<compile_context>
chip_gen: v7x
topology: tpu7x:2x2x1
jax: 0.10.0
libtpu: 0.0.40
codegen_flags: <defaults>
</compile_context>

<pallas_src>
import jax
import jax.numpy as jnp
from jax.experimental import pallas as pl
from jax.experimental.pallas import tpu as pltpu

NUM_CLASSES = 10
DROPOUT_RATE = 0.5   # Dropout is identity in eval/inference mode.

IMAGE_SIZE = 12      # stand-in FrameCNN: 12x12 input, 4x4 patches -> 3x3 spatial
PATCH = 4
C_IN = 3
C_FEAT = 512
N_PATCH = (IMAGE_SIZE // PATCH) ** 2          # 9
KDIM = C_IN * PATCH * PATCH                   # 48
KPAD = 128                                    # zero-padded K (lane-dense)
FC_IN = N_PATCH * C_FEAT                      # 4608
FC_HID = 256
OUT_PAD = 128                                 # lane-dense padded logits width
BLOCK_B = 256                                 # batch tile (128 is plenty on v5e)


def _round_up(n, m):
    return ((n + m - 1) // m) * m


# ----------------------------- Pallas kernel -------------------------------

def _fused_kernel(patches_ref, conv_w_ref, conv_b_ref,
                  fc1_w_ref, fc1_b_ref, fc2_w_ref, fc2_b_ref, o_ref):
    """Fused: patch-conv + ReLU -> Linear(4608,256) + ReLU -> Linear(256,128pad).

    patches: (9, BT, 128) bf16   conv_w: (128, 512) bf16   conv_b: (1, 512) f32
    fc1_w:   (9, 512, 256) bf16 (rows pre-permuted for NCHW flatten order)
    fc1_b:   (1, 256) f32        fc2_w: (256, 128) bf16    fc2_b: (1, 128) f32
    o:       (BT, 128) f32
    """
    bt = patches_ref.shape[1]

    # One merged patch-conv matmul over all 9 patch positions (patch-major rows).
    x = patches_ref[...].reshape(N_PATCH * bt, KPAD)                  # bf16
    feat = jnp.dot(x, conv_w_ref[...], preferred_element_type=jnp.float32)
    feat = jnp.maximum(feat + conv_b_ref[...], 0.0)                   # (9*BT, 512) f32
    feat = feat.astype(jnp.bfloat16)

    # fc1 accumulated over patch positions; start from the bias (f32 accumulator).
    h = jnp.zeros((bt, FC_HID), jnp.float32) + fc1_b_ref[...]
    for p in range(N_PATCH):  # static unroll (9 iters), BT-aligned static slices
        h = h + jnp.dot(feat[p * bt:(p + 1) * bt], fc1_w_ref[p],
                        preferred_element_type=jnp.float32)           # (BT, 256)

    h = jnp.maximum(h, 0.0)
    # Dropout(0.5): identity at inference (no mask applied).
    o_ref[...] = jnp.dot(h.astype(jnp.bfloat16), fc2_w_ref[...],
                         preferred_element_type=jnp.float32) + fc2_b_ref[...]


# ------------------------------ Wrapper -------------------------------------

def fused_forward(patches, conv_w, conv_b, fc1_w, fc1_b, fc2_w, fc2_b, *, block_b):
    n_patch, b_pad, kpad = patches.shape
    assert b_pad % block_b == 0

    def const(nd):
        return lambda i: (0,) * nd

    flops = 2 * b_pad * (N_PATCH * KPAD * C_FEAT + FC_IN * FC_HID + FC_HID * OUT_PAD)
    bytes_accessed = (patches.size * 2 + conv_w.size * 2 + conv_b.size * 4
                      + fc1_w.size * 2 + fc1_b.size * 4 + fc2_w.size * 2
                      + fc2_b.size * 4 + b_pad * OUT_PAD * 4)

    return pl.pallas_call(
        _fused_kernel,
        out_shape=jax.ShapeDtypeStruct((b_pad, OUT_PAD), jnp.float32),
        grid=(b_pad // block_b,),
        in_specs=[
            # streamed per batch tile
            pl.BlockSpec((N_PATCH, block_b, kpad), lambda i: (0, i, 0)),
            # weights/biases: constant block index -> fetched once, VMEM-resident
            pl.BlockSpec(conv_w.shape, const(2)),
            pl.BlockSpec(conv_b.shape, const(2)),
            pl.BlockSpec(fc1_w.shape, const(3)),
            pl.BlockSpec(fc1_b.shape, const(2)),
            pl.BlockSpec(fc2_w.shape, const(2)),
            pl.BlockSpec(fc2_b.shape, const(2)),
        ],
        out_specs=pl.BlockSpec((block_b, OUT_PAD), lambda i: (i, 0)),
        compiler_params=pltpu.CompilerParams(
            dimension_semantics=("parallel",)),
        cost_estimate=pl.CostEstimate(flops=flops, transcendentals=0,
                                      bytes_accessed=bytes_accessed),
    )(patches, conv_w, conv_b, fc1_w, fc1_b, fc2_w, fc2_b)


# --------------------------- Parameter setup --------------------------------

def init_params(key):
    k1, k2, k3, k4, k5, k6 = jax.random.split(key, 6)

    # stand-in FrameCNN conv, (C_in*kh*kw, C_out) matmul form, K zero-padded to 128.
    conv_w = (jax.random.normal(k1, (KDIM, C_FEAT), jnp.float32)
              * (1.0 / jnp.sqrt(KDIM)))
    conv_w_pad = jnp.zeros((KPAD, C_FEAT), jnp.float32).at[:KDIM].set(conv_w)
    conv_w_pad = conv_w_pad.astype(jnp.bfloat16)
    conv_b = jax.random.normal(k2, (1, C_FEAT), jnp.float32) * 0.01

    # fc1 in "PyTorch layout": row j corresponds to flat feature j = c*9 + p
    # (NCHW flatten of the (B, 512, 3, 3) feature map).
    fc1_w = jax.random.normal(k3, (FC_IN, FC_HID), jnp.float32) * (1.0 / jnp.sqrt(FC_IN))
    # Fold the flatten permutation into the weights once:
    #   fc1_w_perm[p, c, :] == fc1_w[c*9 + p, :]
    fc1_w_perm = fc1_w.reshape(C_FEAT, N_PATCH, FC_HID).transpose(1, 0, 2)
    fc1_w_perm = fc1_w_perm.astype(jnp.bfloat16)                  # (9, 512, 256)
    fc1_b = jax.random.normal(k4, (1, FC_HID), jnp.float32) * 0.01

    # fc2, zero-padded from NUM_CLASSES=10 to 128 lanes for lane-dense stores.
    fc2_w = jax.random.normal(k5, (FC_HID, NUM_CLASSES), jnp.float32) * (1.0 / jnp.sqrt(FC_HID))
    fc2_w_pad = jnp.zeros((FC_HID, OUT_PAD), jnp.float32).at[:, :NUM_CLASSES].set(fc2_w)
    fc2_w_pad = fc2_w_pad.astype(jnp.bfloat16)
    fc2_b = jax.random.normal(k6, (1, NUM_CLASSES), jnp.float32) * 0.01
    fc2_b_pad = jnp.zeros((1, OUT_PAD), jnp.float32).at[:, :NUM_CLASSES].set(fc2_b)

    return {
        "conv_w": conv_w_pad, "conv_b": conv_b,
        "fc1_w": fc1_w_perm, "fc1_b": fc1_b,
        "fc2_w": fc2_w_pad, "fc2_b": fc2_b_pad,
    }


# ------------------------------ Forward pass --------------------------------

def output_aggregation_forward(x_nchw, params, *, block_b=BLOCK_B):
    """x_nchw: (B, 3, IMAGE_SIZE, IMAGE_SIZE) float32 -> (B, NUM_CLASSES).

    Upstream callers that process many frames should stack them into one batch
    here: each call amortizes the ~2.4 MiB weight DMA across the whole batch.
    """
    B, C, H, W = x_nchw.shape
    oh, ow = H // PATCH, W // PATCH  # 3, 3

    # Pick a batch tile: at most block_b, at least a bf16-aligned 16 rows.
    bt = min(block_b, _round_up(B, 16))
    b_pad = _round_up(B, bt)

    # im2col glue: (B, C, oh, P, ow, P) -> (p, B, C*P*P), p = oh_idx*3 + ow_idx
    patches = x_nchw.reshape(B, C, oh, PATCH, ow, PATCH)
    patches = patches.transpose(2, 4, 0, 1, 3, 5).reshape(oh * ow, B, KDIM)
    # Zero-pad batch -> b_pad (dead rows sliced off) and K 48 -> 128 (lane-dense).
    patches = jnp.pad(patches, ((0, 0), (0, b_pad - B), (0, KPAD - KDIM)))
    patches = patches.astype(jnp.bfloat16)                        # (9, b_pad, 128)

    # One fused, batch-gridded Pallas kernel: conv+ReLU -> fc1+ReLU -> Dropout(id) -> fc2
    logits_pad = fused_forward(patches,
                               params["conv_w"], params["conv_b"],
                               params["fc1_w"], params["fc1_b"],
                               params["fc2_w"], params["fc2_b"],
                               block_b=bt)                        # (b_pad, 128)
    return logits_pad[:B, :NUM_CLASSES]


# --------------------------------- Main --------------------------------------

if __name__ == "__main__":
    key = jax.random.PRNGKey(0)
    kx, kp = jax.random.split(key)

    B = 2
    x = jax.random.normal(kx, (B, C_IN, IMAGE_SIZE, IMAGE_SIZE), jnp.float32)
    params = init_params(kp)

    out = output_aggregation_forward(x, params)
    out = jax.block_until_ready(out)

    assert out.shape == (B, NUM_CLASSES), out.shape
    assert out.dtype == jnp.float32
    print("KERNEL_OK")
</pallas_src>

<mosaic_0001>
module attributes {stable_mosaic.version = 11 : i64} {
  func.func @_fused_kernel(%arg0: i32, %arg1: memref<9x16x128xbf16, #tpu.memory_space<vmem>>, %arg2: memref<128x512xbf16, #tpu.memory_space<vmem>>, %arg3: memref<1x512xf32, #tpu.memory_space<vmem>>, %arg4: memref<9x512x256xbf16, #tpu.memory_space<vmem>>, %arg5: memref<1x256xf32, #tpu.memory_space<vmem>>, %arg6: memref<256x128xbf16, #tpu.memory_space<vmem>>, %arg7: memref<1x128xf32, #tpu.memory_space<vmem>>, %arg8: memref<16x128xf32, #tpu.memory_space<vmem>>) attributes {dimension_semantics = [#tpu.dimension_semantics<parallel>], iteration_bounds = array<i64: 1>, scalar_prefetch = 0 : i64, scratch_operands = 0 : i64, tpu.core_type = #tpu.core_type<tc>, window_params = [{transform_indices = @transform_0, window_bounds = array<i64: 9, 16, 128>}, {pipeline_mode = #tpu.pipeline_mode<synchronous>, transform_indices = @transform_1, window_bounds = array<i64: 128, 512>}, {pipeline_mode = #tpu.pipeline_mode<synchronous>, transform_indices = @transform_2, window_bounds = array<i64: 1, 512>}, {pipeline_mode = #tpu.pipeline_mode<synchronous>, transform_indices = @transform_3, window_bounds = array<i64: 9, 512, 256>}, {pipeline_mode = #tpu.pipeline_mode<synchronous>, transform_indices = @transform_4, window_bounds = array<i64: 1, 256>}, {pipeline_mode = #tpu.pipeline_mode<synchronous>, transform_indices = @transform_5, window_bounds = array<i64: 256, 128>}, {pipeline_mode = #tpu.pipeline_mode<synchronous>, transform_indices = @transform_6, window_bounds = array<i64: 1, 128>}, {transform_indices = @transform_7, window_bounds = array<i64: 16, 128>}]} {
    %c0 = arith.constant 0 : index
    %c0_0 = arith.constant 0 : index
    %c0_1 = arith.constant 0 : index
    %0 = vector.load %arg1[%c0, %c0_0, %c0_1] : memref<9x16x128xbf16, #tpu.memory_space<vmem>>, vector<9x16x128xbf16>
    %1 = vector.shape_cast %0 : vector<9x16x128xbf16> to vector<144x128xbf16>
    %c0_2 = arith.constant 0 : index
    %c0_3 = arith.constant 0 : index
    %2 = vector.load %arg2[%c0_2, %c0_3] : memref<128x512xbf16, #tpu.memory_space<vmem>>, vector<128x512xbf16>
    %cst = arith.constant dense<0.000000e+00> : vector<144x512xf32>
    %3 = tpu.matmul %1, %2, %cst {dimension_numbers = #tpu.dot_dimension_numbers<[1], [0], [0], [1], [0, 0, 1, 1], [], []>} : vector<144x128xbf16>, vector<128x512xbf16>, vector<144x512xf32> -> vector<144x512xf32>
    %c0_4 = arith.constant 0 : index
    %c0_5 = arith.constant 0 : index
    %4 = vector.load %arg3[%c0_4, %c0_5] : memref<1x512xf32, #tpu.memory_space<vmem>>, vector<1x512xf32>
    %5 = vector.broadcast %4 : vector<1x512xf32> to vector<144x512xf32>
    %6 = arith.addf %3, %5 : vector<144x512xf32>
    %cst_6 = arith.constant 0.000000e+00 : f32
    %7 = vector.broadcast %cst_6 : f32 to vector<144x512xf32>
    %8 = arith.maximumf %6, %7 : vector<144x512xf32>
    %9 = arith.truncf %8 : vector<144x512xf32> to vector<144x512xbf16>
    %cst_7 = arith.constant 0.000000e+00 : f32
    %10 = vector.broadcast %cst_7 : f32 to vector<16x256xf32>
    %c0_8 = arith.constant 0 : index
    %c0_9 = arith.constant 0 : index
    %11 = vector.load %arg5[%c0_8, %c0_9] : memref<1x256xf32, #tpu.memory_space<vmem>>, vector<1x256xf32>
    %12 = vector.broadcast %11 : vector<1x256xf32> to vector<16x256xf32>
    %13 = arith.addf %10, %12 : vector<16x256xf32>
    %14 = vector.extract_strided_slice %9 {offsets = [0, 0], sizes = [16, 512], strides = [1, 1]} : vector<144x512xbf16> to vector<16x512xbf16>
    %c0_10 = arith.constant 0 : index
    %c0_11 = arith.constant 0 : index
    %c0_12 = arith.constant 0 : index
    %15 = vector.load %arg4[%c0_10, %c0_11, %c0_12] : memref<9x512x256xbf16, #tpu.memory_space<vmem>>, vector<1x512x256xbf16>
    %16 = vector.shape_cast %15 : vector<1x512x256xbf16> to vector<512x256xbf16>
    %cst_13 = arith.constant dense<0.000000e+00> : vector<16x256xf32>
    %17 = tpu.matmul %14, %16, %cst_13 {dimension_numbers = #tpu.dot_dimension_numbers<[1], [0], [0], [1], [0, 0, 1, 1], [], []>} : vector<16x512xbf16>, vector<512x256xbf16>, vector<16x256xf32> -> vector<16x256xf32>
    %18 = arith.addf %13, %17 : vector<16x256xf32>
    %19 = vector.extract_strided_slice %9 {offsets = [16, 0], sizes = [16, 512], strides = [1, 1]} : vector<144x512xbf16> to vector<16x512xbf16>
    %c1 = arith.constant 1 : index
    %c0_14 = arith.constant 0 : index
    %c0_15 = arith.constant 0 : index
    %20 = vector.load %arg4[%c1, %c0_14, %c0_15] : memref<9x512x256xbf16, #tpu.memory_space<vmem>>, vector<1x512x256xbf16>
    %21 = vector.shape_cast %20 : vector<1x512x256xbf16> to vector<512x256xbf16>
    %cst_16 = arith.constant dense<0.000000e+00> : vector<16x256xf32>
    %22 = tpu.matmul %19, %21, %cst_16 {dimension_numbers = #tpu.dot_dimension_numbers<[1], [0], [0], [1], [0, 0, 1, 1], [], []>} : vector<16x512xbf16>, vector<512x256xbf16>, vector<16x256xf32> -> vector<16x256xf32>
    %23 = arith.addf %18, %22 : vector<16x256xf32>
    %24 = vector.extract_strided_slice %9 {offsets = [32, 0], sizes = [16, 512], strides = [1, 1]} : vector<144x512xbf16> to vector<16x512xbf16>
    %c2 = arith.constant 2 : index
    %c0_17 = arith.constant 0 : index
    %c0_18 = arith.constant 0 : index
    %25 = vector.load %arg4[%c2, %c0_17, %c0_18] : memref<9x512x256xbf16, #tpu.memory_space<vmem>>, vector<1x512x256xbf16>
    %26 = vector.shape_cast %25 : vector<1x512x256xbf16> to vector<512x256xbf16>
    %cst_19 = arith.constant dense<0.000000e+00> : vector<16x256xf32>
    %27 = tpu.matmul %24, %26, %cst_19 {dimension_numbers = #tpu.dot_dimension_numbers<[1], [0], [0], [1], [0, 0, 1, 1], [], []>} : vector<16x512xbf16>, vector<512x256xbf16>, vector<16x256xf32> -> vector<16x256xf32>
    %28 = arith.addf %23, %27 : vector<16x256xf32>
    %29 = vector.extract_strided_slice %9 {offsets = [48, 0], sizes = [16, 512], strides = [1, 1]} : vector<144x512xbf16> to vector<16x512xbf16>
    %c3 = arith.constant 3 : index
    %c0_20 = arith.constant 0 : index
    %c0_21 = arith.constant 0 : index
    %30 = vector.load %arg4[%c3, %c0_20, %c0_21] : memref<9x512x256xbf16, #tpu.memory_space<vmem>>, vector<1x512x256xbf16>
    %31 = vector.shape_cast %30 : vector<1x512x256xbf16> to vector<512x256xbf16>
    %cst_22 = arith.constant dense<0.000000e+00> : vector<16x256xf32>
    %32 = tpu.matmul %29, %31, %cst_22 {dimension_numbers = #tpu.dot_dimension_numbers<[1], [0], [0], [1], [0, 0, 1, 1], [], []>} : vector<16x512xbf16>, vector<512x256xbf16>, vector<16x256xf32> -> vector<16x256xf32>
    %33 = arith.addf %28, %32 : vector<16x256xf32>
    %34 = vector.extract_strided_slice %9 {offsets = [64, 0], sizes = [16, 512], strides = [1, 1]} : vector<144x512xbf16> to vector<16x512xbf16>
    %c4 = arith.constant 4 : index
    %c0_23 = arith.constant 0 : index
    %c0_24 = arith.constant 0 : index
    %35 = vector.load %arg4[%c4, %c0_23, %c0_24] : memref<9x512x256xbf16, #tpu.memory_space<vmem>>, vector<1x512x256xbf16>
    %36 = vector.shape_cast %35 : vector<1x512x256xbf16> to vector<512x256xbf16>
    %cst_25 = arith.constant dense<0.000000e+00> : vector<16x256xf32>
    %37 = tpu.matmul %34, %36, %cst_25 {dimension_numbers = #tpu.dot_dimension_numbers<[1], [0], [0], [1], [0, 0, 1, 1], [], []>} : vector<16x512xbf16>, vector<512x256xbf16>, vector<16x256xf32> -> vector<16x256xf32>
    %38 = arith.addf %33, %37 : vector<16x256xf32>
    %39 = vector.extract_strided_slice %9 {offsets = [80, 0], sizes = [16, 512], strides = [1, 1]} : vector<144x512xbf16> to vector<16x512xbf16>
    %c5 = arith.constant 5 : index
    %c0_26 = arith.constant 0 : index
    %c0_27 = arith.constant 0 : index
    %40 = vector.load %arg4[%c5, %c0_26, %c0_27] : memref<9x512x256xbf16, #tpu.memory_space<vmem>>, vector<1x512x256xbf16>
    %41 = vector.shape_cast %40 : vector<1x512x256xbf16> to vector<512x256xbf16>
    %cst_28 = arith.constant dense<0.000000e+00> : vector<16x256xf32>
    %42 = tpu.matmul %39, %41, %cst_28 {dimension_numbers = #tpu.dot_dimension_numbers<[1], [0], [0], [1], [0, 0, 1, 1], [], []>} : vector<16x512xbf16>, vector<512x256xbf16>, vector<16x256xf32> -> vector<16x256xf32>
    %43 = arith.addf %38, %42 : vector<16x256xf32>
    %44 = vector.extract_strided_slice %9 {offsets = [96, 0], sizes = [16, 512], strides = [1, 1]} : vector<144x512xbf16> to vector<16x512xbf16>
    %c6 = arith.constant 6 : index
    %c0_29 = arith.constant 0 : index
    %c0_30 = arith.constant 0 : index
    %45 = vector.load %arg4[%c6, %c0_29, %c0_30] : memref<9x512x256xbf16, #tpu.memory_space<vmem>>, vector<1x512x256xbf16>
    %46 = vector.shape_cast %45 : vector<1x512x256xbf16> to vector<512x256xbf16>
    %cst_31 = arith.constant dense<0.000000e+00> : vector<16x256xf32>
    %47 = tpu.matmul %44, %46, %cst_31 {dimension_numbers = #tpu.dot_dimension_numbers<[1], [0], [0], [1], [0, 0, 1, 1], [], []>} : vector<16x512xbf16>, vector<512x256xbf16>, vector<16x256xf32> -> vector<16x256xf32>
    %48 = arith.addf %43, %47 : vector<16x256xf32>
    %49 = vector.extract_strided_slice %9 {offsets = [112, 0], sizes = [16, 512], strides = [1, 1]} : vector<144x512xbf16> to vector<16x512xbf16>
    %c7 = arith.constant 7 : index
    %c0_32 = arith.constant 0 : index
    %c0_33 = arith.constant 0 : index
    %50 = vector.load %arg4[%c7, %c0_32, %c0_33] : memref<9x512x256xbf16, #tpu.memory_space<vmem>>, vector<1x512x256xbf16>
    %51 = vector.shape_cast %50 : vector<1x512x256xbf16> to vector<512x256xbf16>
    %cst_34 = arith.constant dense<0.000000e+00> : vector<16x256xf32>
    %52 = tpu.matmul %49, %51, %cst_34 {dimension_numbers = #tpu.dot_dimension_numbers<[1], [0], [0], [1], [0, 0, 1, 1], [], []>} : vector<16x512xbf16>, vector<512x256xbf16>, vector<16x256xf32> -> vector<16x256xf32>
    %53 = arith.addf %48, %52 : vector<16x256xf32>
    %54 = vector.extract_strided_slice %9 {offsets = [128, 0], sizes = [16, 512], strides = [1, 1]} : vector<144x512xbf16> to vector<16x512xbf16>
    %c8 = arith.constant 8 : index
    %c0_35 = arith.constant 0 : index
    %c0_36 = arith.constant 0 : index
    %55 = vector.load %arg4[%c8, %c0_35, %c0_36] : memref<9x512x256xbf16, #tpu.memory_space<vmem>>, vector<1x512x256xbf16>
    %56 = vector.shape_cast %55 : vector<1x512x256xbf16> to vector<512x256xbf16>
    %cst_37 = arith.constant dense<0.000000e+00> : vector<16x256xf32>
    %57 = tpu.matmul %54, %56, %cst_37 {dimension_numbers = #tpu.dot_dimension_numbers<[1], [0], [0], [1], [0, 0, 1, 1], [], []>} : vector<16x512xbf16>, vector<512x256xbf16>, vector<16x256xf32> -> vector<16x256xf32>
    %58 = arith.addf %53, %57 : vector<16x256xf32>
    %cst_38 = arith.constant 0.000000e+00 : f32
    %59 = vector.broadcast %cst_38 : f32 to vector<16x256xf32>
    %60 = arith.maximumf %58, %59 : vector<16x256xf32>
    %61 = arith.truncf %60 : vector<16x256xf32> to vector<16x256xbf16>
    %c0_39 = arith.constant 0 : index
    %c0_40 = arith.constant 0 : index
    %62 = vector.load %arg6[%c0_39, %c0_40] : memref<256x128xbf16, #tpu.memory_space<vmem>>, vector<256x128xbf16>
    %cst_41 = arith.constant dense<0.000000e+00> : vector<16x128xf32>
    %63 = tpu.matmul %61, %62, %cst_41 {dimension_numbers = #tpu.dot_dimension_numbers<[1], [0], [0], [1], [0, 0, 1, 1], [], []>} : vector<16x256xbf16>, vector<256x128xbf16>, vector<16x128xf32> -> vector<16x128xf32>
    %c0_42 = arith.constant 0 : index
    %c0_43 = arith.constant 0 : index
    %64 = vector.load %arg7[%c0_42, %c0_43] : memref<1x128xf32, #tpu.memory_space<vmem>>, vector<1x128xf32>
    %65 = vector.broadcast %64 : vector<1x128xf32> to vector<16x128xf32>
    %66 = arith.addf %63, %65 : vector<16x128xf32>
    %c0_44 = arith.constant 0 : index
    %c0_45 = arith.constant 0 : index
    %67 = vector.load %arg8[%c0_44, %c0_45] : memref<16x128xf32, #tpu.memory_space<vmem>>, vector<16x128xf32>
    tpu.vector_store %arg8[%c0_44, %c0_45], %66 {strides = array<i32>} : memref<16x128xf32, #tpu.memory_space<vmem>>, vector<16x128xf32>,
    return
  }
  func.func @transform_0(%arg0: i32) -> (i32, i32, i32) {
    %c0_i32 = arith.constant 0 : i32
    %c0_i32_0 = arith.constant 0 : i32
    %c0_i32_1 = arith.constant 0 : i32
    return %c0_i32, %arg0, %c0_i32_0 : i32, i32, i32
  }
  func.func @transform_1(%arg0: i32) -> (i32, i32) {
    %c0_i32 = arith.constant 0 : i32
    %c0_i32_0 = arith.constant 0 : i32
    %c0_i32_1 = arith.constant 0 : i32
    return %c0_i32, %c0_i32_0 : i32, i32
  }
  func.func @transform_2(%arg0: i32) -> (i32, i32) {
    %c0_i32 = arith.constant 0 : i32
    %c0_i32_0 = arith.constant 0 : i32
    %c0_i32_1 = arith.constant 0 : i32
    return %c0_i32, %c0_i32_0 : i32, i32
  }
  func.func @transform_3(%arg0: i32) -> (i32, i32, i32) {
    %c0_i32 = arith.constant 0 : i32
    %c0_i32_0 = arith.constant 0 : i32
    %c0_i32_1 = arith.constant 0 : i32
    %c0_i32_2 = arith.constant 0 : i32
    return %c0_i32, %c0_i32_0, %c0_i32_1 : i32, i32, i32
  }
  func.func @transform_4(%arg0: i32) -> (i32, i32) {
    %c0_i32 = arith.constant 0 : i32
    %c0_i32_0 = arith.constant 0 : i32
    %c0_i32_1 = arith.constant 0 : i32
    return %c0_i32, %c0_i32_0 : i32, i32
  }
  func.func @transform_5(%arg0: i32) -> (i32, i32) {
    %c0_i32 = arith.constant 0 : i32
    %c0_i32_0 = arith.constant 0 : i32
    %c0_i32_1 = arith.constant 0 : i32
    return %c0_i32, %c0_i32_0 : i32, i32
  }
  func.func @transform_6(%arg0: i32) -> (i32, i32) {
    %c0_i32 = arith.constant 0 : i32
    %c0_i32_0 = arith.constant 0 : i32
    %c0_i32_1 = arith.constant 0 : i32
    return %c0_i32, %c0_i32_0 : i32, i32
  }
  func.func @transform_7(%arg0: i32) -> (i32, i32) {
    %c0_i32 = arith.constant 0 : i32
    %c0_i32_0 = arith.constant 0 : i32
    return %arg0, %c0_i32 : i32, i32
  }
}

</mosaic_0001>

<bundles_post_ra>
// kernel: tpu_custom_call.1
= control target key start
LH: loop header
LB: loop body
LE: loop exit
PB: predicated region body
PF: predicated region fallthrough
CT: control target
= control target key end

     0   :  { %12 = vsyncpa [#allocation3], 0  ;;  %s7481_s0 = inlined_call_operand.hbm [shape: bf16[9,16,128], index: 0, kind: input, shape index: {}]   ;;  %s7482_s1 = inlined_call_operand.hbm [shape: bf16[128,512], index: 1, kind: input, shape index: {}]   ;;  %s7483_s2 = inlined_call_operand.hbm [shape: f32[1,512], index: 2, kind: input, shape index: {}]   ;;  %s7484_s3 = inlined_call_operand.hbm [shape: bf16[9,512,256], index: 3, kind: input, shape index: {}]   ;;  %s7485_s4 = inlined_call_operand.hbm [shape: f32[1,256], index: 4, kind: input, shape index: {}]   ;;  %s7486_s5 = inlined_call_operand.hbm [shape: bf16[256,128], index: 5, kind: input, shape index: {}]   ;;  %s7487_s6 = inlined_call_operand.hbm [shape: f32[1,128], index: 6, kind: input, shape index: {}]   ;;  %s7488_s7 = inlined_call_operand.hbm [shape: f32[16,128], index: 7, kind: output, shape index: {}]  }
   0x1   :  { %13 = vsyncpa [#allocation6], 0 }
   0x2   :  { %14 = vsyncpa [#allocation9], 0 }
   0x3   :  { %15 = vsyncpa [#allocation12], 0 }
   0x4   :  { %16 = vsyncpa [#allocation4], 0  ;;  %s7115_s24 = smov [#allocation5]   ;;  %s6929_s28 = scalar_lea.hbm %s7482_s1, 4096 }
   0x5   :  { %s34_s25 = sshll.u32 %s7115_s24, 4  ;;  %p6930_p0 = scmp.ne.s32.totalorder %s7482_s1, %s6929_s28  ;;  %s35_s25 = int_to_ptr.vmem [resolvable:$true] %s34_s25 }
   0x6   :  { %p6933_p1 = scmp.lt.u32.totalorder %s6929_s28, %s7482_s1 }
   0x8   :  { %p6935_p2 = pnand %p6933_p1, %p6930_p0 }
   0xa   :  { %6938 = shalt.err (!%p6935_p2)
}
   0xb   :  { %s6939_s10 = scalar_lea.vmem %s35_s25, 4096  ;;  %p6944_p4 = scmp.lt.s32.totalorder %s35_s25, %s35_s25 }
   0xc   :  { %p6940_p3 = scmp.ne.s32.totalorder %s35_s25, %s6939_s10  ;;  %p6945_p5 = scmp.lt.s32.totalorder %s6939_s10, %s6939_s10 }
   0xe   :  { %p6946_p6 = por %p6945_p5, %p6944_p4 }
  0x10   :  { %p6947_p7 = pnand %p6946_p6, %p6940_p3 }
  0x12   :  { %6950 = shalt.err (!%p6947_p7)
}
  0x13   :  { %s7116_s11 = smov 256   ;;  %s7117_s12 = smov 16  }
  0x14   :  { %40 = dma.hbm_to_vmem [thread:$0]  %s7482_s1, 4096, %s35_s25, [#allocation6], %s7116_s11, %s7116_s11, %s7117_s12  }
  0x15   :  { %s7118_s15 = smov [#allocation8]   ;;  %s6951_s19 = scalar_lea.hbm %s7484_s3, 73728 }
  0x16   :  { %s56_s16 = sshll.u32 %s7118_s15, 4  ;;  %p6952_p8 = scmp.ne.s32.totalorder %s7484_s3, %s6951_s19  ;;  %s57_s16 = int_to_ptr.vmem [resolvable:$true] %s56_s16 }
  0x17   :  { %p6955_p9 = scmp.lt.u32.totalorder %s6951_s19, %s7484_s3 }
  0x19   :  { %p6957_p10 = pnand %p6955_p9, %p6952_p8 }
  0x1b   :  { %6960 = shalt.err (!%p6957_p10)
}
  0x1c   :  { %s6961_s24 = scalar_lea.vmem %s57_s16, 73728  ;;  %p6966_p12 = scmp.lt.s32.totalorder %s57_s16, %s57_s16 }
  0x1d   :  { %p6962_p11 = scmp.ne.s32.totalorder %s57_s16, %s6961_s24  ;;  %p6967_p13 = scmp.lt.s32.totalorder %s6961_s24, %s6961_s24 }
  0x1f   :  { %p6968_p0 = por %p6967_p13, %p6966_p12 }
  0x21   :  { %p6969_p1 = pnand %p6968_p0, %p6962_p11 }
  0x23   :  { %6972 = shalt.err (!%p6969_p1)
}
  0x24   :  { %s7119_s1 = smov 128   ;;  %s7120_s25 = smov 8  }
  0x25   :  { %62 = dma.hbm_to_vmem [thread:$0]  %s7484_s3, 73728, %s57_s16, [#allocation9], %s7119_s1, %s7119_s1, %s7120_s25  }
  0x26   :  { %s7121_s28 = smov [#allocation11]   ;;  %s7122_s30 = smov [#allocation2]  }
  0x27   :  { %s78_s29 = sshll.u32 %s7121_s28, 4  ;;  %s22_s8 = sshll.u32 %s7122_s30, 4  ;;  %s79_s29 = int_to_ptr.vmem [resolvable:$true] %s78_s29  ;;  %s7197_s8 = int_to_ptr.vmem [resolvable:$true] %s22_s8 }
  0x28   :  { %s6973_s11 = scalar_lea.hbm %s7486_s5, 2048 }
  0x29   :  { %p6974_p2 = scmp.ne.s32.totalorder %s7486_s5, %s6973_s11  ;;  %p6977_p3 = scmp.lt.u32.totalorder %s6973_s11, %s7486_s5 }
  0x2b   :  { %p6979_p4 = pnand %p6977_p3, %p6974_p2 }
  0x2d   :  { %6982 = shalt.err (!%p6979_p4)
}
  0x2e   :  { %s6983_s3 = scalar_lea.vmem %s79_s29, 2048  ;;  %p6988_p6 = scmp.lt.s32.totalorder %s79_s29, %s79_s29 }
  0x2f   :  { %p6984_p5 = scmp.ne.s32.totalorder %s79_s29, %s6983_s3  ;;  %p6989_p7 = scmp.lt.s32.totalorder %s6983_s3, %s6983_s3 }
  0x31   :  { %p6990_p8 = por %p6989_p7, %p6988_p6 }
  0x33   :  { %p6991_p9 = pnand %p6990_p8, %p6984_p5 }
  0x35   :  { %6994 = shalt.err (!%p6991_p9)
}
  0x36   :  { %s7123_s16 = smov 64   ;;  %s7124_s17 = smov 4  }
  0x37   :  { %84 = dma.hbm_to_vmem [thread:$0]  %s7486_s5, 2048, %s79_s29, [#allocation12], %s7123_s16, %s7123_s16, %s7124_s17  }
  0x38   :  { %s6995_s22 = scalar_lea.hbm %s7481_s0, 1152 }
  0x39   :  { %p6996_p10 = scmp.ne.s32.totalorder %s7481_s0, %s6995_s22  ;;  %p6999_p11 = scmp.lt.u32.totalorder %s6995_s22, %s7481_s0 }
  0x3b   :  { %p7001_p12 = pnand %p6999_p11, %p6996_p10 }
  0x3d   :  { %7004 = shalt.err (!%p7001_p12)
}
  0x3e   :  { %s7005_s28 = scalar_lea.vmem %s7197_s8, 1152  ;;  %p7010_p0 = scmp.lt.s32.totalorder %s7197_s8, %s7197_s8 }
  0x3f   :  { %p7006_p13 = scmp.ne.s32.totalorder %s7197_s8, %s7005_s28  ;;  %p7011_p1 = scmp.lt.s32.totalorder %s7005_s28, %s7005_s28 }
  0x41   :  { %p7012_p2 = por %p7011_p1, %p7010_p0 }
  0x43   :  { %p7013_p3 = pnand %p7012_p2, %p7006_p13 }
  0x45   :  { %7016 = shalt.err (!%p7013_p3)
}
  0x46   :  { %28 = dma.hbm_to_vmem [thread:$0]  %s7481_s0, 1152, %s7197_s8, [#allocation3], %s7123_s16, %s7123_s16, %s7124_s17  }
  0x47   :  { %s7125_s30 = smov [#allocation7]   ;;  %s7126_s10 = smov [#allocation10]  }
  0x48   :  { %s47_s9 = sshll.u32 %s7125_s30, 4  ;;  %s69_s11 = sshll.u32 %s7126_s10, 4  ;;  %s48_s9 = int_to_ptr.vmem [resolvable:$true] %s47_s9  ;;  %s70_s11 = int_to_ptr.vmem [resolvable:$true] %s69_s11 }
  0x49   :  { %s7017_s14 = scalar_lea.hbm %s7483_s2, 64 }
  0x4a   :  { %p7018_p4 = scmp.ne.s32.totalorder %s7483_s2, %s7017_s14  ;;  %p7021_p5 = scmp.lt.u32.totalorder %s7017_s14, %s7483_s2 }
  0x4c   :  { %p7023_p6 = pnand %p7021_p5, %p7018_p4 }
  0x4e   :  { %7026 = shalt.err (!%p7023_p6)
}
  0x4f   :  { %s7027_s0 = scalar_lea.vmem %s48_s9, 64  ;;  %p7032_p8 = scmp.lt.s32.totalorder %s48_s9, %s48_s9 }
  0x50   :  { %p7028_p7 = scmp.ne.s32.totalorder %s48_s9, %s7027_s0  ;;  %p7033_p9 = scmp.lt.s32.totalorder %s7027_s0, %s7027_s0 }
  0x52   :  { %p7034_p10 = por %p7033_p9, %p7032_p8 }
  0x54   :  { %p7035_p11 = pnand %p7034_p10, %p7028_p7 }
  0x56   :  { %7038 = shalt.err (!%p7035_p11)
}
  0x57   :  { %50 = dma.hbm_to_vmem [thread:$0]  %s7483_s2, 64, %s48_s9, [#allocation6]  }
  0x58   :  { %s7039_s21 = scalar_lea.hbm %s7485_s4, 32 }
  0x59   :  { %p7040_p12 = scmp.ne.s32.totalorder %s7485_s4, %s7039_s21  ;;  %p7043_p13 = scmp.lt.u32.totalorder %s7039_s21, %s7485_s4 }
  0x5b   :  { %p7045_p0 = pnand %p7043_p13, %p7040_p12 }
  0x5d   :  { %7048 = shalt.err (!%p7045_p0)
}
  0x5e   :  { %s7049_s27 = scalar_lea.vmem %s70_s11, 32  ;;  %p7054_p2 = scmp.lt.s32.totalorder %s70_s11, %s70_s11 }
  0x5f   :  { %p7050_p1 = scmp.ne.s32.totalorder %s70_s11, %s7049_s27  ;;  %p7055_p3 = scmp.lt.s32.totalorder %s7049_s27, %s7049_s27 }
  0x61   :  { %p7056_p4 = por %p7055_p3, %p7054_p2 }
  0x63   :  { %p7057_p5 = pnand %p7056_p4, %p7050_p1 }
  0x65   :  { %7060 = shalt.err (!%p7057_p5)
}
  0x66   :  { %72 = dma.hbm_to_vmem [thread:$0]  %s7485_s4, 32, %s70_s11, [#allocation9]  }
  0x67   :  { %s7127_s5 = smov [#allocation13]   ;;  %s7061_s10 = scalar_lea.hbm %s7487_s6, 16 }
  0x68   :  { %s91_s29 = sshll.u32 %s7127_s5, 4  ;;  %p7062_p6 = scmp.ne.s32.totalorder %s7487_s6, %s7061_s10  ;;  %s92_s29 = int_to_ptr.vmem [resolvable:$true] %s91_s29 }
  0x69   :  { %p7065_p7 = scmp.lt.u32.totalorder %s7061_s10, %s7487_s6 }
  0x6b   :  { %p7067_p8 = pnand %p7065_p7, %p7062_p6 }
  0x6d   :  { %7070 = shalt.err (!%p7067_p8)
}
  0x6e   :  { %s7071_s3 = scalar_lea.vmem %s92_s29, 16  ;;  %s7075_s4 = scalar_lea.vmem %s92_s29, 32 }
  0x6f   :  { %p7072_p9 = scmp.ne.s32.totalorder %s92_s29, %s7071_s3  ;;  %p7076_p10 = scmp.lt.s32.totalorder %s92_s29, %s92_s29 }
  0x70   :  { %p7077_p11 = scmp.lt.s32.totalorder %s7075_s4, %s7071_s3 }
  0x72   :  { %p7078_p12 = por %p7077_p11, %p7076_p10 }
  0x74   :  { %p7079_p13 = pnand %p7078_p12, %p7072_p9 }
  0x76   :  { %7082 = shalt.err (!%p7079_p13)
}
  0x77   :  { %94 = dma.hbm_to_vmem [thread:$0]  %s7487_s6, 16, %s92_s29, [#allocation12]  }
  0x78   :  { %7105 = dma.done.wait [#allocation3], 1152  }
  0x79   :  { %7106 = vsyncadd [#allocation3], 4294966144 }
  0x7a   :  { %7107 = dma.done.wait [#allocation6], 4160  }
  0x7b   :  { %7108 = vsyncadd [#allocation6], 4294963136 }
  0x7c   :  { %7109 = dma.done.wait [#allocation9], 73760  }
  0x7d   :  { %7110 = vsyncadd [#allocation9], 4294893536 }
  0x7e   :  { %7111 = dma.done.wait [#allocation12], 2064  }
  0x7f   :  { %7112 = vsyncadd [#allocation12], 4294965232  ;;  %v7128_v0 = vmov 0   ;;  %v5992_v1 = vld [vmem:[#allocation5 + $0x4] ss:$16 sps:$4 sm:$0xff]   ;;  %v6040_v34 = vld [vmem:[#allocation2] sm:$0xff]  }
  0x80   :  { %435 = vmatprep.mubr.bf16.mxu0 %v7128_v0  ;;  %558 = vmatprep.mubr.bf16.mxu1 %v7128_v0  ;;  %v5994_v2 = vld [vmem:[#allocation5 + $0xc] ss:$16 sps:$4 sm:$0xff]   ;;  %v5996_v3 = vld [vmem:[#allocation5] ss:$16 sps:$4 sm:$0xff]   ;;  %v5997_v4 = vld [vmem:[#allocation5 + $0x8] ss:$16 sps:$4 sm:$0xff]  }
  0x81   :  { %403 = vmatprep.subr.bf16.mxu0 %v5992_v1  ;;  %526 = vmatprep.subr.bf16.mxu1 %v5994_v2  ;;  %v5998_v5 = vld [vmem:[#allocation5 + $0x24] ss:$16 sps:$4 sm:$0xff]   ;;  %v6000_v6 = vld [vmem:[#allocation5 + $0x2c] ss:$16 sps:$4 sm:$0xff]   ;;  %v6002_v7 = vld [vmem:[#allocation5 + $0x20] ss:$16 sps:$4 sm:$0xff]  }
  0x82   :  { %404 = vmatpush1.bf16.msra.mxu0 %v5996_v3  ;;  %527 = vmatpush1.bf16.msra.mxu1 %v5997_v4  ;;  %v6003_v8 = vld [vmem:[#allocation5 + $0x28] ss:$16 sps:$4 sm:$0xff]   ;;  %v6004_v9 = vld [vmem:[#allocation5 + $0x44] ss:$16 sps:$4 sm:$0xff]   ;;  %v6006_v10 = vld [vmem:[#allocation5 + $0x4c] ss:$16 sps:$4 sm:$0xff]  }
  0x83   :  { %405 = vmatprep.subr.bf16.mxu0 %v5998_v5  ;;  %528 = vmatprep.subr.bf16.mxu1 %v6000_v6  ;;  %v6008_v11 = vld [vmem:[#allocation5 + $0x40] ss:$16 sps:$4 sm:$0xff]   ;;  %v6009_v12 = vld [vmem:[#allocation5 + $0x48] ss:$16 sps:$4 sm:$0xff]   ;;  %v6010_v13 = vld [vmem:[#allocation5 + $0x64] ss:$16 sps:$4 sm:$0xff]  }
  0x84   :  { %v6012_v14 = vld [vmem:[#allocation5 + $0x6c] ss:$16 sps:$4 sm:$0xff]   ;;  %v6014_v15 = vld [vmem:[#allocation5 + $0x60] ss:$16 sps:$4 sm:$0xff]   ;;  %v6015_v16 = vld [vmem:[#allocation5 + $0x68] ss:$16 sps:$4 sm:$0xff]  }
  0x85   :  { %v6016_v17 = vld [vmem:[#allocation5 + $0x84] ss:$16 sps:$4 sm:$0xff]   ;;  %v6018_v18 = vld [vmem:[#allocation5 + $0x8c] ss:$16 sps:$4 sm:$0xff]   ;;  %v6020_v19 = vld [vmem:[#allocation5 + $0x80] ss:$16 sps:$4 sm:$0xff]  }
  0x86   :  { %406 = vmatpush1.bf16.msra.mxu0 %v6002_v7  ;;  %529 = vmatpush1.bf16.msra.mxu1 %v6003_v8  ;;  %v6021_v20 = vld [vmem:[#allocation5 + $0x88] ss:$16 sps:$4 sm:$0xff]   ;;  %v6022_v21 = vld [vmem:[#allocation5 + $0xa4] ss:$16 sps:$4 sm:$0xff]   ;;  %v6024_v22 = vld [vmem:[#allocation5 + $0xac] ss:$16 sps:$4 sm:$0xff]  }
  0x87   :  { %407 = vmatprep.subr.bf16.mxu0 %v6004_v9  ;;  %530 = vmatprep.subr.bf16.mxu1 %v6006_v10  ;;  %v6026_v23 = vld [vmem:[#allocation5 + $0xa0] ss:$16 sps:$4 sm:$0xff]   ;;  %v6027_v24 = vld [vmem:[#allocation5 + $0xa8] ss:$16 sps:$4 sm:$0xff]   ;;  %v6028_v25 = vld [vmem:[#allocation5 + $0xc4] ss:$16 sps:$4 sm:$0xff]  }
  0x88   :  { %v6030_v26 = vld [vmem:[#allocation5 + $0xcc] ss:$16 sps:$4 sm:$0xff]   ;;  %v6032_v27 = vld [vmem:[#allocation5 + $0xc0] ss:$16 sps:$4 sm:$0xff]   ;;  %v6033_v28 = vld [vmem:[#allocation5 + $0xc8] ss:$16 sps:$4 sm:$0xff]  }
  0x89   :  { %v6034_v29 = vld [vmem:[#allocation5 + $0xe4] ss:$16 sps:$4 sm:$0xff]   ;;  %v6036_v30 = vld [vmem:[#allocation5 + $0xec] ss:$16 sps:$4 sm:$0xff]   ;;  %v6038_v31 = vld [vmem:[#allocation5 + $0xe0] ss:$16 sps:$4 sm:$0xff]  }
  0x8a   :  { %408 = vmatpush1.bf16.msra.mxu0 %v6008_v11  ;;  %531 = vmatpush1.bf16.msra.mxu1 %v6009_v12  ;;  %v6039_v32 = vld [vmem:[#allocation5 + $0xe8] ss:$16 sps:$4 sm:$0xff]   ;;  %v6046_v35 = vld [vmem:[#allocation8] ss:$8 sps:$4 sm:$0xff]   ;;  %v6049_v37 = vld [vmem:[#allocation8 + $0x10] ss:$8 sps:$4 sm:$0xff]  }
  0x8b   :  { %409 = vmatprep.subr.bf16.mxu0 %v6010_v13  ;;  %532 = vmatprep.subr.bf16.mxu1 %v6012_v14  ;;  %v6048_v33 = vld [vmem:[#allocation8 + $0x4] ss:$8 sps:$4 sm:$0xff]   ;;  %v6051_v36 = vld [vmem:[#allocation8 + $0x14] ss:$8 sps:$4 sm:$0xff]   ;;  %v6067_v38 = vld [vmem:[#allocation8 + $0x900] ss:$8 sps:$4 sm:$0xff]  }
  0x8c   :  { %v6069_v39 = vld [vmem:[#allocation8 + $0x904] ss:$8 sps:$4 sm:$0xff]   ;;  %v6041_v41 = vld [vmem:[#allocation2 + $0x8] sm:$0xff]   ;;  %v6073_v44 = vld [vmem:[#allocation8 + $0x910] ss:$8 sps:$4 sm:$0xff]   ;;  %s7129_s6 = smov [#allocation14]  }
  0x8d   :  { %v6054_v40 = vld [vmem:[#allocation8 + $0x24] ss:$8 sps:$4 sm:$0xff]   ;;  %v6075_v42 = vld [vmem:[#allocation8 + $0x914] ss:$8 sps:$4 sm:$0xff]   ;;  %v6052_v43 = vld [vmem:[#allocation8 + $0x20] ss:$8 sps:$4 sm:$0xff]  }
  0x8e   :  { %410 = vmatpush1.bf16.msra.mxu0 %v6014_v15  ;;  %533 = vmatpush1.bf16.msra.mxu1 %v6015_v16  ;;  %v6057_v45 = vld [vmem:[#allocation8 + $0x34] ss:$8 sps:$4 sm:$0xff]   ;;  %v6081_v46 = vld [vmem:[#allocation8 + $0x924] ss:$8 sps:$4 sm:$0xff]   ;;  %v6055_v47 = vld [vmem:[#allocation8 + $0x30] ss:$8 sps:$4 sm:$0xff]  }
  0x8f   :  { %411 = vmatprep.subr.bf16.mxu0 %v6016_v17  ;;  %534 = vmatprep.subr.bf16.mxu1 %v6018_v18  ;;  %v6060_v48 = vld [vmem:[#allocation8 + $0x44] ss:$8 sps:$4 sm:$0xff]   ;;  %v6079_v49 = vld [vmem:[#allocation8 + $0x920] ss:$8 sps:$4 sm:$0xff]   ;;  %v6087_v50 = vld [vmem:[#allocation8 + $0x934] ss:$8 sps:$4 sm:$0xff]  }
  0x90   :  { %v6042_v51 = vld [vmem:[#allocation2 + $0x10] sm:$0xff]   ;;  %v6085_v53 = vld [vmem:[#allocation8 + $0x930] ss:$8 sps:$4 sm:$0xff]   ;;  %v6063_v54 = vld [vmem:[#allocation8 + $0x54] ss:$8 sps:$4 sm:$0xff]   ;;  %s5234_s19 = sshll.u32 %s7129_s6, 4  ;;  %s5235_s19 = int_to_ptr.vmem [resolvable:$true] %s5234_s19 }
  0x91   :  { %v6058_v52 = vld [vmem:[#allocation8 + $0x40] ss:$8 sps:$4 sm:$0xff]   ;;  %v6094_v55 = vld [vmem:[#allocation8 + $0x944] ss:$8 sps:$4 sm:$0xff]   ;;  %v6061_v56 = vld [vmem:[#allocation8 + $0x50] ss:$8 sps:$4 sm:$0xff]   ;;  %p7088_p1 = scmp.lt.s32.totalorder %s5235_s19, %s5235_s19 }
  0x92   :  { %412 = vmatpush1.bf16.msra.mxu0 %v6020_v19  ;;  %535 = vmatpush1.bf16.msra.mxu1 %v6021_v20  ;;  %v6066_v57 = vld [vmem:[#allocation8 + $0x64] ss:$8 sps:$4 sm:$0xff]   ;;  %v6092_v58 = vld [vmem:[#allocation8 + $0x940] ss:$8 sps:$4 sm:$0xff]   ;;  %v6100_v59 = vld [vmem:[#allocation8 + $0x954] ss:$8 sps:$4 sm:$0xff]  }
  0x93   :  { %413 = vmatprep.subr.bf16.mxu0 %v6022_v21  ;;  %536 = vmatprep.subr.bf16.mxu1 %v6024_v22  ;;  %v6043_v60 = vld [vmem:[#allocation2 + $0x18] sm:$0xff]   ;;  %v6064_v61 = vld [vmem:[#allocation8 + $0x60] ss:$8 sps:$4 sm:$0xff]   ;;  %v6072_v62 = vld [vmem:[#allocation8 + $0x74] ss:$8 sps:$4 sm:$0xff]   ;;  %s7083_s0 = scalar_lea.vmem %s5235_s19, 256 }
  0x94   :  { %v6098_v63 = vld [vmem:[#allocation8 + $0x950] ss:$8 sps:$4 sm:$0xff]   ;;  %v6107_v1 = vld [vmem:[#allocation8 + $0x964] ss:$8 sps:$4 sm:$0xff]   ;;  %v6105_v3 = vld [vmem:[#allocation8 + $0x960] ss:$8 sps:$4 sm:$0xff]   ;;  %p7084_p0 = scmp.ne.s32.totalorder %s5235_s19, %s7083_s0  ;;  %p7089_p2 = scmp.lt.s32.totalorder %s7083_s0, %s7083_s0 }
  0x95   :  { %v6070_v2 = vld [vmem:[#allocation8 + $0x70] ss:$8 sps:$4 sm:$0xff]   ;;  %v6078_v4 = vld [vmem:[#allocation8 + $0x84] ss:$8 sps:$4 sm:$0xff]   ;;  %v6076_v6 = vld [vmem:[#allocation8 + $0x80] ss:$8 sps:$4 sm:$0xff]  }
  0x96   :  { %414 = vmatpush1.bf16.msra.mxu0 %v6026_v23  ;;  %537 = vmatpush1.bf16.msra.mxu1 %v6027_v24  ;;  %v6044_v5 = vld [vmem:[#allocation2 + $0x20] sm:$0xff]   ;;  %v6090_v9 = vld [vmem:[#allocation8 + $0xa4] ss:$8 sps:$4 sm:$0xff]   ;;  %v6045_v10 = vld [vmem:[#allocation2 + $0x28] sm:$0xff]   ;;  %p7090_p3 = por %p7089_p2, %p7088_p1 }
  0x97   :  { %415 = vmatprep.subr.bf16.mxu0 %v6028_v25  ;;  %538 = vmatprep.subr.bf16.mxu1 %v6030_v26  ;;  %v6084_v7 = vld [vmem:[#allocation8 + $0x94] ss:$8 sps:$4 sm:$0xff]   ;;  %v6082_v8 = vld [vmem:[#allocation8 + $0x90] ss:$8 sps:$4 sm:$0xff]   ;;  %v6088_v11 = vld [vmem:[#allocation8 + $0xa0] ss:$8 sps:$4 sm:$0xff]  }
  0x98   :  { %v6097_v12 = vld [vmem:[#allocation8 + $0xb4] ss:$8 sps:$4 sm:$0xff]   ;;  %v6095_v13 = vld [vmem:[#allocation8 + $0xb0] ss:$8 sps:$4 sm:$0xff]   ;;  %v6103_v14 = vld [vmem:[#allocation8 + $0xc4] ss:$8 sps:$4 sm:$0xff]   ;;  %p7091_p4 = pnand %p7090_p3, %p7084_p0 }
  0x99   :  { %v6091_v15 = vld [vmem:[#allocation2 + $0x30] sm:$0xff]   ;;  %v6110_v17 = vld [vmem:[#allocation8 + $0xd4] ss:$8 sps:$4 sm:$0xff]   ;;  %v6108_v18 = vld [vmem:[#allocation8 + $0xd0] ss:$8 sps:$4 sm:$0xff]  }
  0x9a   :  { %416 = vmatpush1.bf16.msra.mxu0 %v6032_v27  ;;  %539 = vmatpush1.bf16.msra.mxu1 %v6033_v28  ;;  %v6101_v16 = vld [vmem:[#allocation8 + $0xc0] ss:$8 sps:$4 sm:$0xff]   ;;  %v6104_v19 = vld [vmem:[#allocation2 + $0x38] sm:$0xff]   ;;  %v6117_v22 = vld [vmem:[#allocation2 + $0x40] sm:$0xff]  }
  0x9b   :  { %417 = vmatprep.subr.bf16.mxu0 %v6034_v29  ;;  %540 = vmatprep.subr.bf16.mxu1 %v6036_v30  ;;  %v6113_v20 = vld [vmem:[#allocation8 + $0xe4] ss:$8 sps:$4 sm:$0xff]   ;;  %v6111_v21 = vld [vmem:[#allocation8 + $0xe0] ss:$8 sps:$4 sm:$0xff]   ;;  %v6116_v23 = vld [vmem:[#allocation8 + $0x974] ss:$8 sps:$4 sm:$0xff]  }
  0x9c   :  { %v6120_v24 = vld [vmem:[#allocation8 + $0xf4] ss:$8 sps:$4 sm:$0xff]   ;;  %v6114_v25 = vld [vmem:[#allocation8 + $0x970] ss:$8 sps:$4 sm:$0xff]   ;;  %v6121_v27 = vld [vmem:[#allocation8 + $0x980] ss:$8 sps:$4 sm:$0xff]  }
  0x9d   :  { %v6118_v26 = vld [vmem:[#allocation8 + $0xf0] ss:$8 sps:$4 sm:$0xff]   ;;  %v6123_v28 = vld [vmem:[#allocation8 + $0x984] ss:$8 sps:$4 sm:$0xff]  }
  0x9e   :  { %418 = vmatpush1.bf16.msra.mxu0 %v6038_v31  ;;  %541 = vmatpush1.bf16.msra.mxu1 %v6039_v32  ;;  %v6126_v29 = vld [vmem:[#allocation8 + $0x104] ss:$8 sps:$4 sm:$0xff]   ;;  %v6127_v30 = vld [vmem:[#allocation8 + $0x990] ss:$8 sps:$4 sm:$0xff]   ;;  %v6133_v31 = vld [vmem:[#allocation8 + $0x9a0] ss:$8 sps:$4 sm:$0xff]  }
  0x9f   :  { %1155 = vmatprep.subr.bf16.mxu1 %v6048_v33  ;;  %3098 = vmatprep.subr.bf16.mxu0 %v6069_v39  ;;  %v6135_v32 = vld [vmem:[#allocation8 + $0x9a4] ss:$8 sps:$4 sm:$0xff]   ;;  %v6141_v33 = vld [vmem:[#allocation8 + $0x9b4] ss:$8 sps:$4 sm:$0xff]  }
  0xa0   :  { %v6159_v39 = vld [vmem:[#allocation8 + $0x9e4] ss:$8 sps:$4 sm:$0xff]  }
  0xa1   :  { %436 = vmatmul.mubr.bf16.vlgmr.msra.gmra.mrb[0].mxu0 %v6040_v34  ;;  %559 = vmatmul.mubr.bf16.vlgmr.msra.gmra.mrb[0].mxu1 %v6040_v34  ;;  %v6139_v34 = vld [vmem:[#allocation8 + $0x9b0] ss:$8 sps:$4 sm:$0xff]  }
  0xa2   :  { %568 = vmatprep.mubr.bf16.mxu1 %v7128_v0  ;;  %445 = vmatprep.mubr.bf16.mxu0 %v7128_v0 }
  0xa3   :  { %1156 = vmatpush1.bf16.msra.mxu1 %v6046_v35  ;;  %3099 = vmatpush1.bf16.msra.mxu0 %v6067_v38  ;;  %v6147_v35 = vld [vmem:[#allocation8 + $0x9c4] ss:$8 sps:$4 sm:$0xff]   ;;  %v6151_v38 = vld [vmem:[#allocation8 + $0x9d0] ss:$8 sps:$4 sm:$0xff]  }
  0xa4   :  { %1157 = vmatprep.subr.bf16.mxu1 %v6051_v36  ;;  %3100 = vmatprep.subr.bf16.mxu0 %v6075_v42  ;;  %v6145_v36 = vld [vmem:[#allocation8 + $0x9c0] ss:$8 sps:$4 sm:$0xff]   ;;  %v6166_v42 = vld [vmem:[#allocation8 + $0x9f0] ss:$8 sps:$4 sm:$0xff]  }
  0xa7   :  { %1158 = vmatpush1.bf16.msra.mxu1 %v6049_v37  ;;  %3101 = vmatpush1.bf16.msra.mxu0 %v6073_v44  ;;  %v6153_v37 = vld [vmem:[#allocation8 + $0x9d4] ss:$8 sps:$4 sm:$0xff]   ;;  %v169_v44 = vlaneseq }
  0xa8   :  { %1159 = vmatprep.subr.bf16.mxu1 %v6054_v40  ;;  %3102 = vmatprep.subr.bf16.mxu0 %v6081_v46  ;;  %v6157_v40 = vld [vmem:[#allocation8 + $0x9e0] ss:$8 sps:$4 sm:$0xff]  }
  0xa9   :  { %569 = vmatmul.mubr.bf16.gmra.mrb[4].mxu1 %v6041_v41  ;;  %446 = vmatmul.mubr.bf16.gmra.mrb[4].mxu0 %v6041_v41  ;;  %v6168_v41 = vld [vmem:[#allocation8 + $0x9f4] ss:$8 sps:$4 sm:$0xff]  }
  0xaa   :  { %578 = vmatprep.mubr.bf16.mxu1 %v7128_v0  ;;  %455 = vmatprep.mubr.bf16.mxu0 %v7128_v0 }
  0xab   :  { %1160 = vmatpush1.bf16.msra.mxu1 %v6052_v43  ;;  %3103 = vmatpush1.bf16.msra.mxu0 %v6079_v49  ;;  %v6174_v43 = vld [vmem:[#allocation8 + $0xa04] ss:$8 sps:$4 sm:$0xff]  }
  0xac   :  { %1161 = vmatprep.subr.bf16.mxu1 %v6057_v45  ;;  %3104 = vmatprep.subr.bf16.mxu0 %v6087_v50  ;;  %v7282_v45 = vshrl.u32 %v169_v44, 7 }
  0xae   :  { %v171_v46 = vsub.s32 0, %v7282_v45  ;;  %v175_v49 = vsub.s32 1, %v7282_v45  ;;  %v183_v50 = vsub.s32 3, %v7282_v45 }
  0xaf   :  { %1162 = vmatpush1.bf16.msra.mxu1 %v6055_v47  ;;  %3105 = vmatpush1.bf16.msra.mxu0 %v6085_v53  ;;  %v179_v47 = vsub.s32 2, %v7282_v45 }
  0xb0   :  { %1163 = vmatprep.subr.bf16.mxu1 %v6060_v48  ;;  %3106 = vmatprep.subr.bf16.mxu0 %v6094_v55  ;;  %v167_v48 = vld [vmem:[#allocation7] sm:$0xf] }
  0xb1   :  { %579 = vmatmul.mubr.bf16.gmra.mrb[8].mxu1 %v6042_v51  ;;  %456 = vmatmul.mubr.bf16.gmra.mrb[8].mxu0 %v6042_v51  ;;  %v7290_v51 = vrot.slane %v167_v48, %v171_v46  ;;  %v7296_v53 = vrot.slane %v167_v48, %v175_v49 }
  0xb2   :  { %588 = vmatprep.mubr.bf16.mxu1 %v7128_v0  ;;  %465 = vmatprep.mubr.bf16.mxu0 %v7128_v0 }
  0xb3   :  { %1164 = vmatpush1.bf16.msra.mxu1 %v6058_v52  ;;  %3107 = vmatpush1.bf16.msra.mxu0 %v6092_v58  ;;  %v7292_v52 = vrot.slane %v167_v48, %v179_v47 }
  0xb4   :  { %1165 = vmatprep.subr.bf16.mxu1 %v6063_v54  ;;  %3108 = vmatprep.subr.bf16.mxu0 %v6100_v59  ;;  %v7298_v54 = vrot.slane %v167_v48, %v183_v50  ;;  %v6136_v48 = vld [vmem:[#allocation8 + $0x120] ss:$8 sps:$4 sm:$0xff]  }
  0xb7   :  { %1166 = vmatpush1.bf16.msra.mxu1 %v6061_v56  ;;  %3109 = vmatpush1.bf16.msra.mxu0 %v6098_v63 }
  0xb8   :  { %1167 = vmatprep.subr.bf16.mxu1 %v6066_v57  ;;  %3110 = vmatprep.subr.bf16.mxu0 %v6107_v1 }
  0xb9   :  { %589 = vmatmul.mubr.bf16.gmra.mrb[12].mxu1 %v6043_v60  ;;  %466 = vmatmul.mubr.bf16.gmra.mrb[12].mxu0 %v6043_v60 }
  0xba   :  { %598 = vmatprep.mubr.bf16.mxu1 %v7128_v0  ;;  %475 = vmatprep.mubr.bf16.mxu0 %v7128_v0 }
  0xbb   :  { %1168 = vmatpush1.bf16.msra.mxu1 %v6064_v61  ;;  %3111 = vmatpush1.bf16.msra.mxu0 %v6105_v3 }
  0xbc   :  { %1169 = vmatprep.subr.bf16.mxu1 %v6072_v62  ;;  %3112 = vmatprep.subr.bf16.mxu0 %v6116_v23 }
  0xbf   :  { %1170 = vmatpush1.bf16.msra.mxu1 %v6070_v2  ;;  %3113 = vmatpush1.bf16.msra.mxu0 %v6114_v25 }
  0xc0   :  { %1171 = vmatprep.subr.bf16.mxu1 %v6078_v4  ;;  %3114 = vmatprep.subr.bf16.mxu0 %v6123_v28 }
  0xc1   :  { %599 = vmatmul.mubr.bf16.gmra.mrb[16].mxu1 %v6044_v5  ;;  %476 = vmatmul.mubr.bf16.gmra.mrb[16].mxu0 %v6044_v5 }
  0xc2   :  { %485 = vmatprep.mubr.bf16.mxu0 %v7128_v0  ;;  %608 = vmatprep.mubr.bf16.mxu1 %v7128_v0 }
  0xc3   :  { %1172 = vmatpush1.bf16.msra.mxu1 %v6076_v6  ;;  %3115 = vmatpush1.bf16.msra.mxu0 %v6121_v27 }
  0xc4   :  { %1173 = vmatprep.subr.bf16.mxu1 %v6084_v7 }
  0xc7   :  { %1174 = vmatpush1.bf16.msra.mxu1 %v6082_v8 }
  0xc8   :  { %1175 = vmatprep.subr.bf16.mxu1 %v6090_v9 }
  0xc9   :  { %486 = vmatmul.mubr.bf16.gmra.mrb[20].mxu0 %v6045_v10  ;;  %609 = vmatmul.mubr.bf16.gmra.mrb[20].mxu1 %v6045_v10 }
  0xca   :  { %618 = vmatprep.mubr.bf16.mxu1 %v7128_v0  ;;  %495 = vmatprep.mubr.bf16.mxu0 %v7128_v0 }
  0xcb   :  { %1176 = vmatpush1.bf16.msra.mxu1 %v6088_v11 }
  0xcc   :  { %1177 = vmatprep.subr.bf16.mxu1 %v6097_v12 }
  0xcf   :  { %1178 = vmatpush1.bf16.msra.mxu1 %v6095_v13 }
  0xd0   :  { %1179 = vmatprep.subr.bf16.mxu1 %v6103_v14 }
  0xd1   :  { %619 = vmatmul.mubr.bf16.gmra.mrb[24].mxu1 %v6091_v15  ;;  %496 = vmatmul.mubr.bf16.gmra.mrb[24].mxu0 %v6091_v15 }
  0xd2   :  { %628 = vmatprep.mubr.bf16.mxu1 %v7128_v0  ;;  %505 = vmatprep.mubr.bf16.mxu0 %v7128_v0 }
  0xd3   :  { %1180 = vmatpush1.bf16.msra.mxu1 %v6101_v16  ;;  %v6124_v16 = vld [vmem:[#allocation8 + $0x100] ss:$8 sps:$4 sm:$0xff]  }
  0xd4   :  { %1181 = vmatprep.subr.bf16.mxu1 %v6110_v17 }
  0xd7   :  { %1182 = vmatpush1.bf16.msra.mxu1 %v6108_v18 }
  0xd8   :  { %1183 = vmatprep.subr.bf16.mxu1 %v6113_v20 }
  0xd9   :  { %629 = vmatmul.mubr.bf16.gmra.mrb[28].mxu1 %v6104_v19  ;;  %506 = vmatmul.mubr.bf16.gmra.mrb[28].mxu0 %v6104_v19  ;;  %v6132_v19 = vld [vmem:[#allocation8 + $0x114] ss:$8 sps:$4 sm:$0xff]  }
  0xda   :  { %638 = vmatprep.mubr.bf16.mxu1 %v7128_v0  ;;  %515 = vmatprep.mubr.bf16.mxu0 %v7128_v0  ;;  %v6129_v0 = vld [vmem:[#allocation8 + $0x994] ss:$8 sps:$4 sm:$0xff]  }
  0xdb   :  { %1184 = vmatpush1.bf16.msra.mxu1 %v6111_v21  ;;  %3116 = vmatprep.subr.bf16.mxu0 %v6129_v0 }
  0xdc   :  { %1185 = vmatprep.subr.bf16.mxu1 %v6120_v24  ;;  %3117 = vmatpush1.bf16.msra.mxu0 %v6127_v30 }
  0xdd   :  { %3118 = vmatprep.subr.bf16.mxu0 %v6135_v32 }
  0xdf   :  { %1186 = vmatpush1.bf16.msra.mxu1 %v6118_v26 }
  0xe0   :  { %1198 = vmatprep.subr.bf16.mxu1 %v6126_v29  ;;  %3119 = vmatpush1.bf16.msra.mxu0 %v6133_v31 }
  0xe1   :  { %639 = vmatmul.mubr.bf16.gmra.mrb[32].mxu1 %v6117_v22  ;;  %516 = vmatmul.mubr.bf16.gmra.mrb[32].mxu0 %v6117_v22 }
  0xe2   :  { %3120 = vmatprep.subr.bf16.mxu0 %v6141_v33 }
  0xe4   :  { %3121 = vmatpush1.bf16.msra.mxu0 %v6139_v34 }
  0xe5   :  { %3122 = vmatprep.subr.bf16.mxu0 %v6147_v35 }
  0xe8   :  { %3123 = vmatpush1.bf16.msra.mxu0 %v6145_v36 }
  0xe9   :  { %3124 = vmatprep.subr.bf16.mxu0 %v6153_v37  ;;  %v6130_v37 = vld [vmem:[#allocation8 + $0x110] ss:$8 sps:$4 sm:$0xff]  }
  0xec   :  { %3125 = vmatpush1.bf16.msra.mxu0 %v6151_v38 }
  0xed   :  { %3126 = vmatprep.subr.bf16.mxu0 %v6159_v39 }
  0xf0   :  { %3127 = vmatpush1.bf16.msra.mxu0 %v6157_v40 }
  0xf1   :  { %3128 = vmatprep.subr.bf16.mxu0 %v6168_v41 }
  0xf4   :  { %3129 = vmatpush1.bf16.msra.mxu0 %v6166_v42  ;;  %v6138_v42 = vld [vmem:[#allocation8 + $0x124] ss:$8 sps:$4 sm:$0xff]  }
  0xf5   :  { %3530 = vmatprep.subr.bf16.mxu0 %v6174_v43 }
 0x174   :  { %v437_v55 = vpop.f32.mrb[0].mxu0  ;;  %v560_v56 = vpop.f32.mrb[0].mxu1 }
 0x175   :  { %v438_v57 = vadd.f32 %v437_v55, %v7290_v51  ;;  %v561_v58 = vadd.f32 %v560_v56, %v7292_v52  ;;  %v439_v59 = vpop.f32.mrb[1].mxu0  ;;  %v562_v60 = vpop.f32.mrb[1].mxu1 }
 0x176   :  { %v440_v61 = vadd.f32 %v439_v59, %v7296_v53  ;;  %v563_v62 = vadd.f32 %v562_v60, %v7298_v54  ;;  %v441_v63 = vpop.f32.mrb[2].mxu0  ;;  %v564_v1 = vpop.f32.mrb[2].mxu1 }
 0x177   :  { %v649_v2 = vmax.f32 %v438_v57, 0.0  ;;  %v442_v3 = vadd.f32 %v441_v63, %v7290_v51  ;;  %v565_v4 = vadd.f32 %v564_v1, %v7292_v52  ;;  %v443_v5 = vpop.f32.mrb[3].mxu0  ;;  %v566_v6 = vpop.f32.mrb[3].mxu1  ;;  %v651_v10 = vmax.f32 %v561_v58, 0.0  ;;  %v6144_v63 = vld [vmem:[#allocation8 + $0x134] ss:$8 sps:$4 sm:$0xff]  }
 0x178   :  { %v650_v7 = vmax.f32 %v440_v61, 0.0  ;;  %v444_v8 = vadd.f32 %v443_v5, %v7296_v53  ;;  %v567_v9 = vadd.f32 %v566_v6, %v7298_v54  ;;  %v652_v13 = vmax.f32 %v563_v62, 0.0  ;;  %v6142_v5 = vld [vmem:[#allocation8 + $0x130] ss:$8 sps:$4 sm:$0xff]  }
 0x179   :  { %v653_v11 = vmax.f32 %v442_v3, 0.0  ;;  %v655_v12 = vmax.f32 %v565_v4, 0.0 }
 0x17a   :  { %v654_v14 = vmax.f32 %v444_v8, 0.0  ;;  %v656_v15 = vmax.f32 %v567_v9, 0.0 }
 0x17b   :  { %v721_v17 = vpack.c.bf16 %v653_v11, %v649_v2  ;;  %v7308_v18 = vpack.c.bf16 %v655_v12, %v651_v10 }
 0x17c   :  { %v722_v20 = vpack.c.bf16 %v654_v14, %v650_v7  ;;  %v724_v21 = vpack.c.bf16 %v656_v15, %v652_v13  ;;  %v570_v22 = vpop.f32.mrb[4].mxu1  ;;  %v447_v23 = vpop.f32.mrb[4].mxu0 }
 0x17d   :  { %v571_v24 = vadd.f32 %v570_v22, %v7292_v52  ;;  %v572_v25 = vpop.f32.mrb[5].mxu1  ;;  %v448_v26 = vadd.f32 %v447_v23, %v7290_v51  ;;  %v449_v27 = vpop.f32.mrb[5].mxu0  ;;  %v6148_v23 = vld [vmem:[#allocation8 + $0x140] ss:$8 sps:$4 sm:$0xff]  }
 0x17e   :  { %v573_v28 = vadd.f32 %v572_v25, %v7298_v54  ;;  %v574_v29 = vpop.f32.mrb[6].mxu1  ;;  %1187 = vmatprep.mubr.bf16.mxu1 %v722_v20  ;;  %v450_v0 = vadd.f32 %v449_v27, %v7296_v53  ;;  %v451_v30 = vpop.f32.mrb[6].mxu0 }
 0x17f   :  { %v575_v31 = vadd.f32 %v574_v29, %v7292_v52  ;;  %v576_v32 = vpop.f32.mrb[7].mxu1  ;;  %1188 = vmatmul.mubr.bf16.vlgmr.msra.gmra.mrb[36].mxu1 %v721_v17  ;;  %v657_v33 = vmax.f32 %v448_v26, 0.0  ;;  %v452_v34 = vadd.f32 %v451_v30, %v7290_v51  ;;  %v453_v35 = vpop.f32.mrb[7].mxu0  ;;  %v659_v40 = vmax.f32 %v571_v24, 0.0 }
 0x180   :  { %v577_v36 = vadd.f32 %v576_v32, %v7298_v54  ;;  %1199 = vmatpush1.bf16.msra.mxu1 %v6124_v16  ;;  %1230 = vmatprep.mubr.bf16.mxu1 %v724_v21  ;;  %v658_v38 = vmax.f32 %v450_v0, 0.0  ;;  %v454_v39 = vadd.f32 %v453_v35, %v7296_v53  ;;  %v660_v44 = vmax.f32 %v573_v28, 0.0  ;;  %v6156_v32 = vld [vmem:[#allocation8 + $0x154] ss:$8 sps:$4 sm:$0xff]  }
 0x181   :  { %v663_v41 = vmax.f32 %v575_v31, 0.0  ;;  %1200 = vmatprep.subr.bf16.mxu1 %v6132_v19  ;;  %v661_v43 = vmax.f32 %v452_v34, 0.0  ;;  %v6150_v19 = vld [vmem:[#allocation8 + $0x144] ss:$8 sps:$4 sm:$0xff]  }
 0x182   :  { %v664_v47 = vmax.f32 %v577_v36, 0.0  ;;  %v662_v50 = vmax.f32 %v454_v39, 0.0 }
 0x183   :  { %v7318_v55 = vpack.c.bf16 %v663_v41, %v659_v40  ;;  %v7320_v56 = vpack.c.bf16 %v661_v43, %v657_v33 }
 0x184   :  { %v7322_v57 = vpack.c.bf16 %v664_v47, %v660_v44  ;;  %1201 = vmatpush1.bf16.msra.mxu1 %v6130_v37  ;;  %v580_v58 = vpop.f32.mrb[8].mxu1  ;;  %v7324_v59 = vpack.c.bf16 %v662_v50, %v658_v38  ;;  %v457_v60 = vpop.f32.mrb[8].mxu0  ;;  %v6154_v37 = vld [vmem:[#allocation8 + $0x150] ss:$8 sps:$4 sm:$0xff]  }
 0x185   :  { %v581_v61 = vadd.f32 %v580_v58, %v7292_v52  ;;  %v582_v62 = vpop.f32.mrb[9].mxu1  ;;  %1202 = vmatprep.subr.bf16.mxu1 %v6138_v42  ;;  %v458_v1 = vadd.f32 %v457_v60, %v7290_v51  ;;  %v459_v2 = vpop.f32.mrb[9].mxu0 }
 0x186   :  { %v583_v3 = vadd.f32 %v582_v62, %v7298_v54  ;;  %v584_v4 = vpop.f32.mrb[10].mxu1  ;;  %v460_v6 = vadd.f32 %v459_v2, %v7296_v53  ;;  %v461_v7 = vpop.f32.mrb[10].mxu0  ;;  %v6160_v2 = vld [vmem:[#allocation8 + $0x160] ss:$8 sps:$4 sm:$0xff]  }
 0x187   :  { %v585_v8 = vadd.f32 %v584_v4, %v7292_v52  ;;  %v586_v9 = vpop.f32.mrb[11].mxu1  ;;  %v665_v10 = vmax.f32 %v458_v1, 0.0  ;;  %v462_v11 = vadd.f32 %v461_v7, %v7290_v51  ;;  %v463_v12 = vpop.f32.mrb[11].mxu0  ;;  %v667_v16 = vmax.f32 %v581_v61, 0.0  ;;  %v6162_v61 = vld [vmem:[#allocation8 + $0x164] ss:$8 sps:$4 sm:$0xff]  }
 0x188   :  { %v587_v13 = vadd.f32 %v586_v9, %v7298_v54  ;;  %1203 = vmatpush1.bf16.msra.mxu1 %v6136_v48  ;;  %v666_v14 = vmax.f32 %v460_v6, 0.0  ;;  %v464_v15 = vadd.f32 %v463_v12, %v7296_v53  ;;  %v668_v21 = vmax.f32 %v583_v3, 0.0  ;;  %v6165_v12 = vld [vmem:[#allocation8 + $0x174] ss:$8 sps:$4 sm:$0xff]  }
 0x189   :  { %v671_v17 = vmax.f32 %v585_v8, 0.0  ;;  %1204 = vmatprep.subr.bf16.mxu1 %v6144_v63  ;;  %v669_v20 = vmax.f32 %v462_v11, 0.0 }
 0x18a   :  { %v672_v22 = vmax.f32 %v587_v13, 0.0  ;;  %v670_v24 = vmax.f32 %v464_v15, 0.0 }
 0x18b   :  { %v7334_v25 = vpack.c.bf16 %v671_v17, %v667_v16  ;;  %v7336_v26 = vpack.c.bf16 %v669_v20, %v665_v10  ;;  %v6163_v17 = vld [vmem:[#allocation8 + $0x170] ss:$8 sps:$4 sm:$0xff]  }
 0x18c   :  { %v7338_v27 = vpack.c.bf16 %v672_v22, %v668_v21  ;;  %1205 = vmatpush1.bf16.msra.mxu1 %v6142_v5  ;;  %v590_v28 = vpop.f32.mrb[12].mxu1  ;;  %v7340_v29 = vpack.c.bf16 %v670_v24, %v666_v14  ;;  %v467_v0 = vpop.f32.mrb[12].mxu0 }
 0x18d   :  { %v591_v30 = vadd.f32 %v590_v28, %v7292_v52  ;;  %v592_v31 = vpop.f32.mrb[13].mxu1  ;;  %1206 = vmatprep.subr.bf16.mxu1 %v6150_v19  ;;  %v468_v33 = vadd.f32 %v467_v0, %v7290_v51  ;;  %v469_v34 = vpop.f32.mrb[13].mxu0 }
 0x18e   :  { %v593_v35 = vadd.f32 %v592_v31, %v7298_v54  ;;  %v594_v36 = vpop.f32.mrb[14].mxu1  ;;  %v470_v38 = vadd.f32 %v469_v34, %v7296_v53  ;;  %v471_v39 = vpop.f32.mrb[14].mxu0  ;;  %v6171_v34 = vld [vmem:[#allocation8 + $0x184] ss:$8 sps:$4 sm:$0xff]  }
 0x18f   :  { %v595_v40 = vadd.f32 %v594_v36, %v7292_v52  ;;  %v596_v41 = vpop.f32.mrb[15].mxu1  ;;  %v673_v42 = vmax.f32 %v468_v33, 0.0  ;;  %v472_v43 = vadd.f32 %v471_v39, %v7290_v51  ;;  %v473_v44 = vpop.f32.mrb[15].mxu0  ;;  %v675_v58 = vmax.f32 %v591_v30, 0.0  ;;  %v6172_v39 = vld [vmem:[#allocation8 + $0xa00] ss:$8 sps:$4 sm:$0xff]  }
 0x190   :  { %v597_v47 = vadd.f32 %v596_v41, %v7298_v54  ;;  %1207 = vmatpush1.bf16.msra.mxu1 %v6148_v23  ;;  %v674_v48 = vmax.f32 %v470_v38, 0.0  ;;  %v474_v50 = vadd.f32 %v473_v44, %v7296_v53  ;;  %v676_v63 = vmax.f32 %v593_v35, 0.0  ;;  %v6169_v38 = vld [vmem:[#allocation8 + $0x180] ss:$8 sps:$4 sm:$0xff]  }
 0x191   :  { %v679_v60 = vmax.f32 %v595_v40, 0.0  ;;  %1208 = vmatprep.subr.bf16.mxu1 %v6156_v32  ;;  %v677_v62 = vmax.f32 %v472_v43, 0.0 }
 0x192   :  { %v680_v1 = vmax.f32 %v597_v47, 0.0  ;;  %v678_v3 = vmax.f32 %v474_v50, 0.0  ;;  %v6177_v50 = vld [vmem:[#allocation8 + $0x194] ss:$8 sps:$4 sm:$0xff]  }
 0x193   :  { %v7350_v4 = vpack.c.bf16 %v679_v60, %v675_v58  ;;  %v7352_v5 = vpack.c.bf16 %v677_v62, %v673_v42  ;;  %v6180_v58 = vld [vmem:[#allocation8 + $0xa14] ss:$8 sps:$4 sm:$0xff]  }
 0x194   :  { %v7354_v6 = vpack.c.bf16 %v680_v1, %v676_v63  ;;  %1209 = vmatpush1.bf16.msra.mxu1 %v6154_v37  ;;  %v600_v7 = vpop.f32.mrb[16].mxu1  ;;  %v7356_v8 = vpack.c.bf16 %v678_v3, %v674_v48  ;;  %v477_v9 = vpop.f32.mrb[16].mxu0  ;;  %v6175_v1 = vld [vmem:[#allocation8 + $0x190] ss:$8 sps:$4 sm:$0xff]  }
 0x195   :  { %v601_v10 = vadd.f32 %v600_v7, %v7292_v52  ;;  %v602_v11 = vpop.f32.mrb[17].mxu1  ;;  %1210 = vmatprep.subr.bf16.mxu1 %v6162_v61  ;;  %v478_v13 = vadd.f32 %v477_v9, %v7290_v51  ;;  %v479_v14 = vpop.f32.mrb[17].mxu0 }
 0x196   :  { %v603_v15 = vadd.f32 %v602_v11, %v7298_v54  ;;  %v604_v16 = vpop.f32.mrb[18].mxu1  ;;  %v480_v19 = vadd.f32 %v479_v14, %v7296_v53  ;;  %v481_v20 = vpop.f32.mrb[18].mxu0 }
 0x197   :  { %v605_v21 = vadd.f32 %v604_v16, %v7292_v52  ;;  %v606_v22 = vpop.f32.mrb[19].mxu1  ;;  %v681_v23 = vmax.f32 %v478_v13, 0.0  ;;  %v482_v24 = vadd.f32 %v481_v20, %v7290_v51  ;;  %v483_v28 = vpop.f32.mrb[19].mxu0  ;;  %v683_v32 = vmax.f32 %v601_v10, 0.0  ;;  %v6178_v10 = vld [vmem:[#allocation8 + $0xa10] ss:$8 sps:$4 sm:$0xff]  }
 0x198   :  { %v607_v0 = vadd.f32 %v606_v22, %v7298_v54  ;;  %1211 = vmatpush1.bf16.msra.mxu1 %v6160_v2  ;;  %v682_v30 = vmax.f32 %v480_v19, 0.0  ;;  %v484_v31 = vadd.f32 %v483_v28, %v7296_v53  ;;  %v684_v36 = vmax.f32 %v603_v15, 0.0  ;;  %v6183_v22 = vld [vmem:[#allocation8 + $0x1a4] ss:$8 sps:$4 sm:$0xff]  }
 0x199   :  { %v687_v33 = vmax.f32 %v605_v21, 0.0  ;;  %1212 = vmatprep.subr.bf16.mxu1 %v6165_v12  ;;  %v685_v35 = vmax.f32 %v482_v24, 0.0 }
 0x19a   :  { %v688_v37 = vmax.f32 %v607_v0, 0.0  ;;  %v686_v40 = vmax.f32 %v484_v31, 0.0  ;;  %v6181_v0 = vld [vmem:[#allocation8 + $0x1a0] ss:$8 sps:$4 sm:$0xff]  }
 0x19b   :  { %v739_v41 = vpack.c.bf16 %v687_v33, %v683_v32  ;;  %v7366_v42 = vpack.c.bf16 %v685_v35, %v681_v23  ;;  %v6186_v23 = vld [vmem:[#allocation8 + $0xa24] ss:$8 sps:$4 sm:$0xff]  }
 0x19c   :  { %v740_v43 = vpack.c.bf16 %v688_v37, %v684_v36  ;;  %1213 = vmatpush1.bf16.msra.mxu1 %v6163_v17  ;;  %v7368_v44 = vpack.c.bf16 %v686_v40, %v682_v30  ;;  %v487_v47 = vpop.f32.mrb[20].mxu0  ;;  %v610_v48 = vpop.f32.mrb[20].mxu1  ;;  %v6184_v30 = vld [vmem:[#allocation8 + $0xa20] ss:$8 sps:$4 sm:$0xff]   ;;  %v6189_v37 = vld [vmem:[#allocation8 + $0x1b4] ss:$8 sps:$4 sm:$0xff]  }
 0x19d   :  { %1214 = vmatprep.subr.bf16.mxu1 %v6171_v34  ;;  %v488_v60 = vadd.f32 %v487_v47, %v7290_v51  ;;  %v489_v61 = vpop.f32.mrb[21].mxu0  ;;  %v611_v62 = vadd.f32 %v610_v48, %v7292_v52  ;;  %v612_v63 = vpop.f32.mrb[21].mxu1  ;;  %v6190_v40 = vld [vmem:[#allocation8 + $0xa30] ss:$8 sps:$4 sm:$0xff]   ;;  %v6193_v47 = vld [vmem:[#allocation8 + $0x1c0] ss:$8 sps:$4 sm:$0xff]  }
 0x19e   :  { %3130 = vmatprep.mubr.bf16.mxu0 %v740_v43  ;;  %v490_v2 = vadd.f32 %v489_v61, %v7296_v53  ;;  %v491_v3 = vpop.f32.mrb[22].mxu0  ;;  %v613_v7 = vadd.f32 %v612_v63, %v7298_v54  ;;  %v614_v9 = vpop.f32.mrb[22].mxu1  ;;  %v6198_v43 = vld [vmem:[#allocation8 + $0xa44] ss:$8 sps:$4 sm:$0xff]   ;;  %v6196_v48 = vld [vmem:[#allocation8 + $0xa40] ss:$8 sps:$4 sm:$0xff]  }
 0x19f   :  { %3131 = vmatmul.mubr.bf16.vlgmr.msra.gmra.mrb[36].mxu0 %v739_v41  ;;  %v689_v11 = vmax.f32 %v488_v60, 0.0  ;;  %v492_v12 = vadd.f32 %v491_v3, %v7290_v51  ;;  %v493_v13 = vpop.f32.mrb[23].mxu0  ;;  %v691_v14 = vmax.f32 %v611_v62, 0.0  ;;  %v615_v15 = vadd.f32 %v614_v9, %v7292_v52  ;;  %v616_v16 = vpop.f32.mrb[23].mxu1  ;;  %v6195_v41 = vld [vmem:[#allocation8 + $0x1c4] ss:$8 sps:$4 sm:$0xff]  }
 0x1a0   :  { %1215 = vmatpush1.bf16.msra.mxu1 %v6169_v38  ;;  %3531 = vmatpush1.bf16.msra.mxu0 %v6172_v39  ;;  %v690_v17 = vmax.f32 %v490_v2, 0.0  ;;  %v494_v19 = vadd.f32 %v493_v13, %v7296_v53  ;;  %v692_v20 = vmax.f32 %v613_v7, 0.0  ;;  %v617_v21 = vadd.f32 %v616_v16, %v7298_v54  ;;  %v6192_v38 = vld [vmem:[#allocation8 + $0xa34] ss:$8 sps:$4 sm:$0xff]   ;;  %v6187_v39 = vld [vmem:[#allocation8 + $0x1b0] ss:$8 sps:$4 sm:$0xff]  }
 0x1a1   :  { %1216 = vmatprep.subr.bf16.mxu1 %v6177_v50  ;;  %3532 = vmatprep.subr.bf16.mxu0 %v6180_v58  ;;  %v693_v24 = vmax.f32 %v492_v12, 0.0  ;;  %v695_v28 = vmax.f32 %v615_v15, 0.0  ;;  %v6201_v50 = vld [vmem:[#allocation8 + $0x1d4] ss:$8 sps:$4 sm:$0xff]   ;;  %v6199_v60 = vld [vmem:[#allocation8 + $0x1d0] ss:$8 sps:$4 sm:$0xff]  }
 0x1a2   :  { %v694_v31 = vmax.f32 %v494_v19, 0.0  ;;  %v696_v32 = vmax.f32 %v617_v21, 0.0  ;;  %v6204_v58 = vld [vmem:[#allocation8 + $0xa54] ss:$8 sps:$4 sm:$0xff]   ;;  %v6202_v61 = vld [vmem:[#allocation8 + $0xa50] ss:$8 sps:$4 sm:$0xff]  }
 0x1a3   :  { %v7378_v33 = vpack.c.bf16 %v693_v24, %v689_v11  ;;  %v7380_v34 = vpack.c.bf16 %v695_v28, %v691_v14  ;;  %v6207_v62 = vld [vmem:[#allocation8 + $0x1e4] ss:$8 sps:$4 sm:$0xff]   ;;  %v6208_v2 = vld [vmem:[#allocation8 + $0xa60] ss:$8 sps:$4 sm:$0xff]   ;;  %v6213_v3 = vld [vmem:[#allocation8 + $0x1f4] ss:$8 sps:$4 sm:$0xff]  }
 0x1a4   :  { %1217 = vmatpush1.bf16.msra.mxu1 %v6175_v1  ;;  %3533 = vmatpush1.bf16.msra.mxu0 %v6178_v10  ;;  %v742_v35 = vpack.c.bf16 %v694_v31, %v690_v17  ;;  %v7382_v36 = vpack.c.bf16 %v696_v32, %v692_v20  ;;  %v6210_v63 = vld [vmem:[#allocation8 + $0xa64] ss:$8 sps:$4 sm:$0xff]   ;;  %v6205_v1 = vld [vmem:[#allocation8 + $0x1e0] ss:$8 sps:$4 sm:$0xff]   ;;  %v6216_v7 = vld [vmem:[#allocation8 + $0xa74] ss:$8 sps:$4 sm:$0xff]  }
 0x1a5   :  { %1218 = vmatprep.subr.bf16.mxu1 %v6183_v22  ;;  %3534 = vmatprep.subr.bf16.mxu0 %v6186_v23  ;;  %v6211_v9 = vld [vmem:[#allocation8 + $0x1f0] ss:$8 sps:$4 sm:$0xff]   ;;  %v6219_v11 = vld [vmem:[#allocation8 + $0x204] ss:$8 sps:$4 sm:$0xff]   ;;  %v6217_v13 = vld [vmem:[#allocation8 + $0x200] ss:$8 sps:$4 sm:$0xff]  }
 0x1a6   :  { %3562 = vmatprep.mubr.bf16.mxu0 %v742_v35  ;;  %v6214_v10 = vld [vmem:[#allocation8 + $0xa70] ss:$8 sps:$4 sm:$0xff]   ;;  %v6222_v12 = vld [vmem:[#allocation8 + $0xa84] ss:$8 sps:$4 sm:$0xff]   ;;  %v6220_v14 = vld [vmem:[#allocation8 + $0xa80] ss:$8 sps:$4 sm:$0xff]  }
 0x1a7   :  { %v6225_v15 = vld [vmem:[#allocation8 + $0x214] ss:$8 sps:$4 sm:$0xff]   ;;  %v6223_v17 = vld [vmem:[#allocation8 + $0x210] ss:$8 sps:$4 sm:$0xff]   ;;  %v6231_v20 = vld [vmem:[#allocation8 + $0x224] ss:$8 sps:$4 sm:$0xff]  }
 0x1a8   :  { %1219 = vmatpush1.bf16.msra.mxu1 %v6181_v0  ;;  %3535 = vmatpush1.bf16.msra.mxu0 %v6184_v30  ;;  %v6228_v16 = vld [vmem:[#allocation8 + $0xa94] ss:$8 sps:$4 sm:$0xff]   ;;  %v6226_v19 = vld [vmem:[#allocation8 + $0xa90] ss:$8 sps:$4 sm:$0xff]   ;;  %v6234_v21 = vld [vmem:[#allocation8 + $0xaa4] ss:$8 sps:$4 sm:$0xff]  }
 0x1a9   :  { %1220 = vmatprep.subr.bf16.mxu1 %v6189_v37  ;;  %3536 = vmatprep.subr.bf16.mxu0 %v6192_v38  ;;  %v6229_v22 = vld [vmem:[#allocation8 + $0x220] ss:$8 sps:$4 sm:$0xff]   ;;  %v6237_v24 = vld [vmem:[#allocation8 + $0x234] ss:$8 sps:$4 sm:$0xff]   ;;  %v6238_v0 = vld [vmem:[#allocation8 + $0xab0] ss:$8 sps:$4 sm:$0xff]  }
 0x1aa   :  { %v6232_v23 = vld [vmem:[#allocation8 + $0xaa0] ss:$8 sps:$4 sm:$0xff]   ;;  %v6240_v28 = vld [vmem:[#allocation8 + $0xab4] ss:$8 sps:$4 sm:$0xff]   ;;  %v6246_v30 = vld [vmem:[#allocation8 + $0xac4] ss:$8 sps:$4 sm:$0xff]  }
 0x1ab   :  { %v6241_v31 = vld [vmem:[#allocation8 + $0x240] ss:$8 sps:$4 sm:$0xff]   ;;  %v6249_v35 = vld [vmem:[#allocation8 + $0x254] ss:$8 sps:$4 sm:$0xff]   ;;  %v6247_v38 = vld [vmem:[#allocation8 + $0x250] ss:$8 sps:$4 sm:$0xff]  }
 0x1ac   :  { %1221 = vmatpush1.bf16.msra.mxu1 %v6187_v39  ;;  %3537 = vmatpush1.bf16.msra.mxu0 %v6190_v40  ;;  %v6244_v32 = vld [vmem:[#allocation8 + $0xac0] ss:$8 sps:$4 sm:$0xff]   ;;  %v6252_v37 = vld [vmem:[#allocation8 + $0xad4] ss:$8 sps:$4 sm:$0xff]   ;;  %v6250_v39 = vld [vmem:[#allocation8 + $0xad0] ss:$8 sps:$4 sm:$0xff]  }
 0x1ad   :  { %1222 = vmatprep.subr.bf16.mxu1 %v6195_v41  ;;  %3538 = vmatprep.subr.bf16.mxu0 %v6198_v43  ;;  %v6255_v40 = vld [vmem:[#allocation8 + $0x264] ss:$8 sps:$4 sm:$0xff]   ;;  %v497_v41 = vpop.f32.mrb[24].mxu0 }
 0x1ae   :  { %v6258_v43 = vld [vmem:[#allocation8 + $0xae4] ss:$8 sps:$4 sm:$0xff]  }
 0x1b0   :  { %1223 = vmatpush1.bf16.msra.mxu1 %v6193_v47  ;;  %3539 = vmatpush1.bf16.msra.mxu0 %v6196_v48  ;;  %v498_v47 = vadd.f32 %v497_v41, %v7290_v51  ;;  %v499_v48 = vpop.f32.mrb[25].mxu0 }
 0x1b1   :  { %1224 = vmatprep.subr.bf16.mxu1 %v6201_v50  ;;  %3540 = vmatprep.subr.bf16.mxu0 %v6204_v58  ;;  %v500_v50 = vadd.f32 %v499_v48, %v7296_v53  ;;  %v501_v58 = vpop.f32.mrb[26].mxu0 }
 0x1b4   :  { %1225 = vmatpush1.bf16.msra.mxu1 %v6199_v60  ;;  %3541 = vmatpush1.bf16.msra.mxu0 %v6202_v61  ;;  %v6253_v60 = vld [vmem:[#allocation8 + $0x260] ss:$8 sps:$4 sm:$0xff]   ;;  %v697_v61 = vmax.f32 %v498_v47, 0.0 }
 0x1b5   :  { %1226 = vmatprep.subr.bf16.mxu1 %v6207_v62  ;;  %3542 = vmatprep.subr.bf16.mxu0 %v6210_v63  ;;  %v502_v62 = vadd.f32 %v501_v58, %v7290_v51  ;;  %v6256_v63 = vld [vmem:[#allocation8 + $0xae0] ss:$8 sps:$4 sm:$0xff]   ;;  %v6274_v58 = vld [vmem:[#allocation8 + $0xb10] ss:$8 sps:$4 sm:$0xff]  }
 0x1b8   :  { %1227 = vmatpush1.bf16.msra.mxu1 %v6205_v1  ;;  %3543 = vmatpush1.bf16.msra.mxu0 %v6208_v2  ;;  %v6261_v1 = vld [vmem:[#allocation8 + $0x274] ss:$8 sps:$4 sm:$0xff]   ;;  %v503_v2 = vpop.f32.mrb[27].mxu0 }
 0x1b9   :  { %1228 = vmatprep.subr.bf16.mxu1 %v6213_v3  ;;  %3544 = vmatprep.subr.bf16.mxu0 %v6216_v7  ;;  %v620_v3 = vpop.f32.mrb[24].mxu1  ;;  %v6264_v7 = vld [vmem:[#allocation8 + $0xaf4] ss:$8 sps:$4 sm:$0xff]  }
 0x1bc   :  { %1229 = vmatpush1.bf16.msra.mxu1 %v6211_v9  ;;  %3545 = vmatpush1.bf16.msra.mxu0 %v6214_v10  ;;  %v698_v9 = vmax.f32 %v500_v50, 0.0  ;;  %v701_v10 = vmax.f32 %v502_v62, 0.0  ;;  %v6271_v50 = vld [vmem:[#allocation8 + $0x290] ss:$8 sps:$4 sm:$0xff]   ;;  %v6279_v62 = vld [vmem:[#allocation8 + $0x2a4] ss:$8 sps:$4 sm:$0xff]  }
 0x1bd   :  { %1630 = vmatprep.subr.bf16.mxu1 %v6219_v11  ;;  %3546 = vmatprep.subr.bf16.mxu0 %v6222_v12  ;;  %v504_v11 = vadd.f32 %v503_v2, %v7296_v53  ;;  %v621_v12 = vadd.f32 %v620_v3, %v7292_v52 }
 0x1bf   :  { %1231 = vmatmul.mubr.bf16.vlgmr.msra.gmra.mrb[36].mxu1 %v7308_v18  ;;  %v6235_v18 = vld [vmem:[#allocation8 + $0x230] ss:$8 sps:$4 sm:$0xff]  }
 0x1c0   :  { %1631 = vmatpush1.bf16.msra.mxu1 %v6217_v13  ;;  %1662 = vmatprep.mubr.bf16.mxu1 %v7324_v59  ;;  %v6243_v59 = vld [vmem:[#allocation8 + $0x244] ss:$8 sps:$4 sm:$0xff]   ;;  %v622_v13 = vpop.f32.mrb[25].mxu1 }
 0x1c1   :  { %3547 = vmatpush1.bf16.msra.mxu0 %v6220_v14  ;;  %1632 = vmatprep.subr.bf16.mxu1 %v6225_v15  ;;  %v623_v14 = vadd.f32 %v622_v13, %v7298_v54  ;;  %v624_v15 = vpop.f32.mrb[26].mxu1 }
 0x1c2   :  { %3548 = vmatprep.subr.bf16.mxu0 %v6228_v16  ;;  %v6259_v16 = vld [vmem:[#allocation8 + $0x270] ss:$8 sps:$4 sm:$0xff]  }
 0x1c4   :  { %1633 = vmatpush1.bf16.msra.mxu1 %v6223_v17  ;;  %v7392_v17 = vpack.c.bf16 %v701_v10, %v697_v61 }
 0x1c5   :  { %3549 = vmatpush1.bf16.msra.mxu0 %v6226_v19  ;;  %1634 = vmatprep.subr.bf16.mxu1 %v6231_v20  ;;  %v702_v19 = vmax.f32 %v504_v11, 0.0  ;;  %v699_v20 = vmax.f32 %v621_v12, 0.0 }
 0x1c6   :  { %3550 = vmatprep.subr.bf16.mxu0 %v6234_v21  ;;  %v625_v21 = vadd.f32 %v624_v15, %v7292_v52 }
 0x1c8   :  { %1635 = vmatpush1.bf16.msra.mxu1 %v6229_v22  ;;  %v6262_v22 = vld [vmem:[#allocation8 + $0xaf0] ss:$8 sps:$4 sm:$0xff]  }
 0x1c9   :  { %3551 = vmatpush1.bf16.msra.mxu0 %v6232_v23  ;;  %1636 = vmatprep.subr.bf16.mxu1 %v6237_v24  ;;  %v6267_v23 = vld [vmem:[#allocation8 + $0x284] ss:$8 sps:$4 sm:$0xff]   ;;  %v626_v24 = vpop.f32.mrb[27].mxu1 }
 0x1ca   :  { %3552 = vmatprep.subr.bf16.mxu0 %v6240_v28  ;;  %v6270_v28 = vld [vmem:[#allocation8 + $0xb04] ss:$8 sps:$4 sm:$0xff]  }
 0x1cc   :  { %1637 = vmatpush1.bf16.msra.mxu1 %v6235_v18  ;;  %v7395_v18 = vpack.c.bf16 %v702_v19, %v698_v9  ;;  %v6282_v9 = vld [vmem:[#allocation8 + $0xb24] ss:$8 sps:$4 sm:$0xff]   ;;  %v6277_v19 = vld [vmem:[#allocation8 + $0x2a0] ss:$8 sps:$4 sm:$0xff]  }
 0x1cd   :  { %3553 = vmatpush1.bf16.msra.mxu0 %v6238_v0  ;;  %1638 = vmatprep.subr.bf16.mxu1 %v6243_v59  ;;  %v700_v0 = vmax.f32 %v623_v14, 0.0  ;;  %v703_v59 = vmax.f32 %v625_v21, 0.0 }
 0x1ce   :  { %3554 = vmatprep.subr.bf16.mxu0 %v6246_v30  ;;  %v627_v30 = vadd.f32 %v626_v24, %v7298_v54 }
 0x1d0   :  { %1639 = vmatpush1.bf16.msra.mxu1 %v6241_v31  ;;  %v6265_v31 = vld [vmem:[#allocation8 + $0x280] ss:$8 sps:$4 sm:$0xff]  }
 0x1d1   :  { %3555 = vmatpush1.bf16.msra.mxu0 %v6244_v32  ;;  %1640 = vmatprep.subr.bf16.mxu1 %v6249_v35  ;;  %v7398_v32 = vpack.c.bf16 %v703_v59, %v699_v20  ;;  %v704_v35 = vmax.f32 %v627_v30, 0.0  ;;  %v6288_v59 = vld [vmem:[#allocation8 + $0xb34] ss:$8 sps:$4 sm:$0xff]  }
 0x1d2   :  { %3556 = vmatprep.subr.bf16.mxu0 %v6252_v37  ;;  %v6268_v37 = vld [vmem:[#allocation8 + $0xb00] ss:$8 sps:$4 sm:$0xff]  }
 0x1d3   :  { %v7400_v41 = vpack.c.bf16 %v704_v35, %v700_v0 }
 0x1d4   :  { %1641 = vmatpush1.bf16.msra.mxu1 %v6247_v38  ;;  %v6273_v38 = vld [vmem:[#allocation8 + $0x294] ss:$8 sps:$4 sm:$0xff]  }
 0x1d5   :  { %3557 = vmatpush1.bf16.msra.mxu0 %v6250_v39  ;;  %1642 = vmatprep.subr.bf16.mxu1 %v6255_v40  ;;  %v630_v39 = vpop.f32.mrb[28].mxu1  ;;  %v6276_v40 = vld [vmem:[#allocation8 + $0xb14] ss:$8 sps:$4 sm:$0xff]  }
 0x1d6   :  { %3558 = vmatprep.subr.bf16.mxu0 %v6258_v43  ;;  %v631_v43 = vadd.f32 %v630_v39, %v7292_v52  ;;  %v632_v47 = vpop.f32.mrb[29].mxu1 }
 0x1d7   :  { %v633_v48 = vadd.f32 %v632_v47, %v7298_v54  ;;  %v634_v61 = vpop.f32.mrb[30].mxu1  ;;  %v6283_v47 = vld [vmem:[#allocation8 + $0x2b0] ss:$8 sps:$4 sm:$0xff]  }
 0x1d8   :  { %1643 = vmatpush1.bf16.msra.mxu1 %v6253_v60  ;;  %v507_v60 = vpop.f32.mrb[28].mxu0  ;;  %v635_v2 = vadd.f32 %v634_v61, %v7292_v52  ;;  %v6286_v61 = vld [vmem:[#allocation8 + $0xb30] ss:$8 sps:$4 sm:$0xff]  }
 0x1d9   :  { %3559 = vmatpush1.bf16.msra.mxu0 %v6256_v63  ;;  %1644 = vmatprep.subr.bf16.mxu1 %v6261_v1  ;;  %v707_v63 = vmax.f32 %v631_v43, 0.0  ;;  %v508_v1 = vadd.f32 %v507_v60, %v7290_v51  ;;  %v509_v3 = vpop.f32.mrb[29].mxu0 }
 0x1da   :  { %3560 = vmatprep.subr.bf16.mxu0 %v6264_v7  ;;  %v636_v7 = vpop.f32.mrb[31].mxu1  ;;  %v510_v10 = vadd.f32 %v509_v3, %v7296_v53  ;;  %v511_v12 = vpop.f32.mrb[30].mxu0  ;;  %v711_v14 = vmax.f32 %v635_v2, 0.0  ;;  %v6294_v2 = vld [vmem:[#allocation8 + $0xb44] ss:$8 sps:$4 sm:$0xff]  }
 0x1db   :  { %v637_v11 = vadd.f32 %v636_v7, %v7298_v54  ;;  %v705_v13 = vmax.f32 %v508_v1, 0.0  ;;  %v512_v15 = vadd.f32 %v511_v12, %v7290_v51  ;;  %v640_v0 = vpop.f32.mrb[32].mxu1 }
 0x1dc   :  { %1645 = vmatpush1.bf16.msra.mxu1 %v6259_v16  ;;  %v513_v16 = vpop.f32.mrb[31].mxu0  ;;  %v706_v20 = vmax.f32 %v510_v10, 0.0  ;;  %v7412_v24 = vpack.c.bf16 %v711_v14, %v707_v63  ;;  %v641_v35 = vadd.f32 %v640_v0, %v7292_v52 }
 0x1dd   :  { %3561 = vmatpush1.bf16.msra.mxu0 %v6262_v22  ;;  %1646 = vmatprep.subr.bf16.mxu1 %v6267_v23  ;;  %v712_v21 = vmax.f32 %v637_v11, 0.0  ;;  %v514_v22 = vadd.f32 %v513_v16, %v7296_v53  ;;  %v6285_v23 = vld [vmem:[#allocation8 + $0x2b4] ss:$8 sps:$4 sm:$0xff]  }
 0x1de   :  { %3573 = vmatprep.subr.bf16.mxu0 %v6270_v28  ;;  %v709_v28 = vmax.f32 %v512_v15, 0.0 }
 0x1e0   :  { %3563 = vmatmul.mubr.bf16.vlgmr.msra.gmra.mrb[36].mxu0 %v7378_v33  ;;  %1647 = vmatpush1.bf16.msra.mxu1 %v6265_v31  ;;  %v708_v33 = vmax.f32 %v633_v48, 0.0  ;;  %v710_v31 = vmax.f32 %v514_v22, 0.0 }
 0x1e1   :  { %3574 = vmatpush1.bf16.msra.mxu0 %v6268_v37  ;;  %1648 = vmatprep.subr.bf16.mxu1 %v6273_v38  ;;  %v642_v37 = vpop.f32.mrb[33].mxu1  ;;  %v7417_v38 = vpack.c.bf16 %v709_v28, %v705_v13  ;;  %v6295_v28 = vld [vmem:[#allocation8 + $0x2d0] ss:$8 sps:$4 sm:$0xff]  }
 0x1e2   :  { %3575 = vmatprep.subr.bf16.mxu0 %v6276_v40  ;;  %3605 = vmatprep.mubr.bf16.mxu0 %v7382_v36  ;;  %v6280_v36 = vld [vmem:[#allocation8 + $0xb20] ss:$8 sps:$4 sm:$0xff]   ;;  %v7414_v30 = vpack.c.bf16 %v712_v21, %v708_v33  ;;  %v643_v39 = vadd.f32 %v642_v37, %v7298_v54  ;;  %v517_v40 = vpop.f32.mrb[32].mxu0  ;;  %v644_v43 = vpop.f32.mrb[34].mxu1  ;;  %v7420_v48 = vpack.c.bf16 %v710_v31, %v706_v20  ;;  %v6297_v21 = vld [vmem:[#allocation8 + $0x2d4] ss:$8 sps:$4 sm:$0xff]  }
 0x1e3   :  { %v645_v60 = vadd.f32 %v644_v43, %v7292_v52  ;;  %v519_v63 = vpop.f32.mrb[33].mxu0  ;;  %v646_v1 = vpop.f32.mrb[35].mxu1  ;;  %v6289_v52 = vld [vmem:[#allocation8 + $0x2c0] ss:$8 sps:$4 sm:$0xff]   ;;  %v6306_v31 = vld [vmem:[#allocation8 + $0xb64] ss:$8 sps:$4 sm:$0xff]  }
 0x1e4   :  { %1649 = vmatpush1.bf16.msra.mxu1 %v6271_v50  ;;  %v715_v50 = vmax.f32 %v641_v35, 0.0  ;;  %v716_v3 = vmax.f32 %v643_v39, 0.0  ;;  %v647_v33 = vadd.f32 %v646_v1, %v7298_v54  ;;  %v521_v10 = vpop.f32.mrb[34].mxu0  ;;  %v6292_v20 = vld [vmem:[#allocation8 + $0xb40] ss:$8 sps:$4 sm:$0xff]  }
 0x1e5   :  { %3576 = vmatpush1.bf16.msra.mxu0 %v6274_v58  ;;  %1650 = vmatprep.subr.bf16.mxu1 %v6279_v62  ;;  %v518_v58 = vadd.f32 %v517_v40, %v7290_v51  ;;  %v6291_v62 = vld [vmem:[#allocation8 + $0x2c4] ss:$8 sps:$4 sm:$0xff]   ;;  %v719_v7 = vmax.f32 %v645_v60, 0.0  ;;  %v522_v12 = vadd.f32 %v521_v10, %v7290_v51  ;;  %v523_v13 = vpop.f32.mrb[35].mxu0  ;;  %v6300_v54 = vld [vmem:[#allocation8 + $0xb54] ss:$8 sps:$4 sm:$0xff]  }
 0x1e6   :  { %3577 = vmatprep.subr.bf16.mxu0 %v6282_v9  ;;  %v520_v9 = vadd.f32 %v519_v63, %v7296_v53  ;;  %v720_v16 = vmax.f32 %v647_v33, 0.0  ;;  %v6301_v35 = vld [vmem:[#allocation8 + $0x2e0] ss:$8 sps:$4 sm:$0xff]   ;;  %v6309_v39 = vld [vmem:[#allocation8 + $0x2f4] ss:$8 sps:$4 sm:$0xff]  }
 0x1e7   :  { %v713_v11 = vmax.f32 %v518_v58, 0.0  ;;  %v7427_v14 = vpack.c.bf16 %v719_v7, %v715_v50  ;;  %v717_v22 = vmax.f32 %v522_v12, 0.0  ;;  %v6304_v37 = vld [vmem:[#allocation8 + $0xb60] ss:$8 sps:$4 sm:$0xff]   ;;  %v6312_v40 = vld [vmem:[#allocation8 + $0xb74] ss:$8 sps:$4 sm:$0xff]  }
 0x1e8   :  { %1651 = vmatpush1.bf16.msra.mxu1 %v6277_v19  ;;  %v714_v15 = vmax.f32 %v520_v9, 0.0  ;;  %v524_v19 = vadd.f32 %v523_v13, %v7296_v53  ;;  %v6303_v53 = vld [vmem:[#allocation8 + $0x2e4] ss:$8 sps:$4 sm:$0xff]   ;;  %v6307_v43 = vld [vmem:[#allocation8 + $0x2f0] ss:$8 sps:$4 sm:$0xff]  }
 0x1e9   :  { %3578 = vmatpush1.bf16.msra.mxu0 %v6280_v36  ;;  %1652 = vmatprep.subr.bf16.mxu1 %v6285_v23  ;;  %v7430_v36 = vpack.c.bf16 %v720_v16, %v716_v3  ;;  %v7432_v51 = vpack.c.bf16 %v717_v22, %v713_v11  ;;  %v6315_v50 = vld [vmem:[#allocation8 + $0x304] ss:$8 sps:$4 sm:$0xff]   ;;  %v6313_v60 = vld [vmem:[#allocation8 + $0x300] ss:$8 sps:$4 sm:$0xff]   ;;  %v6324_v63 = vld [vmem:[#allocation8 + $0xb94] ss:$8 sps:$4 sm:$0xff]  }
 0x1ea   :  { %3579 = vmatprep.subr.bf16.mxu0 %v6288_v59  ;;  %v718_v23 = vmax.f32 %v524_v19, 0.0  ;;  %v6298_v59 = vld [vmem:[#allocation8 + $0xb50] ss:$8 sps:$4 sm:$0xff]   ;;  %v6318_v58 = vld [vmem:[#allocation8 + $0xb84] ss:$8 sps:$4 sm:$0xff]  }
 0x1eb   :  { %v6319_v1 = vld [vmem:[#allocation8 + $0x310] ss:$8 sps:$4 sm:$0xff]   ;;  %v6327_v3 = vld [vmem:[#allocation8 + $0x324] ss:$8 sps:$4 sm:$0xff]   ;;  %v6325_v9 = vld [vmem:[#allocation8 + $0x320] ss:$8 sps:$4 sm:$0xff]  }
 0x1ec   :  { %1653 = vmatpush1.bf16.msra.mxu1 %v6283_v47  ;;  %v7434_v0 = vpack.c.bf16 %v718_v23, %v714_v15  ;;  %v6310_v47 = vld [vmem:[#allocation8 + $0xb70] ss:$8 sps:$4 sm:$0xff]   ;;  %v6330_v7 = vld [vmem:[#allocation8 + $0xba4] ss:$8 sps:$4 sm:$0xff]   ;;  %v6328_v33 = vld [vmem:[#allocation8 + $0xba0] ss:$8 sps:$4 sm:$0xff]  }
 0x1ed   :  { %3580 = vmatpush1.bf16.msra.mxu0 %v6286_v61  ;;  %1654 = vmatprep.subr.bf16.mxu1 %v6291_v62  ;;  %v6316_v61 = vld [vmem:[#allocation8 + $0xb80] ss:$8 sps:$4 sm:$0xff]   ;;  %v6321_v62 = vld [vmem:[#allocation8 + $0x314] ss:$8 sps:$4 sm:$0xff]   ;;  %v6339_v12 = vld [vmem:[#allocation8 + $0x344] ss:$8 sps:$4 sm:$0xff]  }
 0x1ee   :  { %3581 = vmatprep.subr.bf16.mxu0 %v6294_v2  ;;  %v6322_v2 = vld [vmem:[#allocation8 + $0xb90] ss:$8 sps:$4 sm:$0xff]   ;;  %v6333_v10 = vld [vmem:[#allocation8 + $0x334] ss:$8 sps:$4 sm:$0xff]   ;;  %v6342_v13 = vld [vmem:[#allocation8 + $0xbc4] ss:$8 sps:$4 sm:$0xff]  }
 0x1ef   :  { %v6336_v11 = vld [vmem:[#allocation8 + $0xbb4] ss:$8 sps:$4 sm:$0xff]   ;;  %v6340_v15 = vld [vmem:[#allocation8 + $0xbc0] ss:$8 sps:$4 sm:$0xff]   ;;  %v6351_v22 = vld [vmem:[#allocation8 + $0x364] ss:$8 sps:$4 sm:$0xff]  }
 0x1f0   :  { %1655 = vmatpush1.bf16.msra.mxu1 %v6289_v52  ;;  %v6337_v52 = vld [vmem:[#allocation8 + $0x340] ss:$8 sps:$4 sm:$0xff]   ;;  %v6345_v16 = vld [vmem:[#allocation8 + $0x354] ss:$8 sps:$4 sm:$0xff]  }
 0x1f1   :  { %3582 = vmatpush1.bf16.msra.mxu0 %v6292_v20  ;;  %1656 = vmatprep.subr.bf16.mxu1 %v6297_v21  ;;  %v6348_v19 = vld [vmem:[#allocation8 + $0xbd4] ss:$8 sps:$4 sm:$0xff]   ;;  %v6343_v20 = vld [vmem:[#allocation8 + $0x350] ss:$8 sps:$4 sm:$0xff]   ;;  %v6349_v23 = vld [vmem:[#allocation8 + $0x360] ss:$8 sps:$4 sm:$0xff]  }
 0x1f2   :  { %3583 = vmatprep.subr.bf16.mxu0 %v6300_v54  ;;  %v6346_v21 = vld [vmem:[#allocation8 + $0xbd0] ss:$8 sps:$4 sm:$0xff]   ;;  %v6354_v54 = vld [vmem:[#allocation8 + $0xbe4] ss:$8 sps:$4 sm:$0xff]  }
 0x1f4   :  { %1657 = vmatpush1.bf16.msra.mxu1 %v6295_v28  ;;  %v6352_v28 = vld [vmem:[#allocation8 + $0xbe0] ss:$8 sps:$4 sm:$0xff]  }
 0x1f5   :  { %3584 = vmatpush1.bf16.msra.mxu0 %v6298_v59  ;;  %1658 = vmatprep.subr.bf16.mxu1 %v6303_v53  ;;  %v6357_v59 = vld [vmem:[#allocation8 + $0x374] ss:$8 sps:$4 sm:$0xff]  }
 0x1f6   :  { %3585 = vmatprep.subr.bf16.mxu0 %v6306_v31  ;;  %v6360_v53 = vld [vmem:[#allocation8 + $0xbf4] ss:$8 sps:$4 sm:$0xff]   ;;  %v6355_v31 = vld [vmem:[#allocation8 + $0x370] ss:$8 sps:$4 sm:$0xff]  }
 0x1f8   :  { %1659 = vmatpush1.bf16.msra.mxu1 %v6301_v35  ;;  %v6358_v35 = vld [vmem:[#allocation8 + $0xbf0] ss:$8 sps:$4 sm:$0xff]  }
 0x1f9   :  { %3586 = vmatpush1.bf16.msra.mxu0 %v6304_v37  ;;  %1660 = vmatprep.subr.bf16.mxu1 %v6309_v39  ;;  %v6363_v37 = vld [vmem:[#allocation8 + $0x384] ss:$8 sps:$4 sm:$0xff]  }
 0x1fa   :  { %3587 = vmatprep.subr.bf16.mxu0 %v6312_v40  ;;  %v6366_v39 = vld [vmem:[#allocation8 + $0xc04] ss:$8 sps:$4 sm:$0xff]   ;;  %v6361_v40 = vld [vmem:[#allocation8 + $0x380] ss:$8 sps:$4 sm:$0xff]  }
 0x1fc   :  { %1661 = vmatpush1.bf16.msra.mxu1 %v6307_v43  ;;  %v6364_v43 = vld [vmem:[#allocation8 + $0xc00] ss:$8 sps:$4 sm:$0xff]  }
 0x1fd   :  { %3588 = vmatpush1.bf16.msra.mxu0 %v6310_v47  ;;  %1673 = vmatprep.subr.bf16.mxu1 %v6315_v50  ;;  %v6369_v47 = vld [vmem:[#allocation8 + $0x394] ss:$8 sps:$4 sm:$0xff]  }
 0x1fe   :  { %3589 = vmatprep.subr.bf16.mxu0 %v6318_v58  ;;  %v6372_v50 = vld [vmem:[#allocation8 + $0xc14] ss:$8 sps:$4 sm:$0xff]   ;;  %v6367_v58 = vld [vmem:[#allocation8 + $0x390] ss:$8 sps:$4 sm:$0xff]  }
 0x1ff   :  { %1663 = vmatmul.mubr.bf16.vlgmr.msra.gmra.mrb[36].mxu1 %v7320_v56  ;;  %v6331_v56 = vld [vmem:[#allocation8 + $0x330] ss:$8 sps:$4 sm:$0xff]  }
 0x200   :  { %1674 = vmatpush1.bf16.msra.mxu1 %v6313_v60  ;;  %1705 = vmatprep.mubr.bf16.mxu1 %v7322_v57  ;;  %v6334_v57 = vld [vmem:[#allocation8 + $0xbb0] ss:$8 sps:$4 sm:$0xff]  }
 0x201   :  { %3590 = vmatpush1.bf16.msra.mxu0 %v6316_v61  ;;  %1675 = vmatprep.subr.bf16.mxu1 %v6321_v62  ;;  %v6370_v60 = vld [vmem:[#allocation8 + $0xc10] ss:$8 sps:$4 sm:$0xff]   ;;  %v6375_v61 = vld [vmem:[#allocation8 + $0x3a4] ss:$8 sps:$4 sm:$0xff]  }
 0x202   :  { %3591 = vmatprep.subr.bf16.mxu0 %v6324_v63  ;;  %v6378_v62 = vld [vmem:[#allocation8 + $0xc24] ss:$8 sps:$4 sm:$0xff]   ;;  %v6373_v63 = vld [vmem:[#allocation8 + $0x3a0] ss:$8 sps:$4 sm:$0xff]  }
 0x204   :  { %1676 = vmatpush1.bf16.msra.mxu1 %v6319_v1  ;;  %v6376_v1 = vld [vmem:[#allocation8 + $0xc20] ss:$8 sps:$4 sm:$0xff]  }
 0x205   :  { %3592 = vmatpush1.bf16.msra.mxu0 %v6322_v2  ;;  %1677 = vmatprep.subr.bf16.mxu1 %v6327_v3  ;;  %v6381_v2 = vld [vmem:[#allocation8 + $0x3b4] ss:$8 sps:$4 sm:$0xff]  }
 0x206   :  { %3593 = vmatprep.subr.bf16.mxu0 %v6330_v7  ;;  %v6384_v3 = vld [vmem:[#allocation8 + $0xc34] ss:$8 sps:$4 sm:$0xff]   ;;  %v6382_v7 = vld [vmem:[#allocation8 + $0xc30] ss:$8 sps:$4 sm:$0xff]  }
 0x208   :  { %1678 = vmatpush1.bf16.msra.mxu1 %v6325_v9  ;;  %v6387_v9 = vld [vmem:[#allocation8 + $0x3c4] ss:$8 sps:$4 sm:$0xff]  }
 0x209   :  { %3594 = vmatpush1.bf16.msra.mxu0 %v6328_v33  ;;  %1679 = vmatprep.subr.bf16.mxu1 %v6333_v10  ;;  %v6390_v33 = vld [vmem:[#allocation8 + $0xc44] ss:$8 sps:$4 sm:$0xff]   ;;  %v6385_v10 = vld [vmem:[#allocation8 + $0x3c0] ss:$8 sps:$4 sm:$0xff]  }
 0x20a   :  { %3595 = vmatprep.subr.bf16.mxu0 %v6336_v11  ;;  %v6393_v11 = vld [vmem:[#allocation8 + $0x3d4] ss:$8 sps:$4 sm:$0xff]  }
 0x20c   :  { %1680 = vmatpush1.bf16.msra.mxu1 %v6331_v56  ;;  %v6396_v56 = vld [vmem:[#allocation8 + $0xc54] ss:$8 sps:$4 sm:$0xff]  }
 0x20d   :  { %3596 = vmatpush1.bf16.msra.mxu0 %v6334_v57  ;;  %1681 = vmatprep.subr.bf16.mxu1 %v6339_v12  ;;  %v6391_v57 = vld [vmem:[#allocation8 + $0x3d0] ss:$8 sps:$4 sm:$0xff]  }
 0x20e   :  { %3597 = vmatprep.subr.bf16.mxu0 %v6342_v13  ;;  %v6394_v12 = vld [vmem:[#allocation8 + $0xc50] ss:$8 sps:$4 sm:$0xff]   ;;  %v6399_v13 = vld [vmem:[#allocation8 + $0x3e4] ss:$8 sps:$4 sm:$0xff]  }
 0x210   :  { %1682 = vmatpush1.bf16.msra.mxu1 %v6337_v52  ;;  %v6402_v52 = vld [vmem:[#allocation8 + $0xc64] ss:$8 sps:$4 sm:$0xff]  }
 0x211   :  { %3598 = vmatpush1.bf16.msra.mxu0 %v6340_v15  ;;  %1683 = vmatprep.subr.bf16.mxu1 %v6345_v16  ;;  %v6397_v15 = vld [vmem:[#allocation8 + $0x3e0] ss:$8 sps:$4 sm:$0xff]  }
 0x212   :  { %3599 = vmatprep.subr.bf16.mxu0 %v6348_v19  ;;  %v6400_v16 = vld [vmem:[#allocation8 + $0xc60] ss:$8 sps:$4 sm:$0xff]   ;;  %v6405_v19 = vld [vmem:[#allocation8 + $0x3f4] ss:$8 sps:$4 sm:$0xff]  }
 0x214   :  { %1684 = vmatpush1.bf16.msra.mxu1 %v6343_v20  ;;  %v6408_v20 = vld [vmem:[#allocation8 + $0xc74] ss:$8 sps:$4 sm:$0xff]  }
 0x215   :  { %3600 = vmatpush1.bf16.msra.mxu0 %v6346_v21  ;;  %1685 = vmatprep.subr.bf16.mxu1 %v6351_v22  ;;  %v6403_v21 = vld [vmem:[#allocation8 + $0x3f0] ss:$8 sps:$4 sm:$0xff]  }
 0x216   :  { %3601 = vmatprep.subr.bf16.mxu0 %v6354_v54  ;;  %v6406_v22 = vld [vmem:[#allocation8 + $0xc70] ss:$8 sps:$4 sm:$0xff]   ;;  %v6411_v54 = vld [vmem:[#allocation8 + $0x404] ss:$8 sps:$4 sm:$0xff]  }
 0x218   :  { %1686 = vmatpush1.bf16.msra.mxu1 %v6349_v23  ;;  %v6414_v23 = vld [vmem:[#allocation8 + $0xc84] ss:$8 sps:$4 sm:$0xff]  }
 0x219   :  { %3602 = vmatpush1.bf16.msra.mxu0 %v6352_v28  ;;  %1687 = vmatprep.subr.bf16.mxu1 %v6357_v59  ;;  %v6409_v28 = vld [vmem:[#allocation8 + $0x400] ss:$8 sps:$4 sm:$0xff]  }
 0x21a   :  { %3603 = vmatprep.subr.bf16.mxu0 %v6360_v53  ;;  %v6412_v59 = vld [vmem:[#allocation8 + $0xc80] ss:$8 sps:$4 sm:$0xff]   ;;  %v6417_v53 = vld [vmem:[#allocation8 + $0x414] ss:$8 sps:$4 sm:$0xff]  }
 0x21c   :  { %1688 = vmatpush1.bf16.msra.mxu1 %v6355_v31  ;;  %v6420_v31 = vld [vmem:[#allocation8 + $0xc94] ss:$8 sps:$4 sm:$0xff]  }
 0x21d   :  { %3604 = vmatpush1.bf16.msra.mxu0 %v6358_v35  ;;  %1689 = vmatprep.subr.bf16.mxu1 %v6363_v37  ;;  %v6415_v35 = vld [vmem:[#allocation8 + $0x410] ss:$8 sps:$4 sm:$0xff]  }
 0x21e   :  { %4005 = vmatprep.subr.bf16.mxu0 %v6366_v39  ;;  %v6418_v37 = vld [vmem:[#allocation8 + $0xc90] ss:$8 sps:$4 sm:$0xff]   ;;  %v6423_v39 = vld [vmem:[#allocation8 + $0x424] ss:$8 sps:$4 sm:$0xff]  }
 0x220   :  { %3606 = vmatmul.mubr.bf16.vlgmr.msra.gmra.mrb[36].mxu0 %v7380_v34  ;;  %1690 = vmatpush1.bf16.msra.mxu1 %v6361_v40  ;;  %v6379_v34 = vld [vmem:[#allocation8 + $0x3b0] ss:$8 sps:$4 sm:$0xff]   ;;  %v6426_v40 = vld [vmem:[#allocation8 + $0xca4] ss:$8 sps:$4 sm:$0xff]  }
 0x221   :  { %4006 = vmatpush1.bf16.msra.mxu0 %v6364_v43  ;;  %1691 = vmatprep.subr.bf16.mxu1 %v6369_v47  ;;  %v6421_v43 = vld [vmem:[#allocation8 + $0x420] ss:$8 sps:$4 sm:$0xff]  }
 0x222   :  { %4007 = vmatprep.subr.bf16.mxu0 %v6372_v50  ;;  %4037 = vmatprep.mubr.bf16.mxu0 %v7395_v18  ;;  %v6388_v18 = vld [vmem:[#allocation8 + $0xc40] ss:$8 sps:$4 sm:$0xff]   ;;  %v6429_v50 = vld [vmem:[#allocation8 + $0x434] ss:$8 sps:$4 sm:$0xff]  }
 0x223   :  { %v6424_v47 = vld [vmem:[#allocation8 + $0xca0] ss:$8 sps:$4 sm:$0xff]  }
 0x224   :  { %1692 = vmatpush1.bf16.msra.mxu1 %v6367_v58  ;;  %v6432_v58 = vld [vmem:[#allocation8 + $0xcb4] ss:$8 sps:$4 sm:$0xff]  }
 0x225   :  { %4008 = vmatpush1.bf16.msra.mxu0 %v6370_v60  ;;  %1693 = vmatprep.subr.bf16.mxu1 %v6375_v61  ;;  %v6435_v60 = vld [vmem:[#allocation8 + $0x444] ss:$8 sps:$4 sm:$0xff]  }
 0x226   :  { %4009 = vmatprep.subr.bf16.mxu0 %v6378_v62  ;;  %v6438_v61 = vld [vmem:[#allocation8 + $0xcc4] ss:$8 sps:$4 sm:$0xff]   ;;  %v6433_v62 = vld [vmem:[#allocation8 + $0x440] ss:$8 sps:$4 sm:$0xff]  }
 0x228   :  { %1694 = vmatpush1.bf16.msra.mxu1 %v6373_v63  ;;  %v6436_v63 = vld [vmem:[#allocation8 + $0xcc0] ss:$8 sps:$4 sm:$0xff]  }
 0x229   :  { %4010 = vmatpush1.bf16.msra.mxu0 %v6376_v1  ;;  %1695 = vmatprep.subr.bf16.mxu1 %v6381_v2  ;;  %v6441_v1 = vld [vmem:[#allocation8 + $0x454] ss:$8 sps:$4 sm:$0xff]  }
 0x22a   :  { %4011 = vmatprep.subr.bf16.mxu0 %v6384_v3  ;;  %v6444_v2 = vld [vmem:[#allocation8 + $0xcd4] ss:$8 sps:$4 sm:$0xff]   ;;  %v6439_v3 = vld [vmem:[#allocation8 + $0x450] ss:$8 sps:$4 sm:$0xff]  }
 0x22c   :  { %1696 = vmatpush1.bf16.msra.mxu1 %v6379_v34  ;;  %v6442_v34 = vld [vmem:[#allocation8 + $0xcd0] ss:$8 sps:$4 sm:$0xff]  }
 0x22d   :  { %4012 = vmatpush1.bf16.msra.mxu0 %v6382_v7  ;;  %1697 = vmatprep.subr.bf16.mxu1 %v6387_v9  ;;  %v6447_v7 = vld [vmem:[#allocation8 + $0x464] ss:$8 sps:$4 sm:$0xff]  }
 0x22e   :  { %4013 = vmatprep.subr.bf16.mxu0 %v6390_v33  ;;  %v6450_v9 = vld [vmem:[#allocation8 + $0xce4] ss:$8 sps:$4 sm:$0xff]   ;;  %v6445_v33 = vld [vmem:[#allocation8 + $0x460] ss:$8 sps:$4 sm:$0xff]  }
 0x230   :  { %1698 = vmatpush1.bf16.msra.mxu1 %v6385_v10  ;;  %v6448_v10 = vld [vmem:[#allocation8 + $0xce0] ss:$8 sps:$4 sm:$0xff]  }
 0x231   :  { %4014 = vmatpush1.bf16.msra.mxu0 %v6388_v18  ;;  %1699 = vmatprep.subr.bf16.mxu1 %v6393_v11  ;;  %v6453_v18 = vld [vmem:[#allocation8 + $0x474] ss:$8 sps:$4 sm:$0xff]  }
 0x232   :  { %4015 = vmatprep.subr.bf16.mxu0 %v6396_v56  ;;  %v6456_v11 = vld [vmem:[#allocation8 + $0xcf4] ss:$8 sps:$4 sm:$0xff]   ;;  %v6451_v56 = vld [vmem:[#allocation8 + $0x470] ss:$8 sps:$4 sm:$0xff]  }
 0x234   :  { %1700 = vmatpush1.bf16.msra.mxu1 %v6391_v57  ;;  %v6454_v57 = vld [vmem:[#allocation8 + $0xcf0] ss:$8 sps:$4 sm:$0xff]  }
 0x235   :  { %4016 = vmatpush1.bf16.msra.mxu0 %v6394_v12  ;;  %1701 = vmatprep.subr.bf16.mxu1 %v6399_v13  ;;  %v6459_v12 = vld [vmem:[#allocation8 + $0x484] ss:$8 sps:$4 sm:$0xff]  }
 0x236   :  { %4017 = vmatprep.subr.bf16.mxu0 %v6402_v52  ;;  %v6462_v13 = vld [vmem:[#allocation8 + $0xd04] ss:$8 sps:$4 sm:$0xff]   ;;  %v6457_v52 = vld [vmem:[#allocation8 + $0x480] ss:$8 sps:$4 sm:$0xff]  }
 0x238   :  { %1702 = vmatpush1.bf16.msra.mxu1 %v6397_v15  ;;  %v6460_v15 = vld [vmem:[#allocation8 + $0xd00] ss:$8 sps:$4 sm:$0xff]  }
 0x239   :  { %4018 = vmatpush1.bf16.msra.mxu0 %v6400_v16  ;;  %1703 = vmatprep.subr.bf16.mxu1 %v6405_v19  ;;  %v6465_v16 = vld [vmem:[#allocation8 + $0x494] ss:$8 sps:$4 sm:$0xff]  }
 0x23a   :  { %4019 = vmatprep.subr.bf16.mxu0 %v6408_v20  ;;  %v6468_v19 = vld [vmem:[#allocation8 + $0xd14] ss:$8 sps:$4 sm:$0xff]   ;;  %v6463_v20 = vld [vmem:[#allocation8 + $0x490] ss:$8 sps:$4 sm:$0xff]  }
 0x23c   :  { %1704 = vmatpush1.bf16.msra.mxu1 %v6403_v21  ;;  %v6466_v21 = vld [vmem:[#allocation8 + $0xd10] ss:$8 sps:$4 sm:$0xff]  }
 0x23d   :  { %4020 = vmatpush1.bf16.msra.mxu0 %v6406_v22  ;;  %2105 = vmatprep.subr.bf16.mxu1 %v6411_v54  ;;  %v6471_v22 = vld [vmem:[#allocation8 + $0x4a4] ss:$8 sps:$4 sm:$0xff]  }
 0x23e   :  { %4021 = vmatprep.subr.bf16.mxu0 %v6414_v23  ;;  %v6474_v54 = vld [vmem:[#allocation8 + $0xd24] ss:$8 sps:$4 sm:$0xff]   ;;  %v6469_v23 = vld [vmem:[#allocation8 + $0x4a0] ss:$8 sps:$4 sm:$0xff]  }
 0x23f   :  { %1706 = vmatmul.mubr.bf16.vlgmr.msra.gmra.mrb[36].mxu1 %v7318_v55  ;;  %v6427_v55 = vld [vmem:[#allocation8 + $0x430] ss:$8 sps:$4 sm:$0xff]  }
 0x240   :  { %2106 = vmatpush1.bf16.msra.mxu1 %v6409_v28  ;;  %2137 = vmatprep.mubr.bf16.mxu1 %v7340_v29  ;;  %v6430_v29 = vld [vmem:[#allocation8 + $0xcb0] ss:$8 sps:$4 sm:$0xff]   ;;  %v6472_v28 = vld [vmem:[#allocation8 + $0xd20] ss:$8 sps:$4 sm:$0xff]  }
 0x241   :  { %4022 = vmatpush1.bf16.msra.mxu0 %v6412_v59  ;;  %2107 = vmatprep.subr.bf16.mxu1 %v6417_v53  ;;  %v6477_v59 = vld [vmem:[#allocation8 + $0x4b4] ss:$8 sps:$4 sm:$0xff]  }
 0x242   :  { %4023 = vmatprep.subr.bf16.mxu0 %v6420_v31  ;;  %v6480_v53 = vld [vmem:[#allocation8 + $0xd34] ss:$8 sps:$4 sm:$0xff]   ;;  %v6478_v31 = vld [vmem:[#allocation8 + $0xd30] ss:$8 sps:$4 sm:$0xff]  }
 0x244   :  { %2108 = vmatpush1.bf16.msra.mxu1 %v6415_v35  ;;  %v6483_v35 = vld [vmem:[#allocation8 + $0x4c4] ss:$8 sps:$4 sm:$0xff]  }
 0x245   :  { %4024 = vmatpush1.bf16.msra.mxu0 %v6418_v37  ;;  %2109 = vmatprep.subr.bf16.mxu1 %v6423_v39  ;;  %v6481_v37 = vld [vmem:[#allocation8 + $0x4c0] ss:$8 sps:$4 sm:$0xff]  }
 0x246   :  { %4025 = vmatprep.subr.bf16.mxu0 %v6426_v40  ;;  %v6484_v39 = vld [vmem:[#allocation8 + $0xd40] ss:$8 sps:$4 sm:$0xff]   ;;  %v6489_v40 = vld [vmem:[#allocation8 + $0x4d4] ss:$8 sps:$4 sm:$0xff]  }
 0x248   :  { %2110 = vmatpush1.bf16.msra.mxu1 %v6421_v43  ;;  %v6492_v43 = vld [vmem:[#allocation8 + $0xd54] ss:$8 sps:$4 sm:$0xff]  }
 0x249   :  { %4026 = vmatpush1.bf16.msra.mxu0 %v6424_v47  ;;  %2111 = vmatprep.subr.bf16.mxu1 %v6429_v50  ;;  %v6487_v47 = vld [vmem:[#allocation8 + $0x4d0] ss:$8 sps:$4 sm:$0xff]  }
 0x24a   :  { %4027 = vmatprep.subr.bf16.mxu0 %v6432_v58  ;;  %v6490_v50 = vld [vmem:[#allocation8 + $0xd50] ss:$8 sps:$4 sm:$0xff]   ;;  %v6495_v58 = vld [vmem:[#allocation8 + $0x4e4] ss:$8 sps:$4 sm:$0xff]  }
 0x24c   :  { %2112 = vmatpush1.bf16.msra.mxu1 %v6427_v55  ;;  %v6498_v55 = vld [vmem:[#allocation8 + $0xd64] ss:$8 sps:$4 sm:$0xff]  }
 0x24d   :  { %4028 = vmatpush1.bf16.msra.mxu0 %v6430_v29  ;;  %2113 = vmatprep.subr.bf16.mxu1 %v6435_v60  ;;  %v6493_v29 = vld [vmem:[#allocation8 + $0x4e0] ss:$8 sps:$4 sm:$0xff]  }
 0x24e   :  { %4029 = vmatprep.subr.bf16.mxu0 %v6438_v61  ;;  %v6496_v60 = vld [vmem:[#allocation8 + $0xd60] ss:$8 sps:$4 sm:$0xff]   ;;  %v6501_v61 = vld [vmem:[#allocation8 + $0x4f4] ss:$8 sps:$4 sm:$0xff]  }
 0x250   :  { %2114 = vmatpush1.bf16.msra.mxu1 %v6433_v62  ;;  %v6504_v62 = vld [vmem:[#allocation8 + $0xd74] ss:$8 sps:$4 sm:$0xff]  }
 0x251   :  { %4030 = vmatpush1.bf16.msra.mxu0 %v6436_v63  ;;  %2115 = vmatprep.subr.bf16.mxu1 %v6441_v1  ;;  %v6499_v63 = vld [vmem:[#allocation8 + $0x4f0] ss:$8 sps:$4 sm:$0xff]  }
 0x252   :  { %4031 = vmatprep.subr.bf16.mxu0 %v6444_v2  ;;  %v6502_v1 = vld [vmem:[#allocation8 + $0xd70] ss:$8 sps:$4 sm:$0xff]   ;;  %v6507_v2 = vld [vmem:[#allocation8 + $0x504] ss:$8 sps:$4 sm:$0xff]  }
 0x254   :  { %2116 = vmatpush1.bf16.msra.mxu1 %v6439_v3  ;;  %v6510_v3 = vld [vmem:[#allocation8 + $0xd84] ss:$8 sps:$4 sm:$0xff]  }
 0x255   :  { %4032 = vmatpush1.bf16.msra.mxu0 %v6442_v34  ;;  %2117 = vmatprep.subr.bf16.mxu1 %v6447_v7  ;;  %v6505_v34 = vld [vmem:[#allocation8 + $0x500] ss:$8 sps:$4 sm:$0xff]  }
 0x256   :  { %4033 = vmatprep.subr.bf16.mxu0 %v6450_v9  ;;  %v6508_v7 = vld [vmem:[#allocation8 + $0xd80] ss:$8 sps:$4 sm:$0xff]   ;;  %v6513_v9 = vld [vmem:[#allocation8 + $0x514] ss:$8 sps:$4 sm:$0xff]  }
 0x258   :  { %2118 = vmatpush1.bf16.msra.mxu1 %v6445_v33  ;;  %v6516_v33 = vld [vmem:[#allocation8 + $0xd94] ss:$8 sps:$4 sm:$0xff]  }
 0x259   :  { %4034 = vmatpush1.bf16.msra.mxu0 %v6448_v10  ;;  %2119 = vmatprep.subr.bf16.mxu1 %v6453_v18  ;;  %v6511_v10 = vld [vmem:[#allocation8 + $0x510] ss:$8 sps:$4 sm:$0xff]  }
 0x25a   :  { %4035 = vmatprep.subr.bf16.mxu0 %v6456_v11  ;;  %v6514_v18 = vld [vmem:[#allocation8 + $0xd90] ss:$8 sps:$4 sm:$0xff]   ;;  %v6519_v11 = vld [vmem:[#allocation8 + $0x524] ss:$8 sps:$4 sm:$0xff]  }
 0x25c   :  { %2120 = vmatpush1.bf16.msra.mxu1 %v6451_v56  ;;  %v6522_v56 = vld [vmem:[#allocation8 + $0xda4] ss:$8 sps:$4 sm:$0xff]  }
 0x25d   :  { %4036 = vmatpush1.bf16.msra.mxu0 %v6454_v57  ;;  %2121 = vmatprep.subr.bf16.mxu1 %v6459_v12  ;;  %v6517_v57 = vld [vmem:[#allocation8 + $0x520] ss:$8 sps:$4 sm:$0xff]  }
 0x25e   :  { %4048 = vmatprep.subr.bf16.mxu0 %v6462_v13  ;;  %v6520_v12 = vld [vmem:[#allocation8 + $0xda0] ss:$8 sps:$4 sm:$0xff]   ;;  %v6525_v13 = vld [vmem:[#allocation8 + $0x534] ss:$8 sps:$4 sm:$0xff]  }
 0x260   :  { %4038 = vmatmul.mubr.bf16.vlgmr.msra.gmra.mrb[36].mxu0 %v7392_v17  ;;  %2122 = vmatpush1.bf16.msra.mxu1 %v6457_v52  ;;  %v6475_v17 = vld [vmem:[#allocation8 + $0x4b0] ss:$8 sps:$4 sm:$0xff]   ;;  %v6528_v52 = vld [vmem:[#allocation8 + $0xdb4] ss:$8 sps:$4 sm:$0xff]  }
 0x261   :  { %4049 = vmatpush1.bf16.msra.mxu0 %v6460_v15  ;;  %4080 = vmatprep.mubr.bf16.mxu0 %v7400_v41  ;;  %v6486_v41 = vld [vmem:[#allocation8 + $0xd44] ss:$8 sps:$4 sm:$0xff]  }
 0x262   :  { %2123 = vmatprep.subr.bf16.mxu1 %v6465_v16  ;;  %4050 = vmatprep.subr.bf16.mxu0 %v6468_v19  ;;  %v6531_v15 = vld [vmem:[#allocation8 + $0x544] ss:$8 sps:$4 sm:$0xff]   ;;  %v6529_v19 = vld [vmem:[#allocation8 + $0x540] ss:$8 sps:$4 sm:$0xff]  }
 0x263   :  { %v6534_v16 = vld [vmem:[#allocation8 + $0xdc4] ss:$8 sps:$4 sm:$0xff]  }
 0x264   :  { %2124 = vmatpush1.bf16.msra.mxu1 %v6463_v20  ;;  %v6532_v20 = vld [vmem:[#allocation8 + $0xdc0] ss:$8 sps:$4 sm:$0xff]  }
 0x265   :  { %4051 = vmatpush1.bf16.msra.mxu0 %v6466_v21  ;;  %2125 = vmatprep.subr.bf16.mxu1 %v6471_v22  ;;  %v6537_v21 = vld [vmem:[#allocation8 + $0x554] ss:$8 sps:$4 sm:$0xff]  }
 0x266   :  { %4052 = vmatprep.subr.bf16.mxu0 %v6474_v54  ;;  %v6540_v22 = vld [vmem:[#allocation8 + $0xdd4] ss:$8 sps:$4 sm:$0xff]   ;;  %v6535_v54 = vld [vmem:[#allocation8 + $0x550] ss:$8 sps:$4 sm:$0xff]  }
 0x268   :  { %2126 = vmatpush1.bf16.msra.mxu1 %v6469_v23  ;;  %v6538_v23 = vld [vmem:[#allocation8 + $0xdd0] ss:$8 sps:$4 sm:$0xff]  }
 0x269   :  { %4053 = vmatpush1.bf16.msra.mxu0 %v6472_v28  ;;  %2127 = vmatprep.subr.bf16.mxu1 %v6477_v59  ;;  %v6543_v28 = vld [vmem:[#allocation8 + $0x564] ss:$8 sps:$4 sm:$0xff]  }
 0x26a   :  { %4054 = vmatprep.subr.bf16.mxu0 %v6480_v53  ;;  %v6546_v59 = vld [vmem:[#allocation8 + $0xde4] ss:$8 sps:$4 sm:$0xff]   ;;  %v6541_v53 = vld [vmem:[#allocation8 + $0x560] ss:$8 sps:$4 sm:$0xff]  }
 0x26c   :  { %2128 = vmatpush1.bf16.msra.mxu1 %v6475_v17  ;;  %v6544_v17 = vld [vmem:[#allocation8 + $0xde0] ss:$8 sps:$4 sm:$0xff]  }
 0x26d   :  { %4055 = vmatpush1.bf16.msra.mxu0 %v6478_v31  ;;  %2129 = vmatprep.subr.bf16.mxu1 %v6483_v35  ;;  %v6549_v31 = vld [vmem:[#allocation8 + $0x574] ss:$8 sps:$4 sm:$0xff]  }
 0x26e   :  { %4056 = vmatprep.subr.bf16.mxu0 %v6486_v41  ;;  %v6552_v35 = vld [vmem:[#allocation8 + $0xdf4] ss:$8 sps:$4 sm:$0xff]   ;;  %v6547_v41 = vld [vmem:[#allocation8 + $0x570] ss:$8 sps:$4 sm:$0xff]  }
 0x270   :  { %2130 = vmatpush1.bf16.msra.mxu1 %v6481_v37  ;;  %v6550_v37 = vld [vmem:[#allocation8 + $0xdf0] ss:$8 sps:$4 sm:$0xff]  }
 0x271   :  { %4057 = vmatpush1.bf16.msra.mxu0 %v6484_v39  ;;  %2131 = vmatprep.subr.bf16.mxu1 %v6489_v40  ;;  %v6555_v39 = vld [vmem:[#allocation8 + $0x584] ss:$8 sps:$4 sm:$0xff]  }
 0x272   :  { %4058 = vmatprep.subr.bf16.mxu0 %v6492_v43  ;;  %v6558_v40 = vld [vmem:[#allocation8 + $0xe04] ss:$8 sps:$4 sm:$0xff]   ;;  %v6553_v43 = vld [vmem:[#allocation8 + $0x580] ss:$8 sps:$4 sm:$0xff]  }
 0x274   :  { %2132 = vmatpush1.bf16.msra.mxu1 %v6487_v47  ;;  %v6556_v47 = vld [vmem:[#allocation8 + $0xe00] ss:$8 sps:$4 sm:$0xff]  }
 0x275   :  { %4059 = vmatpush1.bf16.msra.mxu0 %v6490_v50  ;;  %2133 = vmatprep.subr.bf16.mxu1 %v6495_v58  ;;  %v6561_v50 = vld [vmem:[#allocation8 + $0x594] ss:$8 sps:$4 sm:$0xff]  }
 0x276   :  { %4060 = vmatprep.subr.bf16.mxu0 %v6498_v55  ;;  %v6564_v58 = vld [vmem:[#allocation8 + $0xe14] ss:$8 sps:$4 sm:$0xff]   ;;  %v6559_v55 = vld [vmem:[#allocation8 + $0x590] ss:$8 sps:$4 sm:$0xff]  }
 0x278   :  { %2134 = vmatpush1.bf16.msra.mxu1 %v6493_v29  ;;  %v6562_v29 = vld [vmem:[#allocation8 + $0xe10] ss:$8 sps:$4 sm:$0xff]  }
 0x279   :  { %4061 = vmatpush1.bf16.msra.mxu0 %v6496_v60  ;;  %2135 = vmatprep.subr.bf16.mxu1 %v6501_v61  ;;  %v6567_v60 = vld [vmem:[#allocation8 + $0x5a4] ss:$8 sps:$4 sm:$0xff]  }
 0x27a   :  { %4062 = vmatprep.subr.bf16.mxu0 %v6504_v62  ;;  %v6570_v61 = vld [vmem:[#allocation8 + $0xe24] ss:$8 sps:$4 sm:$0xff]   ;;  %v6565_v62 = vld [vmem:[#allocation8 + $0x5a0] ss:$8 sps:$4 sm:$0xff]  }
 0x27c   :  { %2136 = vmatpush1.bf16.msra.mxu1 %v6499_v63  ;;  %v6568_v63 = vld [vmem:[#allocation8 + $0xe20] ss:$8 sps:$4 sm:$0xff]  }
 0x27d   :  { %4063 = vmatpush1.bf16.msra.mxu0 %v6502_v1  ;;  %2148 = vmatprep.subr.bf16.mxu1 %v6507_v2  ;;  %v6573_v1 = vld [vmem:[#allocation8 + $0x5b4] ss:$8 sps:$4 sm:$0xff]  }
 0x27e   :  { %4064 = vmatprep.subr.bf16.mxu0 %v6510_v3  ;;  %v6576_v2 = vld [vmem:[#allocation8 + $0xe34] ss:$8 sps:$4 sm:$0xff]   ;;  %v6574_v3 = vld [vmem:[#allocation8 + $0xe30] ss:$8 sps:$4 sm:$0xff]  }
 0x27f   :  { %2138 = vmatmul.mubr.bf16.vlgmr.msra.gmra.mrb[36].mxu1 %v7336_v26  ;;  %v6523_v26 = vld [vmem:[#allocation8 + $0x530] ss:$8 sps:$4 sm:$0xff]  }
 0x280   :  { %2149 = vmatpush1.bf16.msra.mxu1 %v6505_v34  ;;  %2180 = vmatprep.mubr.bf16.mxu1 %v7338_v27  ;;  %v6526_v27 = vld [vmem:[#allocation8 + $0xdb0] ss:$8 sps:$4 sm:$0xff]   ;;  %v6579_v34 = vld [vmem:[#allocation8 + $0x5c4] ss:$8 sps:$4 sm:$0xff]  }
 0x281   :  { %4065 = vmatpush1.bf16.msra.mxu0 %v6508_v7  ;;  %2150 = vmatprep.subr.bf16.mxu1 %v6513_v9  ;;  %v6577_v7 = vld [vmem:[#allocation8 + $0x5c0] ss:$8 sps:$4 sm:$0xff]  }
 0x282   :  { %4066 = vmatprep.subr.bf16.mxu0 %v6516_v33  ;;  %v6580_v9 = vld [vmem:[#allocation8 + $0xe40] ss:$8 sps:$4 sm:$0xff]   ;;  %v6585_v33 = vld [vmem:[#allocation8 + $0x5d4] ss:$8 sps:$4 sm:$0xff]  }
 0x284   :  { %2151 = vmatpush1.bf16.msra.mxu1 %v6511_v10  ;;  %v6588_v10 = vld [vmem:[#allocation8 + $0xe54] ss:$8 sps:$4 sm:$0xff]  }
 0x285   :  { %4067 = vmatpush1.bf16.msra.mxu0 %v6514_v18  ;;  %2152 = vmatprep.subr.bf16.mxu1 %v6519_v11  ;;  %v6583_v18 = vld [vmem:[#allocation8 + $0x5d0] ss:$8 sps:$4 sm:$0xff]  }
 0x286   :  { %4068 = vmatprep.subr.bf16.mxu0 %v6522_v56  ;;  %v6586_v11 = vld [vmem:[#allocation8 + $0xe50] ss:$8 sps:$4 sm:$0xff]   ;;  %v6591_v56 = vld [vmem:[#allocation8 + $0x5e4] ss:$8 sps:$4 sm:$0xff]  }
 0x288   :  { %2153 = vmatpush1.bf16.msra.mxu1 %v6517_v57  ;;  %v6594_v57 = vld [vmem:[#allocation8 + $0xe64] ss:$8 sps:$4 sm:$0xff]  }
 0x289   :  { %4069 = vmatpush1.bf16.msra.mxu0 %v6520_v12  ;;  %2154 = vmatprep.subr.bf16.mxu1 %v6525_v13  ;;  %v6589_v12 = vld [vmem:[#allocation8 + $0x5e0] ss:$8 sps:$4 sm:$0xff]  }
 0x28a   :  { %4070 = vmatprep.subr.bf16.mxu0 %v6528_v52  ;;  %v6592_v13 = vld [vmem:[#allocation8 + $0xe60] ss:$8 sps:$4 sm:$0xff]   ;;  %v6597_v52 = vld [vmem:[#allocation8 + $0x5f4] ss:$8 sps:$4 sm:$0xff]  }
 0x28c   :  { %2155 = vmatpush1.bf16.msra.mxu1 %v6523_v26  ;;  %v6600_v26 = vld [vmem:[#allocation8 + $0xe74] ss:$8 sps:$4 sm:$0xff]  }
 0x28d   :  { %4071 = vmatpush1.bf16.msra.mxu0 %v6526_v27  ;;  %2156 = vmatprep.subr.bf16.mxu1 %v6531_v15  ;;  %v6595_v27 = vld [vmem:[#allocation8 + $0x5f0] ss:$8 sps:$4 sm:$0xff]  }
 0x28e   :  { %4072 = vmatprep.subr.bf16.mxu0 %v6534_v16  ;;  %v6598_v15 = vld [vmem:[#allocation8 + $0xe70] ss:$8 sps:$4 sm:$0xff]   ;;  %v6603_v16 = vld [vmem:[#allocation8 + $0x604] ss:$8 sps:$4 sm:$0xff]  }
 0x290   :  { %2157 = vmatpush1.bf16.msra.mxu1 %v6529_v19  ;;  %v6606_v19 = vld [vmem:[#allocation8 + $0xe84] ss:$8 sps:$4 sm:$0xff]  }
 0x291   :  { %4073 = vmatpush1.bf16.msra.mxu0 %v6532_v20  ;;  %2158 = vmatprep.subr.bf16.mxu1 %v6537_v21  ;;  %v6601_v20 = vld [vmem:[#allocation8 + $0x600] ss:$8 sps:$4 sm:$0xff]  }
 0x292   :  { %4074 = vmatprep.subr.bf16.mxu0 %v6540_v22  ;;  %v6604_v21 = vld [vmem:[#allocation8 + $0xe80] ss:$8 sps:$4 sm:$0xff]   ;;  %v6609_v22 = vld [vmem:[#allocation8 + $0x614] ss:$8 sps:$4 sm:$0xff]  }
 0x294   :  { %2159 = vmatpush1.bf16.msra.mxu1 %v6535_v54  ;;  %v6612_v54 = vld [vmem:[#allocation8 + $0xe94] ss:$8 sps:$4 sm:$0xff]  }
 0x295   :  { %4075 = vmatpush1.bf16.msra.mxu0 %v6538_v23  ;;  %2160 = vmatprep.subr.bf16.mxu1 %v6543_v28  ;;  %v6607_v23 = vld [vmem:[#allocation8 + $0x610] ss:$8 sps:$4 sm:$0xff]  }
 0x296   :  { %4076 = vmatprep.subr.bf16.mxu0 %v6546_v59  ;;  %v6610_v28 = vld [vmem:[#allocation8 + $0xe90] ss:$8 sps:$4 sm:$0xff]   ;;  %v6615_v59 = vld [vmem:[#allocation8 + $0x624] ss:$8 sps:$4 sm:$0xff]  }
 0x298   :  { %2161 = vmatpush1.bf16.msra.mxu1 %v6541_v53  ;;  %v6618_v53 = vld [vmem:[#allocation8 + $0xea4] ss:$8 sps:$4 sm:$0xff]  }
 0x299   :  { %4077 = vmatpush1.bf16.msra.mxu0 %v6544_v17  ;;  %2162 = vmatprep.subr.bf16.mxu1 %v6549_v31  ;;  %v6613_v17 = vld [vmem:[#allocation8 + $0x620] ss:$8 sps:$4 sm:$0xff]  }
 0x29a   :  { %4078 = vmatprep.subr.bf16.mxu0 %v6552_v35  ;;  %v6616_v31 = vld [vmem:[#allocation8 + $0xea0] ss:$8 sps:$4 sm:$0xff]   ;;  %v6621_v35 = vld [vmem:[#allocation8 + $0x634] ss:$8 sps:$4 sm:$0xff]  }
 0x29c   :  { %2163 = vmatpush1.bf16.msra.mxu1 %v6547_v41  ;;  %v6624_v41 = vld [vmem:[#allocation8 + $0xeb4] ss:$8 sps:$4 sm:$0xff]  }
 0x29d   :  { %4079 = vmatpush1.bf16.msra.mxu0 %v6550_v37  ;;  %2164 = vmatprep.subr.bf16.mxu1 %v6555_v39  ;;  %v6627_v37 = vld [vmem:[#allocation8 + $0x644] ss:$8 sps:$4 sm:$0xff]  }
 0x29e   :  { %4480 = vmatprep.subr.bf16.mxu0 %v6558_v40  ;;  %v6630_v39 = vld [vmem:[#allocation8 + $0xec4] ss:$8 sps:$4 sm:$0xff]   ;;  %v6625_v40 = vld [vmem:[#allocation8 + $0x640] ss:$8 sps:$4 sm:$0xff]  }
 0x2a0   :  { %4081 = vmatmul.mubr.bf16.vlgmr.msra.gmra.mrb[36].mxu0 %v7398_v32  ;;  %2165 = vmatpush1.bf16.msra.mxu1 %v6553_v43  ;;  %v6571_v32 = vld [vmem:[#allocation8 + $0x5b0] ss:$8 sps:$4 sm:$0xff]   ;;  %v6628_v43 = vld [vmem:[#allocation8 + $0xec0] ss:$8 sps:$4 sm:$0xff]  }
 0x2a1   :  { %4481 = vmatpush1.bf16.msra.mxu0 %v6556_v47  ;;  %4512 = vmatprep.mubr.bf16.mxu0 %v7420_v48  ;;  %v6582_v48 = vld [vmem:[#allocation8 + $0xe44] ss:$8 sps:$4 sm:$0xff]   ;;  %v6633_v47 = vld [vmem:[#allocation8 + $0x654] ss:$8 sps:$4 sm:$0xff]  }
 0x2a2   :  { %2166 = vmatprep.subr.bf16.mxu1 %v6561_v50  ;;  %4482 = vmatprep.subr.bf16.mxu0 %v6564_v58  ;;  %v6636_v50 = vld [vmem:[#allocation8 + $0xed4] ss:$8 sps:$4 sm:$0xff]   ;;  %v6631_v58 = vld [vmem:[#allocation8 + $0x650] ss:$8 sps:$4 sm:$0xff]  }
 0x2a4   :  { %2167 = vmatpush1.bf16.msra.mxu1 %v6559_v55  ;;  %v6634_v55 = vld [vmem:[#allocation8 + $0xed0] ss:$8 sps:$4 sm:$0xff]  }
 0x2a5   :  { %4483 = vmatpush1.bf16.msra.mxu0 %v6562_v29  ;;  %2168 = vmatprep.subr.bf16.mxu1 %v6567_v60  ;;  %v6639_v29 = vld [vmem:[#allocation8 + $0x664] ss:$8 sps:$4 sm:$0xff]  }
 0x2a6   :  { %4484 = vmatprep.subr.bf16.mxu0 %v6570_v61  ;;  %v6642_v60 = vld [vmem:[#allocation8 + $0xee4] ss:$8 sps:$4 sm:$0xff]   ;;  %v6637_v61 = vld [vmem:[#allocation8 + $0x660] ss:$8 sps:$4 sm:$0xff]  }
 0x2a8   :  { %2169 = vmatpush1.bf16.msra.mxu1 %v6565_v62  ;;  %v6640_v62 = vld [vmem:[#allocation8 + $0xee0] ss:$8 sps:$4 sm:$0xff]  }
 0x2a9   :  { %4485 = vmatpush1.bf16.msra.mxu0 %v6568_v63  ;;  %2170 = vmatprep.subr.bf16.mxu1 %v6573_v1  ;;  %v6645_v63 = vld [vmem:[#allocation8 + $0x674] ss:$8 sps:$4 sm:$0xff]  }
 0x2aa   :  { %4486 = vmatprep.subr.bf16.mxu0 %v6576_v2  ;;  %v6648_v1 = vld [vmem:[#allocation8 + $0xef4] ss:$8 sps:$4 sm:$0xff]   ;;  %v6643_v2 = vld [vmem:[#allocation8 + $0x670] ss:$8 sps:$4 sm:$0xff]  }
 0x2ac   :  { %2171 = vmatpush1.bf16.msra.mxu1 %v6571_v32  ;;  %v6646_v32 = vld [vmem:[#allocation8 + $0xef0] ss:$8 sps:$4 sm:$0xff]  }
 0x2ad   :  { %4487 = vmatpush1.bf16.msra.mxu0 %v6574_v3  ;;  %2172 = vmatprep.subr.bf16.mxu1 %v6579_v34  ;;  %v6651_v3 = vld [vmem:[#allocation8 + $0x684] ss:$8 sps:$4 sm:$0xff]  }
 0x2ae   :  { %4488 = vmatprep.subr.bf16.mxu0 %v6582_v48  ;;  %v6654_v34 = vld [vmem:[#allocation8 + $0xf04] ss:$8 sps:$4 sm:$0xff]   ;;  %v6649_v48 = vld [vmem:[#allocation8 + $0x680] ss:$8 sps:$4 sm:$0xff]  }
 0x2b0   :  { %2173 = vmatpush1.bf16.msra.mxu1 %v6577_v7  ;;  %v6652_v7 = vld [vmem:[#allocation8 + $0xf00] ss:$8 sps:$4 sm:$0xff]  }
 0x2b1   :  { %4489 = vmatpush1.bf16.msra.mxu0 %v6580_v9  ;;  %2174 = vmatprep.subr.bf16.mxu1 %v6585_v33  ;;  %v6657_v9 = vld [vmem:[#allocation8 + $0x694] ss:$8 sps:$4 sm:$0xff]  }
 0x2b2   :  { %4490 = vmatprep.subr.bf16.mxu0 %v6588_v10  ;;  %v6660_v33 = vld [vmem:[#allocation8 + $0xf14] ss:$8 sps:$4 sm:$0xff]   ;;  %v6655_v10 = vld [vmem:[#allocation8 + $0x690] ss:$8 sps:$4 sm:$0xff]  }
 0x2b4   :  { %2175 = vmatpush1.bf16.msra.mxu1 %v6583_v18  ;;  %v6658_v18 = vld [vmem:[#allocation8 + $0xf10] ss:$8 sps:$4 sm:$0xff]  }
 0x2b5   :  { %4491 = vmatpush1.bf16.msra.mxu0 %v6586_v11  ;;  %2176 = vmatprep.subr.bf16.mxu1 %v6591_v56  ;;  %v6663_v11 = vld [vmem:[#allocation8 + $0x6a4] ss:$8 sps:$4 sm:$0xff]  }
 0x2b6   :  { %4492 = vmatprep.subr.bf16.mxu0 %v6594_v57  ;;  %v6666_v56 = vld [vmem:[#allocation8 + $0xf24] ss:$8 sps:$4 sm:$0xff]   ;;  %v6661_v57 = vld [vmem:[#allocation8 + $0x6a0] ss:$8 sps:$4 sm:$0xff]  }
 0x2b8   :  { %2177 = vmatpush1.bf16.msra.mxu1 %v6589_v12  ;;  %v6664_v12 = vld [vmem:[#allocation8 + $0xf20] ss:$8 sps:$4 sm:$0xff]  }
 0x2b9   :  { %4493 = vmatpush1.bf16.msra.mxu0 %v6592_v13  ;;  %2178 = vmatprep.subr.bf16.mxu1 %v6597_v52  ;;  %v6669_v13 = vld [vmem:[#allocation8 + $0x6b4] ss:$8 sps:$4 sm:$0xff]  }
 0x2ba   :  { %4494 = vmatprep.subr.bf16.mxu0 %v6600_v26  ;;  %v6672_v52 = vld [vmem:[#allocation8 + $0xf34] ss:$8 sps:$4 sm:$0xff]   ;;  %v6670_v26 = vld [vmem:[#allocation8 + $0xf30] ss:$8 sps:$4 sm:$0xff]  }
 0x2bc   :  { %2179 = vmatpush1.bf16.msra.mxu1 %v6595_v27  ;;  %v6675_v27 = vld [vmem:[#allocation8 + $0x6c4] ss:$8 sps:$4 sm:$0xff]  }
 0x2bd   :  { %4495 = vmatpush1.bf16.msra.mxu0 %v6598_v15  ;;  %2580 = vmatprep.subr.bf16.mxu1 %v6603_v16  ;;  %v6673_v15 = vld [vmem:[#allocation8 + $0x6c0] ss:$8 sps:$4 sm:$0xff]  }
 0x2be   :  { %4496 = vmatprep.subr.bf16.mxu0 %v6606_v19  ;;  %v6676_v16 = vld [vmem:[#allocation8 + $0xf40] ss:$8 sps:$4 sm:$0xff]   ;;  %v6681_v19 = vld [vmem:[#allocation8 + $0x6d4] ss:$8 sps:$4 sm:$0xff]  }
 0x2bf   :  { %2181 = vmatmul.mubr.bf16.vlgmr.msra.gmra.mrb[36].mxu1 %v7334_v25  ;;  %v6619_v25 = vld [vmem:[#allocation8 + $0x630] ss:$8 sps:$4 sm:$0xff]  }
 0x2c0   :  { %2581 = vmatpush1.bf16.msra.mxu1 %v6601_v20  ;;  %2612 = vmatprep.mubr.bf16.mxu1 %v7356_v8  ;;  %v6622_v8 = vld [vmem:[#allocation8 + $0xeb0] ss:$8 sps:$4 sm:$0xff]   ;;  %v6684_v20 = vld [vmem:[#allocation8 + $0xf54] ss:$8 sps:$4 sm:$0xff]  }
 0x2c1   :  { %4497 = vmatpush1.bf16.msra.mxu0 %v6604_v21  ;;  %2582 = vmatprep.subr.bf16.mxu1 %v6609_v22  ;;  %v6679_v21 = vld [vmem:[#allocation8 + $0x6d0] ss:$8 sps:$4 sm:$0xff]  }
 0x2c2   :  { %4498 = vmatprep.subr.bf16.mxu0 %v6612_v54  ;;  %v6682_v22 = vld [vmem:[#allocation8 + $0xf50] ss:$8 sps:$4 sm:$0xff]   ;;  %v6687_v54 = vld [vmem:[#allocation8 + $0x6e4] ss:$8 sps:$4 sm:$0xff]  }
 0x2c4   :  { %2583 = vmatpush1.bf16.msra.mxu1 %v6607_v23  ;;  %v6690_v23 = vld [vmem:[#allocation8 + $0xf64] ss:$8 sps:$4 sm:$0xff]  }
 0x2c5   :  { %4499 = vmatpush1.bf16.msra.mxu0 %v6610_v28  ;;  %2584 = vmatprep.subr.bf16.mxu1 %v6615_v59  ;;  %v6685_v28 = vld [vmem:[#allocation8 + $0x6e0] ss:$8 sps:$4 sm:$0xff]  }
 0x2c6   :  { %4500 = vmatprep.subr.bf16.mxu0 %v6618_v53  ;;  %v6688_v59 = vld [vmem:[#allocation8 + $0xf60] ss:$8 sps:$4 sm:$0xff]   ;;  %v6693_v53 = vld [vmem:[#allocation8 + $0x6f4] ss:$8 sps:$4 sm:$0xff]  }
 0x2c8   :  { %2585 = vmatpush1.bf16.msra.mxu1 %v6613_v17  ;;  %v6696_v17 = vld [vmem:[#allocation8 + $0xf74] ss:$8 sps:$4 sm:$0xff]  }
 0x2c9   :  { %4501 = vmatpush1.bf16.msra.mxu0 %v6616_v31  ;;  %2586 = vmatprep.subr.bf16.mxu1 %v6621_v35  ;;  %v6691_v31 = vld [vmem:[#allocation8 + $0x6f0] ss:$8 sps:$4 sm:$0xff]  }
 0x2ca   :  { %4502 = vmatprep.subr.bf16.mxu0 %v6624_v41  ;;  %v6694_v35 = vld [vmem:[#allocation8 + $0xf70] ss:$8 sps:$4 sm:$0xff]   ;;  %v6699_v41 = vld [vmem:[#allocation8 + $0x704] ss:$8 sps:$4 sm:$0xff]  }
 0x2cc   :  { %2587 = vmatpush1.bf16.msra.mxu1 %v6619_v25  ;;  %v6702_v25 = vld [vmem:[#allocation8 + $0xf84] ss:$8 sps:$4 sm:$0xff]  }
 0x2cd   :  { %4503 = vmatpush1.bf16.msra.mxu0 %v6622_v8  ;;  %2588 = vmatprep.subr.bf16.mxu1 %v6627_v37  ;;  %v6697_v8 = vld [vmem:[#allocation8 + $0x700] ss:$8 sps:$4 sm:$0xff]  }
 0x2ce   :  { %4504 = vmatprep.subr.bf16.mxu0 %v6630_v39  ;;  %v6700_v37 = vld [vmem:[#allocation8 + $0xf80] ss:$8 sps:$4 sm:$0xff]   ;;  %v6705_v39 = vld [vmem:[#allocation8 + $0x714] ss:$8 sps:$4 sm:$0xff]  }
 0x2d0   :  { %2589 = vmatpush1.bf16.msra.mxu1 %v6625_v40  ;;  %v6708_v40 = vld [vmem:[#allocation8 + $0xf94] ss:$8 sps:$4 sm:$0xff]  }
 0x2d1   :  { %4505 = vmatpush1.bf16.msra.mxu0 %v6628_v43  ;;  %2590 = vmatprep.subr.bf16.mxu1 %v6633_v47  ;;  %v6703_v43 = vld [vmem:[#allocation8 + $0x710] ss:$8 sps:$4 sm:$0xff]  }
 0x2d2   :  { %4506 = vmatprep.subr.bf16.mxu0 %v6636_v50  ;;  %v6706_v47 = vld [vmem:[#allocation8 + $0xf90] ss:$8 sps:$4 sm:$0xff]   ;;  %v6711_v50 = vld [vmem:[#allocation8 + $0x724] ss:$8 sps:$4 sm:$0xff]  }
 0x2d4   :  { %2591 = vmatpush1.bf16.msra.mxu1 %v6631_v58  ;;  %v6714_v58 = vld [vmem:[#allocation8 + $0xfa4] ss:$8 sps:$4 sm:$0xff]  }
 0x2d5   :  { %4507 = vmatpush1.bf16.msra.mxu0 %v6634_v55  ;;  %2592 = vmatprep.subr.bf16.mxu1 %v6639_v29  ;;  %v6709_v55 = vld [vmem:[#allocation8 + $0x720] ss:$8 sps:$4 sm:$0xff]  }
 0x2d6   :  { %4508 = vmatprep.subr.bf16.mxu0 %v6642_v60  ;;  %v6712_v29 = vld [vmem:[#allocation8 + $0xfa0] ss:$8 sps:$4 sm:$0xff]   ;;  %v6717_v60 = vld [vmem:[#allocation8 + $0x734] ss:$8 sps:$4 sm:$0xff]  }
 0x2d8   :  { %2593 = vmatpush1.bf16.msra.mxu1 %v6637_v61  ;;  %v6720_v61 = vld [vmem:[#allocation8 + $0xfb4] ss:$8 sps:$4 sm:$0xff]  }
 0x2d9   :  { %4509 = vmatpush1.bf16.msra.mxu0 %v6640_v62  ;;  %2594 = vmatprep.subr.bf16.mxu1 %v6645_v63  ;;  %v6723_v62 = vld [vmem:[#allocation8 + $0x744] ss:$8 sps:$4 sm:$0xff]  }
 0x2da   :  { %4510 = vmatprep.subr.bf16.mxu0 %v6648_v1  ;;  %v6726_v63 = vld [vmem:[#allocation8 + $0xfc4] ss:$8 sps:$4 sm:$0xff]   ;;  %v6721_v1 = vld [vmem:[#allocation8 + $0x740] ss:$8 sps:$4 sm:$0xff]  }
 0x2dc   :  { %2595 = vmatpush1.bf16.msra.mxu1 %v6643_v2  ;;  %v6724_v2 = vld [vmem:[#allocation8 + $0xfc0] ss:$8 sps:$4 sm:$0xff]  }
 0x2dd   :  { %4511 = vmatpush1.bf16.msra.mxu0 %v6646_v32  ;;  %2596 = vmatprep.subr.bf16.mxu1 %v6651_v3  ;;  %v6729_v32 = vld [vmem:[#allocation8 + $0x754] ss:$8 sps:$4 sm:$0xff]  }
 0x2de   :  { %4523 = vmatprep.subr.bf16.mxu0 %v6654_v34  ;;  %v6732_v3 = vld [vmem:[#allocation8 + $0xfd4] ss:$8 sps:$4 sm:$0xff]   ;;  %v6727_v34 = vld [vmem:[#allocation8 + $0x750] ss:$8 sps:$4 sm:$0xff]  }
 0x2e0   :  { %4513 = vmatmul.mubr.bf16.vlgmr.msra.gmra.mrb[36].mxu0 %v7417_v38  ;;  %2597 = vmatpush1.bf16.msra.mxu1 %v6649_v48  ;;  %v6667_v38 = vld [vmem:[#allocation8 + $0x6b0] ss:$8 sps:$4 sm:$0xff]  }
 0x2e1   :  { %4524 = vmatpush1.bf16.msra.mxu0 %v6652_v7  ;;  %4555 = vmatprep.mubr.bf16.mxu0 %v7414_v30  ;;  %v6678_v30 = vld [vmem:[#allocation8 + $0xf44] ss:$8 sps:$4 sm:$0xff]   ;;  %v6730_v48 = vld [vmem:[#allocation8 + $0xfd0] ss:$8 sps:$4 sm:$0xff]  }
 0x2e2   :  { %2598 = vmatprep.subr.bf16.mxu1 %v6657_v9  ;;  %4525 = vmatprep.subr.bf16.mxu0 %v6660_v33  ;;  %v6735_v7 = vld [vmem:[#allocation8 + $0x764] ss:$8 sps:$4 sm:$0xff]   ;;  %v6733_v33 = vld [vmem:[#allocation8 + $0x760] ss:$8 sps:$4 sm:$0xff]  }
 0x2e3   :  { %v6738_v9 = vld [vmem:[#allocation8 + $0xfe4] ss:$8 sps:$4 sm:$0xff]  }
 0x2e4   :  { %2599 = vmatpush1.bf16.msra.mxu1 %v6655_v10  ;;  %v6736_v10 = vld [vmem:[#allocation8 + $0xfe0] ss:$8 sps:$4 sm:$0xff]  }
 0x2e5   :  { %4526 = vmatpush1.bf16.msra.mxu0 %v6658_v18  ;;  %2600 = vmatprep.subr.bf16.mxu1 %v6663_v11  ;;  %v6741_v18 = vld [vmem:[#allocation8 + $0x774] ss:$8 sps:$4 sm:$0xff]  }
 0x2e6   :  { %4527 = vmatprep.subr.bf16.mxu0 %v6666_v56  ;;  %v6744_v11 = vld [vmem:[#allocation8 + $0xff4] ss:$8 sps:$4 sm:$0xff]   ;;  %v6739_v56 = vld [vmem:[#allocation8 + $0x770] ss:$8 sps:$4 sm:$0xff]  }
 0x2e8   :  { %2601 = vmatpush1.bf16.msra.mxu1 %v6661_v57  ;;  %v6742_v57 = vld [vmem:[#allocation8 + $0xff0] ss:$8 sps:$4 sm:$0xff]  }
 0x2e9   :  { %4528 = vmatpush1.bf16.msra.mxu0 %v6664_v12  ;;  %2602 = vmatprep.subr.bf16.mxu1 %v6669_v13  ;;  %v6747_v12 = vld [vmem:[#allocation8 + $0x784] ss:$8 sps:$4 sm:$0xff]  }
 0x2ea   :  { %4529 = vmatprep.subr.bf16.mxu0 %v6672_v52  ;;  %v6750_v13 = vld [vmem:[#allocation8 + $0x1004] ss:$8 sps:$4 sm:$0xff]   ;;  %v6745_v52 = vld [vmem:[#allocation8 + $0x780] ss:$8 sps:$4 sm:$0xff]  }
 0x2ec   :  { %2603 = vmatpush1.bf16.msra.mxu1 %v6667_v38  ;;  %v6748_v38 = vld [vmem:[#allocation8 + $0x1000] ss:$8 sps:$4 sm:$0xff]  }
 0x2ed   :  { %4530 = vmatpush1.bf16.msra.mxu0 %v6670_v26  ;;  %2604 = vmatprep.subr.bf16.mxu1 %v6675_v27  ;;  %v6753_v26 = vld [vmem:[#allocation8 + $0x794] ss:$8 sps:$4 sm:$0xff]  }
 0x2ee   :  { %4531 = vmatprep.subr.bf16.mxu0 %v6678_v30  ;;  %v6756_v27 = vld [vmem:[#allocation8 + $0x1014] ss:$8 sps:$4 sm:$0xff]   ;;  %v6751_v30 = vld [vmem:[#allocation8 + $0x790] ss:$8 sps:$4 sm:$0xff]  }
 0x2f0   :  { %2605 = vmatpush1.bf16.msra.mxu1 %v6673_v15  ;;  %v6754_v15 = vld [vmem:[#allocation8 + $0x1010] ss:$8 sps:$4 sm:$0xff]  }
 0x2f1   :  { %4532 = vmatpush1.bf16.msra.mxu0 %v6676_v16  ;;  %2606 = vmatprep.subr.bf16.mxu1 %v6681_v19  ;;  %v6759_v16 = vld [vmem:[#allocation8 + $0x7a4] ss:$8 sps:$4 sm:$0xff]  }
 0x2f2   :  { %4533 = vmatprep.subr.bf16.mxu0 %v6684_v20  ;;  %v6762_v19 = vld [vmem:[#allocation8 + $0x1024] ss:$8 sps:$4 sm:$0xff]   ;;  %v6757_v20 = vld [vmem:[#allocation8 + $0x7a0] ss:$8 sps:$4 sm:$0xff]  }
 0x2f4   :  { %2607 = vmatpush1.bf16.msra.mxu1 %v6679_v21  ;;  %v6760_v21 = vld [vmem:[#allocation8 + $0x1020] ss:$8 sps:$4 sm:$0xff]  }
 0x2f5   :  { %4534 = vmatpush1.bf16.msra.mxu0 %v6682_v22  ;;  %2608 = vmatprep.subr.bf16.mxu1 %v6687_v54  ;;  %v6765_v22 = vld [vmem:[#allocation8 + $0x7b4] ss:$8 sps:$4 sm:$0xff]  }
 0x2f6   :  { %4535 = vmatprep.subr.bf16.mxu0 %v6690_v23  ;;  %v6768_v54 = vld [vmem:[#allocation8 + $0x1034] ss:$8 sps:$4 sm:$0xff]   ;;  %v6766_v23 = vld [vmem:[#allocation8 + $0x1030] ss:$8 sps:$4 sm:$0xff]  }
 0x2f8   :  { %2609 = vmatpush1.bf16.msra.mxu1 %v6685_v28  ;;  %v6771_v28 = vld [vmem:[#allocation8 + $0x7c4] ss:$8 sps:$4 sm:$0xff]  }
 0x2f9   :  { %4536 = vmatpush1.bf16.msra.mxu0 %v6688_v59  ;;  %2610 = vmatprep.subr.bf16.mxu1 %v6693_v53  ;;  %v6769_v59 = vld [vmem:[#allocation8 + $0x7c0] ss:$8 sps:$4 sm:$0xff]  }
 0x2fa   :  { %4537 = vmatprep.subr.bf16.mxu0 %v6696_v17  ;;  %v6772_v53 = vld [vmem:[#allocation8 + $0x1040] ss:$8 sps:$4 sm:$0xff]   ;;  %v6777_v17 = vld [vmem:[#allocation8 + $0x7d4] ss:$8 sps:$4 sm:$0xff]  }
 0x2fc   :  { %2611 = vmatpush1.bf16.msra.mxu1 %v6691_v31  ;;  %v6780_v31 = vld [vmem:[#allocation8 + $0x1054] ss:$8 sps:$4 sm:$0xff]  }
 0x2fd   :  { %4538 = vmatpush1.bf16.msra.mxu0 %v6694_v35  ;;  %2623 = vmatprep.subr.bf16.mxu1 %v6699_v41  ;;  %v6775_v35 = vld [vmem:[#allocation8 + $0x7d0] ss:$8 sps:$4 sm:$0xff]  }
 0x2fe   :  { %4539 = vmatprep.subr.bf16.mxu0 %v6702_v25  ;;  %v6778_v41 = vld [vmem:[#allocation8 + $0x1050] ss:$8 sps:$4 sm:$0xff]   ;;  %v6783_v25 = vld [vmem:[#allocation8 + $0x7e4] ss:$8 sps:$4 sm:$0xff]  }
 0x2ff   :  { %2613 = vmatmul.mubr.bf16.vlgmr.msra.gmra.mrb[36].mxu1 %v7352_v5  ;;  %v6715_v5 = vld [vmem:[#allocation8 + $0x730] ss:$8 sps:$4 sm:$0xff]  }
 0x300   :  { %2624 = vmatpush1.bf16.msra.mxu1 %v6697_v8  ;;  %2655 = vmatprep.mubr.bf16.mxu1 %v7354_v6  ;;  %v6718_v6 = vld [vmem:[#allocation8 + $0xfb0] ss:$8 sps:$4 sm:$0xff]   ;;  %v6786_v8 = vld [vmem:[#allocation8 + $0x1064] ss:$8 sps:$4 sm:$0xff]  }
 0x301   :  { %4540 = vmatpush1.bf16.msra.mxu0 %v6700_v37  ;;  %2625 = vmatprep.subr.bf16.mxu1 %v6705_v39  ;;  %v6781_v37 = vld [vmem:[#allocation8 + $0x7e0] ss:$8 sps:$4 sm:$0xff]  }
 0x302   :  { %4541 = vmatprep.subr.bf16.mxu0 %v6708_v40  ;;  %v6784_v39 = vld [vmem:[#allocation8 + $0x1060] ss:$8 sps:$4 sm:$0xff]   ;;  %v6789_v40 = vld [vmem:[#allocation8 + $0x7f4] ss:$8 sps:$4 sm:$0xff]  }
 0x304   :  { %2626 = vmatpush1.bf16.msra.mxu1 %v6703_v43  ;;  %v6792_v43 = vld [vmem:[#allocation8 + $0x1074] ss:$8 sps:$4 sm:$0xff]  }
 0x305   :  { %4542 = vmatpush1.bf16.msra.mxu0 %v6706_v47  ;;  %2627 = vmatprep.subr.bf16.mxu1 %v6711_v50  ;;  %v6787_v47 = vld [vmem:[#allocation8 + $0x7f0] ss:$8 sps:$4 sm:$0xff]  }
 0x306   :  { %4543 = vmatprep.subr.bf16.mxu0 %v6714_v58  ;;  %v6790_v50 = vld [vmem:[#allocation8 + $0x1070] ss:$8 sps:$4 sm:$0xff]   ;;  %v6795_v58 = vld [vmem:[#allocation8 + $0x804] ss:$8 sps:$4 sm:$0xff]  }
 0x308   :  { %2628 = vmatpush1.bf16.msra.mxu1 %v6709_v55  ;;  %v6798_v55 = vld [vmem:[#allocation8 + $0x1084] ss:$8 sps:$4 sm:$0xff]  }
 0x309   :  { %4544 = vmatpush1.bf16.msra.mxu0 %v6712_v29  ;;  %2629 = vmatprep.subr.bf16.mxu1 %v6717_v60  ;;  %v6793_v29 = vld [vmem:[#allocation8 + $0x800] ss:$8 sps:$4 sm:$0xff]  }
 0x30a   :  { %4545 = vmatprep.subr.bf16.mxu0 %v6720_v61  ;;  %v6796_v60 = vld [vmem:[#allocation8 + $0x1080] ss:$8 sps:$4 sm:$0xff]   ;;  %v6801_v61 = vld [vmem:[#allocation8 + $0x814] ss:$8 sps:$4 sm:$0xff]  }
 0x30c   :  { %2630 = vmatpush1.bf16.msra.mxu1 %v6715_v5  ;;  %v6804_v5 = vld [vmem:[#allocation8 + $0x1094] ss:$8 sps:$4 sm:$0xff]  }
 0x30d   :  { %4546 = vmatpush1.bf16.msra.mxu0 %v6718_v6  ;;  %2631 = vmatprep.subr.bf16.mxu1 %v6723_v62  ;;  %v6799_v6 = vld [vmem:[#allocation8 + $0x810] ss:$8 sps:$4 sm:$0xff]  }
 0x30e   :  { %4547 = vmatprep.subr.bf16.mxu0 %v6726_v63  ;;  %v6802_v62 = vld [vmem:[#allocation8 + $0x1090] ss:$8 sps:$4 sm:$0xff]   ;;  %v6807_v63 = vld [vmem:[#allocation8 + $0x824] ss:$8 sps:$4 sm:$0xff]  }
 0x310   :  { %2632 = vmatpush1.bf16.msra.mxu1 %v6721_v1  ;;  %v6810_v1 = vld [vmem:[#allocation8 + $0x10a4] ss:$8 sps:$4 sm:$0xff]  }
 0x311   :  { %4548 = vmatpush1.bf16.msra.mxu0 %v6724_v2  ;;  %2633 = vmatprep.subr.bf16.mxu1 %v6729_v32  ;;  %v6805_v2 = vld [vmem:[#allocation8 + $0x820] ss:$8 sps:$4 sm:$0xff]  }
 0x312   :  { %4549 = vmatprep.subr.bf16.mxu0 %v6732_v3  ;;  %v6808_v32 = vld [vmem:[#allocation8 + $0x10a0] ss:$8 sps:$4 sm:$0xff]   ;;  %v6813_v3 = vld [vmem:[#allocation8 + $0x834] ss:$8 sps:$4 sm:$0xff]  }
 0x314   :  { %2634 = vmatpush1.bf16.msra.mxu1 %v6727_v34  ;;  %v6816_v34 = vld [vmem:[#allocation8 + $0x10b4] ss:$8 sps:$4 sm:$0xff]  }
 0x315   :  { %4550 = vmatpush1.bf16.msra.mxu0 %v6730_v48  ;;  %2635 = vmatprep.subr.bf16.mxu1 %v6735_v7  ;;  %v6819_v48 = vld [vmem:[#allocation8 + $0x844] ss:$8 sps:$4 sm:$0xff]  }
 0x316   :  { %4551 = vmatprep.subr.bf16.mxu0 %v6738_v9  ;;  %v6822_v7 = vld [vmem:[#allocation8 + $0x10c4] ss:$8 sps:$4 sm:$0xff]   ;;  %v6817_v9 = vld [vmem:[#allocation8 + $0x840] ss:$8 sps:$4 sm:$0xff]  }
 0x318   :  { %2636 = vmatpush1.bf16.msra.mxu1 %v6733_v33  ;;  %v6820_v33 = vld [vmem:[#allocation8 + $0x10c0] ss:$8 sps:$4 sm:$0xff]  }
 0x319   :  { %4552 = vmatpush1.bf16.msra.mxu0 %v6736_v10  ;;  %2637 = vmatprep.subr.bf16.mxu1 %v6741_v18  ;;  %v6825_v10 = vld [vmem:[#allocation8 + $0x854] ss:$8 sps:$4 sm:$0xff]  }
 0x31a   :  { %4553 = vmatprep.subr.bf16.mxu0 %v6744_v11  ;;  %v6828_v18 = vld [vmem:[#allocation8 + $0x10d4] ss:$8 sps:$4 sm:$0xff]   ;;  %v6823_v11 = vld [vmem:[#allocation8 + $0x850] ss:$8 sps:$4 sm:$0xff]  }
 0x31c   :  { %2638 = vmatpush1.bf16.msra.mxu1 %v6739_v56  ;;  %v6826_v56 = vld [vmem:[#allocation8 + $0x10d0] ss:$8 sps:$4 sm:$0xff]  }
 0x31d   :  { %4554 = vmatpush1.bf16.msra.mxu0 %v6742_v57  ;;  %2639 = vmatprep.subr.bf16.mxu1 %v6747_v12  ;;  %v6831_v57 = vld [vmem:[#allocation8 + $0x864] ss:$8 sps:$4 sm:$0xff]  }
 0x31e   :  { %4955 = vmatprep.subr.bf16.mxu0 %v6750_v13  ;;  %v6834_v12 = vld [vmem:[#allocation8 + $0x10e4] ss:$8 sps:$4 sm:$0xff]   ;;  %v6829_v13 = vld [vmem:[#allocation8 + $0x860] ss:$8 sps:$4 sm:$0xff]  }
 0x320   :  { %4556 = vmatmul.mubr.bf16.vlgmr.msra.gmra.mrb[36].mxu0 %v7412_v24  ;;  %2640 = vmatpush1.bf16.msra.mxu1 %v6745_v52  ;;  %v6763_v24 = vld [vmem:[#allocation8 + $0x7b0] ss:$8 sps:$4 sm:$0xff]   ;;  %v6832_v52 = vld [vmem:[#allocation8 + $0x10e0] ss:$8 sps:$4 sm:$0xff]  }
 0x321   :  { %4956 = vmatpush1.bf16.msra.mxu0 %v6748_v38  ;;  %4987 = vmatprep.mubr.bf16.mxu0 %v7434_v0  ;;  %v6774_v0 = vld [vmem:[#allocation8 + $0x1044] ss:$8 sps:$4 sm:$0xff]   ;;  %v6837_v38 = vld [vmem:[#allocation8 + $0x874] ss:$8 sps:$4 sm:$0xff]  }
 0x322   :  { %2641 = vmatprep.subr.bf16.mxu1 %v6753_v26  ;;  %4957 = vmatprep.subr.bf16.mxu0 %v6756_v27  ;;  %v6840_v26 = vld [vmem:[#allocation8 + $0x10f4] ss:$8 sps:$4 sm:$0xff]   ;;  %v6835_v27 = vld [vmem:[#allocation8 + $0x870] ss:$8 sps:$4 sm:$0xff]  }
 0x324   :  { %2642 = vmatpush1.bf16.msra.mxu1 %v6751_v30  ;;  %v6838_v30 = vld [vmem:[#allocation8 + $0x10f0] ss:$8 sps:$4 sm:$0xff]  }
 0x325   :  { %4958 = vmatpush1.bf16.msra.mxu0 %v6754_v15  ;;  %2643 = vmatprep.subr.bf16.mxu1 %v6759_v16  ;;  %v6843_v15 = vld [vmem:[#allocation8 + $0x884] ss:$8 sps:$4 sm:$0xff]  }
 0x326   :  { %4959 = vmatprep.subr.bf16.mxu0 %v6762_v19  ;;  %v6846_v16 = vld [vmem:[#allocation8 + $0x1104] ss:$8 sps:$4 sm:$0xff]   ;;  %v6841_v19 = vld [vmem:[#allocation8 + $0x880] ss:$8 sps:$4 sm:$0xff]  }
 0x328   :  { %2644 = vmatpush1.bf16.msra.mxu1 %v6757_v20  ;;  %v6844_v20 = vld [vmem:[#allocation8 + $0x1100] ss:$8 sps:$4 sm:$0xff]  }
 0x329   :  { %4960 = vmatpush1.bf16.msra.mxu0 %v6760_v21  ;;  %2645 = vmatprep.subr.bf16.mxu1 %v6765_v22  ;;  %v6849_v21 = vld [vmem:[#allocation8 + $0x894] ss:$8 sps:$4 sm:$0xff]  }
 0x32a   :  { %4961 = vmatprep.subr.bf16.mxu0 %v6768_v54  ;;  %v6852_v22 = vld [vmem:[#allocation8 + $0x1114] ss:$8 sps:$4 sm:$0xff]   ;;  %v6847_v54 = vld [vmem:[#allocation8 + $0x890] ss:$8 sps:$4 sm:$0xff]  }
 0x32c   :  { %2646 = vmatpush1.bf16.msra.mxu1 %v6763_v24  ;;  %v6850_v24 = vld [vmem:[#allocation8 + $0x1110] ss:$8 sps:$4 sm:$0xff]  }
 0x32d   :  { %4962 = vmatpush1.bf16.msra.mxu0 %v6766_v23  ;;  %2647 = vmatprep.subr.bf16.mxu1 %v6771_v28  ;;  %v6855_v23 = vld [vmem:[#allocation8 + $0x8a4] ss:$8 sps:$4 sm:$0xff]  }
 0x32e   :  { %4963 = vmatprep.subr.bf16.mxu0 %v6774_v0  ;;  %v6858_v28 = vld [vmem:[#allocation8 + $0x1124] ss:$8 sps:$4 sm:$0xff]   ;;  %v6853_v0 = vld [vmem:[#allocation8 + $0x8a0] ss:$8 sps:$4 sm:$0xff]  }
 0x330   :  { %2648 = vmatpush1.bf16.msra.mxu1 %v6769_v59  ;;  %v6856_v59 = vld [vmem:[#allocation8 + $0x1120] ss:$8 sps:$4 sm:$0xff]  }
 0x331   :  { %4964 = vmatpush1.bf16.msra.mxu0 %v6772_v53  ;;  %2649 = vmatprep.subr.bf16.mxu1 %v6777_v17  ;;  %v6861_v53 = vld [vmem:[#allocation8 + $0x8b4] ss:$8 sps:$4 sm:$0xff]  }
 0x332   :  { %4965 = vmatprep.subr.bf16.mxu0 %v6780_v31  ;;  %v6864_v17 = vld [vmem:[#allocation8 + $0x1134] ss:$8 sps:$4 sm:$0xff]   ;;  %v6862_v31 = vld [vmem:[#allocation8 + $0x1130] ss:$8 sps:$4 sm:$0xff]  }
 0x334   :  { %2650 = vmatpush1.bf16.msra.mxu1 %v6775_v35  ;;  %v6867_v35 = vld [vmem:[#allocation8 + $0x8c4] ss:$8 sps:$4 sm:$0xff]  }
 0x335   :  { %4966 = vmatpush1.bf16.msra.mxu0 %v6778_v41  ;;  %2651 = vmatprep.subr.bf16.mxu1 %v6783_v25  ;;  %v6865_v41 = vld [vmem:[#allocation8 + $0x8c0] ss:$8 sps:$4 sm:$0xff]  }
 0x336   :  { %4967 = vmatprep.subr.bf16.mxu0 %v6786_v8  ;;  %v6868_v25 = vld [vmem:[#allocation8 + $0x1140] ss:$8 sps:$4 sm:$0xff]   ;;  %v6873_v8 = vld [vmem:[#allocation8 + $0x8d4] ss:$8 sps:$4 sm:$0xff]  }
 0x338   :  { %2652 = vmatpush1.bf16.msra.mxu1 %v6781_v37  ;;  %v6876_v37 = vld [vmem:[#allocation8 + $0x1154] ss:$8 sps:$4 sm:$0xff]  }
 0x339   :  { %4968 = vmatpush1.bf16.msra.mxu0 %v6784_v39  ;;  %2653 = vmatprep.subr.bf16.mxu1 %v6789_v40  ;;  %v6871_v39 = vld [vmem:[#allocation8 + $0x8d0] ss:$8 sps:$4 sm:$0xff]  }
 0x33a   :  { %4969 = vmatprep.subr.bf16.mxu0 %v6792_v43  ;;  %v6874_v40 = vld [vmem:[#allocation8 + $0x1150] ss:$8 sps:$4 sm:$0xff]   ;;  %v6879_v43 = vld [vmem:[#allocation8 + $0x8e4] ss:$8 sps:$4 sm:$0xff]  }
 0x33c   :  { %2654 = vmatpush1.bf16.msra.mxu1 %v6787_v47  ;;  %v6882_v47 = vld [vmem:[#allocation8 + $0x1164] ss:$8 sps:$4 sm:$0xff]  }
 0x33d   :  { %4970 = vmatpush1.bf16.msra.mxu0 %v6790_v50  ;;  %3055 = vmatprep.subr.bf16.mxu1 %v6795_v58  ;;  %v6877_v50 = vld [vmem:[#allocation8 + $0x8e0] ss:$8 sps:$4 sm:$0xff]  }
 0x33e   :  { %4971 = vmatprep.subr.bf16.mxu0 %v6798_v55  ;;  %v6880_v58 = vld [vmem:[#allocation8 + $0x1160] ss:$8 sps:$4 sm:$0xff]   ;;  %v6885_v55 = vld [vmem:[#allocation8 + $0x8f4] ss:$8 sps:$4 sm:$0xff]  }
 0x33f   :  { %2656 = vmatmul.mubr.bf16.vlgmr.msra.gmra.mrb[36].mxu1 %v7350_v4  ;;  %v6811_v4 = vld [vmem:[#allocation8 + $0x830] ss:$8 sps:$4 sm:$0xff]  }
 0x340   :  { %3056 = vmatpush1.bf16.msra.mxu1 %v6793_v29  ;;  %3087 = vmatprep.mubr.bf16.mxu1 %v7368_v44  ;;  %v6814_v44 = vld [vmem:[#allocation8 + $0x10b0] ss:$8 sps:$4 sm:$0xff]   ;;  %v6888_v29 = vld [vmem:[#allocation8 + $0x1174] ss:$8 sps:$4 sm:$0xff]  }
 0x341   :  { %4972 = vmatpush1.bf16.msra.mxu0 %v6796_v60  ;;  %3057 = vmatprep.subr.bf16.mxu1 %v6801_v61  ;;  %v6883_v60 = vld [vmem:[#allocation8 + $0x8f0] ss:$8 sps:$4 sm:$0xff]  }
 0x342   :  { %4973 = vmatprep.subr.bf16.mxu0 %v6804_v5  ;;  %v6886_v61 = vld [vmem:[#allocation8 + $0x1170] ss:$8 sps:$4 sm:$0xff]   ;;  %v6891_v5 = vld [vmem:[#allocation8 + $0x1184] ss:$8 sps:$4 sm:$0xff]  }
 0x344   :  { %3058 = vmatpush1.bf16.msra.mxu1 %v6799_v6  ;;  %v6889_v6 = vld [vmem:[#allocation8 + $0x1180] ss:$8 sps:$4 sm:$0xff]  }
 0x345   :  { %4974 = vmatpush1.bf16.msra.mxu0 %v6802_v62  ;;  %3059 = vmatprep.subr.bf16.mxu1 %v6807_v63  ;;  %v6894_v62 = vld [vmem:[#allocation8 + $0x1194] ss:$8 sps:$4 sm:$0xff]   ;;  %v6892_v63 = vld [vmem:[#allocation8 + $0x1190] ss:$8 sps:$4 sm:$0xff]  }
 0x346   :  { %4975 = vmatprep.subr.bf16.mxu0 %v6810_v1  ;;  %v6897_v1 = vld [vmem:[#allocation8 + $0x11a4] ss:$8 sps:$4 sm:$0xff]  }
 0x348   :  { %3060 = vmatpush1.bf16.msra.mxu1 %v6805_v2  ;;  %v6895_v2 = vld [vmem:[#allocation8 + $0x11a0] ss:$8 sps:$4 sm:$0xff]  }
 0x349   :  { %4976 = vmatpush1.bf16.msra.mxu0 %v6808_v32  ;;  %3061 = vmatprep.subr.bf16.mxu1 %v6813_v3  ;;  %v6900_v32 = vld [vmem:[#allocation8 + $0x11b4] ss:$8 sps:$4 sm:$0xff]   ;;  %v6898_v3 = vld [vmem:[#allocation8 + $0x11b0] ss:$8 sps:$4 sm:$0xff]  }
 0x34a   :  { %4977 = vmatprep.subr.bf16.mxu0 %v6816_v34  ;;  %v6903_v34 = vld [vmem:[#allocation8 + $0x11c4] ss:$8 sps:$4 sm:$0xff]  }
 0x34c   :  { %3062 = vmatpush1.bf16.msra.mxu1 %v6811_v4  ;;  %v6901_v4 = vld [vmem:[#allocation8 + $0x11c0] ss:$8 sps:$4 sm:$0xff]  }
 0x34d   :  { %4978 = vmatpush1.bf16.msra.mxu0 %v6814_v44  ;;  %3063 = vmatprep.subr.bf16.mxu1 %v6819_v48  ;;  %v6906_v44 = vld [vmem:[#allocation8 + $0x11d4] ss:$8 sps:$4 sm:$0xff]   ;;  %v6904_v48 = vld [vmem:[#allocation8 + $0x11d0] ss:$8 sps:$4 sm:$0xff]  }
 0x34e   :  { %4979 = vmatprep.subr.bf16.mxu0 %v6822_v7  ;;  %v6907_v7 = vld [vmem:[#allocation8 + $0x11e0] ss:$8 sps:$4 sm:$0xff]  }
 0x350   :  { %3064 = vmatpush1.bf16.msra.mxu1 %v6817_v9  ;;  %v6912_v9 = vld [vmem:[#allocation8 + $0x11f4] ss:$8 sps:$4 sm:$0xff]  }
 0x351   :  { %4980 = vmatpush1.bf16.msra.mxu0 %v6820_v33  ;;  %3065 = vmatprep.subr.bf16.mxu1 %v6825_v10  ;;  %v6910_v33 = vld [vmem:[#allocation8 + $0x11f0] ss:$8 sps:$4 sm:$0xff]   ;;  %v6913_v10 = vld [vmem:[#allocation11 + $0x40] sm:$0xff]  }
 0x352   :  { %4981 = vmatprep.subr.bf16.mxu0 %v6828_v18  ;;  %v6914_v18 = vld [vmem:[#allocation11] sm:$0xff]  }
 0x354   :  { %3066 = vmatpush1.bf16.msra.mxu1 %v6823_v11  ;;  %v6915_v11 = vld [vmem:[#allocation11 + $0x48] sm:$0xff]  }
 0x355   :  { %4982 = vmatpush1.bf16.msra.mxu0 %v6826_v56  ;;  %3067 = vmatprep.subr.bf16.mxu1 %v6831_v57  ;;  %v6916_v56 = vld [vmem:[#allocation11 + $0x8] sm:$0xff]   ;;  %v6917_v57 = vld [vmem:[#allocation11 + $0x50] sm:$0xff]  }
 0x356   :  { %4983 = vmatprep.subr.bf16.mxu0 %v6834_v12  ;;  %v6918_v12 = vld [vmem:[#allocation11 + $0x10] sm:$0xff]  }
 0x358   :  { %3068 = vmatpush1.bf16.msra.mxu1 %v6829_v13  ;;  %v6919_v13 = vld [vmem:[#allocation11 + $0x58] sm:$0xff]  }
 0x359   :  { %4984 = vmatpush1.bf16.msra.mxu0 %v6832_v52  ;;  %3069 = vmatprep.subr.bf16.mxu1 %v6837_v38  ;;  %v6920_v52 = vld [vmem:[#allocation11 + $0x18] sm:$0xff]   ;;  %v6921_v38 = vld [vmem:[#allocation11 + $0x60] sm:$0xff]  }
 0x35a   :  { %4985 = vmatprep.subr.bf16.mxu0 %v6840_v26  ;;  %v6922_v26 = vld [vmem:[#allocation11 + $0x20] sm:$0xff]  }
 0x35c   :  { %3070 = vmatpush1.bf16.msra.mxu1 %v6835_v27  ;;  %v6924_v27 = vld [vmem:[#allocation11 + $0x28] sm:$0xff]  }
 0x35d   :  { %4986 = vmatpush1.bf16.msra.mxu0 %v6838_v30  ;;  %3071 = vmatprep.subr.bf16.mxu1 %v6843_v15  ;;  %v6925_v30 = vld [vmem:[#allocation11 + $0x70] sm:$0xff]  }
 0x35e   :  { %4998 = vmatprep.subr.bf16.mxu0 %v6846_v16  ;;  %v6926_v15 = vld [vmem:[#allocation11 + $0x30] sm:$0xff]   ;;  %v6927_v16 = vld [vmem:[#allocation11 + $0x78] sm:$0xff]  }
 0x360   :  { %4988 = vmatmul.mubr.bf16.vlgmr.msra.gmra.mrb[36].mxu0 %v7432_v51  ;;  %3072 = vmatpush1.bf16.msra.mxu1 %v6841_v19  ;;  %v6859_v51 = vld [vmem:[#allocation8 + $0x8b0] ss:$8 sps:$4 sm:$0xff]  }
 0x361   :  { %4999 = vmatpush1.bf16.msra.mxu0 %v6844_v20  ;;  %5030 = vmatprep.mubr.bf16.mxu0 %v7430_v36  ;;  %v6870_v36 = vld [vmem:[#allocation8 + $0x1144] ss:$8 sps:$4 sm:$0xff]   ;;  %v6928_v19 = vld [vmem:[#allocation11 + $0x38] sm:$0xff]  }
 0x362   :  { %3073 = vmatprep.subr.bf16.mxu1 %v6849_v21  ;;  %5000 = vmatprep.subr.bf16.mxu0 %v6852_v22 }
 0x364   :  { %3074 = vmatpush1.bf16.msra.mxu1 %v6847_v54 }
 0x365   :  { %5001 = vmatpush1.bf16.msra.mxu0 %v6850_v24  ;;  %3075 = vmatprep.subr.bf16.mxu1 %v6855_v23  ;;  %v757_v24 = vld [vmem:[#allocation10] sm:$0x3] }
 0x366   :  { %5002 = vmatprep.subr.bf16.mxu0 %v6858_v28  ;;  %v762_v23 = vrot.slane %v757_v24, %v171_v46  ;;  %v766_v28 = vrot.slane %v757_v24, %v175_v49  ;;  %v5866_v49 = vld [vmem:[#allocation13] ss:$0 sm:$0xff] }
 0x368   :  { %3076 = vmatpush1.bf16.msra.mxu1 %v6853_v0 }
 0x369   :  { %5003 = vmatpush1.bf16.msra.mxu0 %v6856_v59  ;;  %3077 = vmatprep.subr.bf16.mxu1 %v6861_v53 }
 0x36a   :  { %5004 = vmatprep.subr.bf16.mxu0 %v6864_v17 }
 0x36c   :  { %3078 = vmatpush1.bf16.msra.mxu1 %v6859_v51 }
 0x36d   :  { %5005 = vmatpush1.bf16.msra.mxu0 %v6862_v31  ;;  %3079 = vmatprep.subr.bf16.mxu1 %v6867_v35 }
 0x36e   :  { %5006 = vmatprep.subr.bf16.mxu0 %v6870_v36 }
 0x370   :  { %3080 = vmatpush1.bf16.msra.mxu1 %v6865_v41 }
 0x371   :  { %5007 = vmatpush1.bf16.msra.mxu0 %v6868_v25  ;;  %3081 = vmatprep.subr.bf16.mxu1 %v6873_v8 }
 0x372   :  { %5008 = vmatprep.subr.bf16.mxu0 %v6876_v37 }
 0x374   :  { %3082 = vmatpush1.bf16.msra.mxu1 %v6871_v39 }
 0x375   :  { %5009 = vmatpush1.bf16.msra.mxu0 %v6874_v40  ;;  %3083 = vmatprep.subr.bf16.mxu1 %v6879_v43 }
 0x376   :  { %5010 = vmatprep.subr.bf16.mxu0 %v6882_v47 }
 0x378   :  { %3084 = vmatpush1.bf16.msra.mxu1 %v6877_v50 }
 0x379   :  { %5011 = vmatpush1.bf16.msra.mxu0 %v6880_v58  ;;  %3085 = vmatprep.subr.bf16.mxu1 %v6885_v55 }
 0x37a   :  { %5012 = vmatprep.subr.bf16.mxu0 %v6888_v29 }
 0x37c   :  { %3086 = vmatpush1.bf16.msra.mxu1 %v6883_v60 }
 0x37d   :  { %5013 = vmatpush1.bf16.msra.mxu0 %v6886_v61  ;;  %5883 = vmatprep.subr.bf16.mxu1 %v6913_v10 }
 0x37e   :  { %5014 = vmatprep.subr.bf16.mxu0 %v6891_v5 }
 0x37f   :  { %3088 = vmatmul.mubr.bf16.vlgmr.msra.gmra.mrb[36].mxu1 %v7366_v42  ;;  %v6909_v42 = vld [vmem:[#allocation8 + $0x11e4] ss:$8 sps:$4 sm:$0xff]  }
 0x380   :  { %5884 = vmatpush3.bf16.msra.mxu1 %v6914_v18 }
 0x381   :  { %5015 = vmatpush1.bf16.msra.mxu0 %v6889_v6  ;;  %5885 = vmatprep.subr.bf16.mxu1 %v6915_v11 }
 0x382   :  { %5016 = vmatprep.subr.bf16.mxu0 %v6894_v62 }
 0x384   :  { %5886 = vmatpush3.bf16.msra.mxu1 %v6916_v56 }
 0x385   :  { %5017 = vmatpush1.bf16.msra.mxu0 %v6892_v63  ;;  %5887 = vmatprep.subr.bf16.mxu1 %v6917_v57 }
 0x386   :  { %5018 = vmatprep.subr.bf16.mxu0 %v6897_v1 }
 0x388   :  { %5888 = vmatpush3.bf16.msra.mxu1 %v6918_v12 }
 0x389   :  { %5019 = vmatpush1.bf16.msra.mxu0 %v6895_v2  ;;  %5889 = vmatprep.subr.bf16.mxu1 %v6919_v13 }
 0x38a   :  { %5020 = vmatprep.subr.bf16.mxu0 %v6900_v32 }
 0x38c   :  { %5890 = vmatpush3.bf16.msra.mxu1 %v6920_v52 }
 0x38d   :  { %5021 = vmatpush1.bf16.msra.mxu0 %v6898_v3  ;;  %5891 = vmatprep.subr.bf16.mxu1 %v6921_v38 }
 0x38e   :  { %5022 = vmatprep.subr.bf16.mxu0 %v6903_v34 }
 0x390   :  { %5892 = vmatpush3.bf16.msra.mxu1 %v6922_v26 }
 0x391   :  { %5023 = vmatpush1.bf16.msra.mxu0 %v6901_v4 }
 0x392   :  { %5024 = vmatprep.subr.bf16.mxu0 %v6906_v44 }
 0x395   :  { %5025 = vmatpush1.bf16.msra.mxu0 %v6904_v48 }
 0x396   :  { %5026 = vmatprep.subr.bf16.mxu0 %v6909_v42 }
 0x399   :  { %5027 = vmatpush1.bf16.msra.mxu0 %v6907_v7 }
 0x39a   :  { %5028 = vmatprep.subr.bf16.mxu0 %v6912_v9 }
 0x39d   :  { %5029 = vmatpush1.bf16.msra.mxu0 %v6910_v33 }
 0x3a0   :  { %5031 = vmatmul.mubr.bf16.vlgmr.msra.gmra.mrb[36].mxu0 %v7427_v14  ;;  %v6923_v14 = vld [vmem:[#allocation11 + $0x68] sm:$0xff]  }
 0x3a1   :  { %5893 = vmatprep.subr.bf16.mxu1 %v6923_v14 }
 0x3a2   :  { %5894 = vmatpush3.bf16.msra.mxu1 %v6924_v27 }
 0x3a3   :  { %5895 = vmatprep.subr.bf16.mxu1 %v6925_v30 }
 0x3a6   :  { %5896 = vmatpush3.bf16.msra.mxu1 %v6926_v15 }
 0x3a7   :  { %5897 = vmatprep.subr.bf16.mxu1 %v6927_v16 }
 0x3aa   :  { %5898 = vmatpush3.bf16.msra.mxu1 %v6928_v19 }
 0x452   :  { %v3089_v20 = vpop.f32.mrb[36].mxu1 }
 0x453   :  { %v3091_v21 = vpop.f32.mrb[37].mxu1  ;;  %v5905_v0 = vadd.f32 %v3089_v20, %v762_v23 }
 0x454   :  { %v3093_v22 = vpop.f32.mrb[38].mxu1  ;;  %v5907_v59 = vadd.f32 %v3091_v21, %v766_v28 }
 0x455   :  { %v3095_v54 = vpop.f32.mrb[39].mxu1  ;;  %v5909_v17 = vadd.f32 %v3093_v22, %v762_v23 }
 0x456   :  { %v5911_v35 = vadd.f32 %v3095_v54, %v766_v28 }
 0x473   :  { %v5032_v53 = vpop.f32.mrb[36].mxu0 }
 0x474   :  { %v5906_v51 = vadd.f32 %v5905_v0, %v5032_v53  ;;  %v5034_v31 = vpop.f32.mrb[37].mxu0 }
 0x475   :  { %v5908_v36 = vadd.f32 %v5907_v59, %v5034_v31  ;;  %v5036_v41 = vpop.f32.mrb[38].mxu0 }
 0x476   :  { %v5910_v25 = vadd.f32 %v5909_v17, %v5036_v41  ;;  %v5038_v8 = vpop.f32.mrb[39].mxu0  ;;  %v5045_v39 = vmax.f32 %v5906_v51, 0.0 }
 0x477   :  { %v5912_v37 = vadd.f32 %v5911_v35, %v5038_v8  ;;  %v5046_v43 = vmax.f32 %v5908_v36, 0.0 }
 0x478   :  { %v5047_v40 = vmax.f32 %v5910_v25, 0.0 }
 0x479   :  { %v5048_v47 = vmax.f32 %v5912_v37, 0.0 }
 0x47a   :  { %v5049_v46 = vpack.c.bf16 %v5047_v40, %v5045_v39 }
 0x47b   :  { %v5050_v50 = vpack.c.bf16 %v5048_v47, %v5046_v43 }
 0x47d   :  { %5218 = vmatprep.mubr.bf16.mxu1 %v5050_v50 }
 0x47e   :  { %5219 = vmatmul.mubr.bf16.vlgmr.msra.gmra.mrb[40].mxu1 %v5049_v46 }
 0x551   :  { %v5899_v45 = vpop.f32.mrb[40].mxu1 }
 0x552   :  { %v5900_v58 = vpop.f32.mrb[41].mxu1 }
 0x553   :  { %v5901_v55 = vadd.f32 %v5900_v58, %v5899_v45  ;;  %v5902_v29 = vpop.f32.mrb[42].mxu1 }
 0x554   :  { %v5903_v60 = vpop.f32.mrb[43].mxu1 }
 0x555   :  { %v5221_v61 = vadd.f32 %v5901_v55, %v5866_v49  ;;  %v5904_v5 = vadd.f32 %v5903_v60, %v5902_v29 }
 0x557   :  { %5227 = vst [vmem:[#allocation14] sm:$0xff] %v5221_v61  ;;  %v5224_v6 = vadd.f32 %v5904_v5, %v5866_v49 }
 0x559   :  { %5228 = vst [vmem:[#allocation14 + $0x8] sm:$0xff] %v5224_v6 }
 0x55a   :  { %7094 = shalt.err (!%p7091_p4)
}
 0x55b   :  { %s7095_s17 = scalar_lea.hbm %s7488_s7, 256 }
 0x55c   :  { %p7096_p5 = scmp.ne.s32.totalorder %s7488_s7, %s7095_s17  ;;  %p7099_p6 = scmp.lt.u32.totalorder %s7095_s17, %s7488_s7 }
 0x55e   :  { %p7101_p7 = pnand %p7099_p6, %p7096_p5 }
 0x560   :  { %7104 = shalt.err (!%p7101_p7)
}
 0x561   :  { %5240 = dma.vmem_to_hbm [thread:$0]  %s5235_s19, 256, %s7488_s7, [#allocation4], %s7119_s1, %s7119_s1, %s7120_s25  }
 0x562   :  { %7113 = dma.done.wait [#allocation4], 256  }
 0x563   :  { %7114 = vsyncadd [#allocation4], 4294967040 }
 0x564   :  { %5244 = vsyncpa [#allocation3], 1 }
 0x565   :  { %5245 = vsyncpa [#allocation6], 1 }
 0x566   :  { %5246 = vsyncpa [#allocation9], 1 }
 0x567   :  { %5247 = vsyncpa [#allocation12], 1 }
 0x568   :  { %5248 = vsyncpa [#allocation4], 1 }

</bundles_post_ra>
